<compile_context>
chip_gen: v7x
topology: tpu7x:2x2x1
jax: 0.10.0
libtpu: 0.0.40
codegen_flags: <defaults>
</compile_context>

<pallas_src>
import functools

import jax
import jax.numpy as jnp
from jax.experimental import pallas as pl
from jax.experimental.pallas import tpu as pltpu


def gat_kernel(item_ref, ent_ref, adj_ref, c_ref, out_ref, *, alpha, chunks):
    """One [tn]-row tile of GraphAttentionLayer.forward."""
    tn, _, f_in = ent_ref.shape

    c = c_ref[...]                                          # [F_in, 2] f32: [W@a1 | W@a2]
    item = item_ref[...].astype(jnp.float32)                # [tn, F_in]

    # item . (W a1): one small MXU matmul; column 0 of the folded coefficients.
    e_item = jnp.dot(item, c, preferred_element_type=jnp.float32)[:, 0:1]  # [tn, 1]
    e_item = e_item[:, :, None]                             # [tn, 1, 1] (hoisted)

    m_run = jnp.full((tn, 1, 1), -jnp.inf, dtype=jnp.float32)
    l_run = jnp.zeros((tn, 1, 1), dtype=jnp.float32)
    acc = jnp.zeros((tn, 1, f_in), dtype=jnp.float32)

    # Online softmax over <= 4 static, sublane-aligned chunks of the entity
    # axis; each chunk is loaded & cast once and reused for logits + weighting.
    for s, t in chunks:
        mc = t - s
        ent_c = ent_ref[:, s:t, :].astype(jnp.float32)      # [tn, mc, F_in]
        adj_c = adj_ref[:, s:t][:, :, None]                 # [tn, mc, 1]

        # ent . (W a2) on the MXU (column 1); free leading-dim split back to 3D.
        logits = jnp.dot(ent_c.reshape(tn * mc, f_in), c,
                         preferred_element_type=jnp.float32)       # [tn*mc, 2]
        e = e_item + logits.reshape(tn, mc, 2)[:, :, 1:2]          # [tn, mc, 1]
        e = jnp.where(e > 0, e, alpha * e)                         # LeakyReLU(alpha)
        e = jnp.where(adj_c > 0, e, -9.0e15)                       # adjacency mask

        m_new = jnp.maximum(m_run, jnp.max(e, axis=1, keepdims=True))  # [tn, 1, 1]
        scale = jnp.exp(m_run - m_new)
        p = jnp.exp(e - m_new)                                     # [tn, mc, 1]
        l_run = scale * l_run + jnp.sum(p, axis=1, keepdims=True)
        acc = scale * acc + jnp.sum(p * ent_c, axis=1, keepdims=True)  # [tn, 1, F_in]
        m_run = m_new

    # Exact softmax normalisation (review: no approx reciprocal here).
    weighted = acc[:, 0, :] / l_run[:, 0, :]                # [tn, F_in]
    # TODO(synk): attention dropout omitted (p=dropout, eval mode -> identity).
    h = weighted + item                                     # residual
    out_ref[...] = jnp.where(h > 0, h, jnp.exp(h) - 1.0).astype(out_ref.dtype)  # ELU


def _cdiv(a, b):
    return -(-a // b)


def graph_attention_layer(item_embs, entity_embs, adj, W, a, *, alpha,
                          stream_dtype=jnp.bfloat16, tile_rows=None):
    """Pallas TPU implementation of GraphAttentionLayer.forward.

    `a` is folded into `W` once (exact: no nonlinearity sits between the W
    matmul and the dot with `a`), so the kernel never forms Wh/We and is a
    single bf16 HBM stream over entity_embs.
    """
    N, F_in = item_embs.shape
    _, M, _ = entity_embs.shape
    F_out = W.shape[1]
    out_dtype = item_embs.dtype
    hi = jax.lax.Precision.HIGHEST      # keep the fold f32-exact on TPU backends

    Wf = W.astype(jnp.float32)
    af = a.astype(jnp.float32)
    c = jnp.concatenate([jnp.matmul(Wf, af[:F_out], precision=hi),
                         jnp.matmul(Wf, af[F_out:], precision=hi)], axis=1)  # [F_in, 2]

    # Stream both embedding inputs as bf16 (dominant HBM bytes halved);
    # the kernel upcasts to f32 internally.
    item_s = item_embs.astype(stream_dtype)
    ent_s = entity_embs.astype(stream_dtype)
    adj_s = adj.astype(jnp.float32)

    # Pad the entity axis to a multiple of 8 so chunk boundaries stay
    # sublane-aligned; padded entries have adj == 0 and are masked out.
    # TODO(synk): a row whose original adjacency is all zeros degenerates to a
    # uniform 1/M attention (same -9e15 masking as the reference); with M
    # padded that mean is over Mp instead of M.
    Mp = max(8, _cdiv(M, 8) * 8)
    if Mp != M:
        ent_s = jnp.pad(ent_s, ((0, 0), (0, Mp - M), (0, 0)))
        adj_s = jnp.pad(adj_s, ((0, 0), (0, Mp - M)))

    # ---- tiling over N: ~4 MiB entity tile, <= 512 rows, even >= 2-step grid ----
    ent_bytes = jnp.dtype(stream_dtype).itemsize
    row_bytes = Mp * F_in * ent_bytes
    if tile_rows is None:
        tn_cap = max(8, min(512, ((4 << 20) // row_bytes) // 8 * 8))
    else:
        tn_cap = max(8, (tile_rows // 8) * 8)
    g = _cdiv(N, tn_cap)
    if N > 8:
        g = max(g, 2)
        g += g % 2                      # even #tiles -> clean 2-TensorCore split (v7x)
    tn = _cdiv(_cdiv(N, g), 8) * 8
    Np = tn * g
    if Np != N:                         # padded rows: zero embs, adj==0 -> output 0
        item_s = jnp.pad(item_s, ((0, Np - N), (0, 0)))
        ent_s = jnp.pad(ent_s, ((0, Np - N), (0, 0), (0, 0)))
        adj_s = jnp.pad(adj_s, ((0, Np - N), (0, 0)))

    # <= 4 sublane-aligned chunks of the entity axis (bounds f32 temporaries).
    m_chunk = min(Mp, max(8, _cdiv(_cdiv(Mp, 4), 8) * 8))
    chunks = tuple((s, min(s + m_chunk, Mp)) for s in range(0, Mp, m_chunk))

    # Explicit scoped-VMEM budget (v5e default is only 16 MiB; v7x physical 64 MiB).
    per_buf = (tn * Mp * F_in * ent_bytes           # entity tile
               + tn * F_in * ent_bytes              # item tile
               + tn * max(Mp, 128) * 4              # adjacency tile (lane padded)
               + tn * F_in * jnp.dtype(out_dtype).itemsize
               + 128 * 2 * 4)
    temps = 2 * tn * m_chunk * F_in * 4 + 8 * tn * F_in * 4
    vmem_limit = int(min(64 << 20, max(32 << 20, 2 * per_buf + temps + (8 << 20))))

    kernel = functools.partial(gat_kernel, alpha=float(alpha), chunks=chunks)
    out = pl.pallas_call(
        kernel,
        out_shape=jax.ShapeDtypeStruct((Np, F_in), out_dtype),
        grid_spec=pltpu.PrefetchScalarGridSpec(
            num_scalar_prefetch=0,
            grid=(g,),
            in_specs=[
                pl.BlockSpec((tn, F_in), lambda i: (i, 0)),         # item tile
                pl.BlockSpec((tn, Mp, F_in), lambda i: (i, 0, 0)),  # entity tile
                pl.BlockSpec((tn, Mp), lambda i: (i, 0)),           # adjacency tile
                pl.BlockSpec((F_in, 2), lambda i: (0, 0)),          # folded [W@a1 | W@a2]
            ],
            out_specs=pl.BlockSpec((tn, F_in), lambda i: (i, 0)),
        ),
        compiler_params=pltpu.CompilerParams(
            dimension_semantics=("parallel",),
            vmem_limit_bytes=vmem_limit),
    )(item_s, ent_s, adj_s, c)
    return out[:N] if Np != N else out


def _xavier_uniform(key, shape, gain):
    fan_in, fan_out = shape
    limit = gain * (6.0 / (fan_in + fan_out)) ** 0.5
    return jax.random.uniform(key, shape, jnp.float32, -limit, limit)


def _reference(item, ent, adj, W, a, alpha):
    """Pure-JAX mirror of GraphAttentionLayer.forward (eval, concat=True)."""
    hi = jax.lax.Precision.HIGHEST
    Wh = jnp.matmul(item, W, precision=hi)
    We = jnp.matmul(ent, W, precision=hi)
    a_input = jnp.concatenate(
        [jnp.broadcast_to(Wh[:, None, :], We.shape), We], axis=-1)
    e = jnp.matmul(a_input, a, precision=hi)[..., 0]
    e = jnp.where(e > 0, e, alpha * e)
    att = jnp.where(adj > 0, e, -9.0e15)
    att = jax.nn.softmax(att, axis=1)
    weighted = jnp.einsum('nm,nmf->nf', att, ent, precision=hi)
    h = weighted + item
    return jnp.where(h > 0, h, jnp.exp(h) - 1.0)


if __name__ == "__main__":
    # Lane/sublane-friendly small problem: F_in multiple of 128, M multiple of 8.
    N, M = 64, 8
    in_features, out_features = 128, 32
    alpha = 0.2          # LeakyReLU negative slope; dropout=0.0 (eval) -> identity

    key = jax.random.PRNGKey(0)
    k_w, k_a, k_item, k_ent, k_adj = jax.random.split(key, 5)

    # Parameters (xavier_uniform_, gain=1.414), built in-script.
    W = _xavier_uniform(k_w, (in_features, out_features), gain=1.414)
    a = _xavier_uniform(k_a, (2 * out_features, 1), gain=1.414)
    # NOTE: self.fc is only used by forward_relation, not forward -> omitted.

    item_embs = jax.random.normal(k_item, (N, in_features), jnp.float32)
    entity_embs = jax.random.normal(k_ent, (N, M, in_features), jnp.float32)
    adj = (jax.random.uniform(k_adj, (N, M)) > 0.3).astype(jnp.float32)
    adj = adj.at[:, 0].set(1.0)      # ensure every row has at least one edge

    out = graph_attention_layer(item_embs, entity_embs, adj, W, a, alpha=alpha)
    out = jax.block_until_ready(out)
    assert out.shape == (N, in_features)
    assert out.dtype == item_embs.dtype

    # The kernel streams the embeddings as bf16 (storage-precision choice, per
    # the review); validate against the f32 reference evaluated on the *same*
    # bf16-rounded inputs so the check isolates kernel math from storage dtype.
    item_q = item_embs.astype(jnp.bfloat16).astype(jnp.float32)
    ent_q = entity_embs.astype(jnp.bfloat16).astype(jnp.float32)
    ref = _reference(item_q, ent_q, adj, W, a, alpha)
    err = float(jnp.max(jnp.abs(out - ref)))
    assert jnp.allclose(out, ref, rtol=2e-3, atol=2e-3), (
        f"mismatch vs reference: max abs err {err}")
    print("KERNEL_OK")
</pallas_src>

<mosaic_0001>
module attributes {stable_mosaic.version = 11 : i64} {
  func.func @gat_kernel(%arg0: i32, %arg1: memref<32x128xbf16, #tpu.memory_space<vmem>>, %arg2: memref<32x8x128xbf16, #tpu.memory_space<vmem>>, %arg3: memref<32x8xf32, #tpu.memory_space<vmem>>, %arg4: memref<128x2xf32, #tpu.memory_space<vmem>>, %arg5: memref<32x128xf32, #tpu.memory_space<vmem>>) attributes {dimension_semantics = [#tpu.dimension_semantics<parallel>], iteration_bounds = array<i64: 2>, scalar_prefetch = 0 : i64, scratch_operands = 0 : i64, tpu.core_type = #tpu.core_type<tc>, window_params = [{transform_indices = @transform_0, window_bounds = array<i64: 32, 128>}, {transform_indices = @transform_1, window_bounds = array<i64: 32, 8, 128>}, {transform_indices = @transform_2, window_bounds = array<i64: 32, 8>}, {pipeline_mode = #tpu.pipeline_mode<synchronous>, transform_indices = @transform_3, window_bounds = array<i64: 128, 2>}, {transform_indices = @transform_4, window_bounds = array<i64: 32, 128>}]} {
    %c0 = arith.constant 0 : index
    %c0_0 = arith.constant 0 : index
    %0 = vector.load %arg4[%c0, %c0_0] : memref<128x2xf32, #tpu.memory_space<vmem>>, vector<128x2xf32>
    %c0_1 = arith.constant 0 : index
    %c0_2 = arith.constant 0 : index
    %1 = vector.load %arg1[%c0_1, %c0_2] : memref<32x128xbf16, #tpu.memory_space<vmem>>, vector<32x128xbf16>
    %2 = arith.extf %1 : vector<32x128xbf16> to vector<32x128xf32>
    %cst = arith.constant dense<0.000000e+00> : vector<32x2xf32>
    %3 = tpu.matmul %2, %0, %cst {dimension_numbers = #tpu.dot_dimension_numbers<[1], [0], [0], [1], [0, 0, 1, 1], [], []>} : vector<32x128xf32>, vector<128x2xf32>, vector<32x2xf32> -> vector<32x2xf32>
    %4 = vector.extract_strided_slice %3 {offsets = [0, 0], sizes = [32, 1], strides = [1, 1]} : vector<32x2xf32> to vector<32x1xf32>
    %5 = vector.shape_cast %4 : vector<32x1xf32> to vector<32x1x1xf32>
    %cst_3 = arith.constant 0xFF800000 : f32
    %6 = vector.broadcast %cst_3 : f32 to vector<32x1x1xf32>
    %cst_4 = arith.constant 0.000000e+00 : f32
    %7 = vector.broadcast %cst_4 : f32 to vector<32x1x1xf32>
    %cst_5 = arith.constant 0.000000e+00 : f32
    %8 = vector.broadcast %cst_5 : f32 to vector<32x1x128xf32>
    %c0_6 = arith.constant 0 : index
    %c0_7 = arith.constant 0 : index
    %c0_8 = arith.constant 0 : index
    %9 = vector.load %arg2[%c0_6, %c0_7, %c0_8] : memref<32x8x128xbf16, #tpu.memory_space<vmem>>, vector<32x8x128xbf16>
    %10 = arith.extf %9 : vector<32x8x128xbf16> to vector<32x8x128xf32>
    %c0_9 = arith.constant 0 : index
    %c0_10 = arith.constant 0 : index
    %11 = vector.load %arg3[%c0_9, %c0_10] : memref<32x8xf32, #tpu.memory_space<vmem>>, vector<32x8xf32>
    %12 = vector.shape_cast %11 : vector<32x8xf32> to vector<32x8x1xf32>
    %13 = vector.shape_cast %10 : vector<32x8x128xf32> to vector<256x128xf32>
    %cst_11 = arith.constant dense<0.000000e+00> : vector<256x2xf32>
    %14 = tpu.matmul %13, %0, %cst_11 {dimension_numbers = #tpu.dot_dimension_numbers<[1], [0], [0], [1], [0, 0, 1, 1], [], []>} : vector<256x128xf32>, vector<128x2xf32>, vector<256x2xf32> -> vector<256x2xf32>
    %15 = vector.shape_cast %14 : vector<256x2xf32> to vector<32x8x2xf32>
    %16 = vector.extract_strided_slice %15 {offsets = [0, 0, 1], sizes = [32, 8, 1], strides = [1, 1, 1]} : vector<32x8x2xf32> to vector<32x8x1xf32>
    %17 = vector.broadcast %5 : vector<32x1x1xf32> to vector<32x8x1xf32>
    %18 = arith.addf %17, %16 : vector<32x8x1xf32>
    %cst_12 = arith.constant 0.000000e+00 : f32
    %19 = vector.broadcast %cst_12 : f32 to vector<32x8x1xf32>
    %20 = arith.cmpf ogt, %18, %19 : vector<32x8x1xf32>
    %cst_13 = arith.constant 2.000000e-01 : f32
    %21 = vector.broadcast %cst_13 : f32 to vector<32x8x1xf32>
    %22 = arith.mulf %21, %18 : vector<32x8x1xf32>
    %23 = arith.select %20, %18, %22 : vector<32x8x1xi1>, vector<32x8x1xf32>
    %cst_14 = arith.constant 0.000000e+00 : f32
    %24 = vector.broadcast %cst_14 : f32 to vector<32x8x1xf32>
    %25 = arith.cmpf ogt, %12, %24 : vector<32x8x1xf32>
    %cst_15 = arith.constant -9.000000e+15 : f32
    %26 = vector.broadcast %cst_15 : f32 to vector<32x8x1xf32>
    %27 = arith.select %25, %23, %26 : vector<32x8x1xi1>, vector<32x8x1xf32>
    %cst_16 = arith.constant dense<0xFF800000> : vector<32x1xf32>
    %28 = vector.multi_reduction <maximumf>, %27, %cst_16 [1] : vector<32x8x1xf32> to vector<32x1xf32>
    %29 = vector.shape_cast %28 : vector<32x1xf32> to vector<32x1x1xf32>
    %30 = arith.maximumf %6, %29 : vector<32x1x1xf32>
    %31 = arith.subf %6, %30 : vector<32x1x1xf32>
    %32 = math.exp %31 : vector<32x1x1xf32>
    %33 = vector.broadcast %30 : vector<32x1x1xf32> to vector<32x8x1xf32>
    %34 = arith.subf %27, %33 : vector<32x8x1xf32>
    %35 = math.exp %34 : vector<32x8x1xf32>
    %36 = arith.mulf %32, %7 : vector<32x1x1xf32>
    %cst_17 = arith.constant dense<0.000000e+00> : vector<32x1xf32>
    %37 = vector.multi_reduction <add>, %35, %cst_17 [1] : vector<32x8x1xf32> to vector<32x1xf32>
    %38 = vector.shape_cast %37 : vector<32x1xf32> to vector<32x1x1xf32>
    %39 = arith.addf %36, %38 : vector<32x1x1xf32>
    %40 = vector.broadcast %32 : vector<32x1x1xf32> to vector<32x1x128xf32>
    %41 = arith.mulf %40, %8 : vector<32x1x128xf32>
    %42 = vector.broadcast %35 : vector<32x8x1xf32> to vector<32x8x128xf32>
    %43 = arith.mulf %42, %10 : vector<32x8x128xf32>
    %cst_18 = arith.constant dense<0.000000e+00> : vector<32x128xf32>
    %44 = vector.multi_reduction <add>, %43, %cst_18 [1] : vector<32x8x128xf32> to vector<32x128xf32>
    %45 = vector.shape_cast %44 : vector<32x128xf32> to vector<32x1x128xf32>
    %46 = arith.addf %41, %45 : vector<32x1x128xf32>
    %47 = vector.shape_cast %46 : vector<32x1x128xf32> to vector<32x128xf32>
    %48 = vector.shape_cast %39 : vector<32x1x1xf32> to vector<32x1xf32>
    %49 = vector.broadcast %48 : vector<32x1xf32> to vector<32x128xf32>
    %50 = arith.divf %47, %49 : vector<32x128xf32>
    %51 = arith.addf %50, %2 : vector<32x128xf32>
    %cst_19 = arith.constant 0.000000e+00 : f32
    %52 = vector.broadcast %cst_19 : f32 to vector<32x128xf32>
    %53 = arith.cmpf ogt, %51, %52 : vector<32x128xf32>
    %54 = math.exp %51 : vector<32x128xf32>
    %cst_20 = arith.constant 1.000000e+00 : f32
    %55 = vector.broadcast %cst_20 : f32 to vector<32x128xf32>
    %56 = arith.subf %54, %55 : vector<32x128xf32>
    %57 = arith.select %53, %51, %56 : vector<32x128xi1>, vector<32x128xf32>
    %c0_21 = arith.constant 0 : index
    %c0_22 = arith.constant 0 : index
    %58 = vector.load %arg5[%c0_21, %c0_22] : memref<32x128xf32, #tpu.memory_space<vmem>>, vector<32x128xf32>
    tpu.vector_store %arg5[%c0_21, %c0_22], %57 {strides = array<i32>} : memref<32x128xf32, #tpu.memory_space<vmem>>, vector<32x128xf32>,
    return
  }
  func.func @transform_0(%arg0: i32) -> (i32, i32) {
    %c0_i32 = arith.constant 0 : i32
    %c0_i32_0 = arith.constant 0 : i32
    return %arg0, %c0_i32 : i32, i32
  }
  func.func @transform_1(%arg0: i32) -> (i32, i32, i32) {
    %c0_i32 = arith.constant 0 : i32
    %c0_i32_0 = arith.constant 0 : i32
    %c0_i32_1 = arith.constant 0 : i32
    return %arg0, %c0_i32, %c0_i32_0 : i32, i32, i32
  }
  func.func @transform_2(%arg0: i32) -> (i32, i32) {
    %c0_i32 = arith.constant 0 : i32
    %c0_i32_0 = arith.constant 0 : i32
    return %arg0, %c0_i32 : i32, i32
  }
  func.func @transform_3(%arg0: i32) -> (i32, i32) {
    %c0_i32 = arith.constant 0 : i32
    %c0_i32_0 = arith.constant 0 : i32
    %c0_i32_1 = arith.constant 0 : i32
    return %c0_i32, %c0_i32_0 : i32, i32
  }
  func.func @transform_4(%arg0: i32) -> (i32, i32) {
    %c0_i32 = arith.constant 0 : i32
    %c0_i32_0 = arith.constant 0 : i32
    return %arg0, %c0_i32 : i32, i32
  }
}

</mosaic_0001>

<bundles_post_ra>
// kernel: tpu_custom_call.1
= control target key start
LH: loop header
LB: loop body
LE: loop exit
PB: predicated region body
PF: predicated region fallthrough
CT: control target
= control target key end

     0   :  { %9 = vsyncpa [#allocation3], 0  ;;  %s6336_s0 = inlined_call_operand.vmem [shape: bf16[64,128], index: 0, kind: input, shape index: {}]   ;;  %s6337_s1 = inlined_call_operand.hbm [shape: bf16[64,8,128], index: 1, kind: input, shape index: {}]   ;;  %s6338_s2 = inlined_call_operand.vmem [shape: f32[64,8], index: 2, kind: input, shape index: {}]   ;;  %s6339_s3 = inlined_call_operand.vmem [shape: f32[128,2], index: 3, kind: input, shape index: {}]   ;;  %s6340_s4 = inlined_call_operand.hbm [shape: f32[64,128], index: 4, kind: output, shape index: {}]  }
   0x1   :  { %11 = vsyncpa [#allocation3 + $0x1], 0 }
   0x2   :  { %12 = vsyncpa [#allocation4], 0 }
   0x3   :  { %14 = vsyncpa [#allocation4 + $0x1], 0  ;;  %s4424_s15 = smov 0   ;;  %s4426_s16 = smov 0  }
   0x4   :  { %s4428_s17 = smov 0   ;;  %s4430_s18 = smov 0  }
   0x5 LB: > { %s4445_s19 = sadd.s32 4294967295, %s4388_s18   ;;  %s3575_s20 = sadd.s32 4294967294, %s4388_s18   ;;  %s4388_s18 = sphi %s4430_s18, %s6590_s18   ;;  %s4384_s17 = sphi %s4428_s17, %s6589_s17   ;;  %s4380_s16 = sphi %s4426_s16, %s6588_s16   ;;  %s4376_s15 = sphi %s4424_s15, %s6587_s15  }
   0x6   : > { %s4449_s21 = sadd.s32 1, %s4388_s18   ;;  %s53_s22 = sadd.s32 1, %s4384_s17 }
   0x7   : > { %s50_s23 = ssub.s32 %s4388_s18, %s4449_s21  ;;  %p60_p0 = scmp.ne.s32.totalorder %s4384_s17, %s4380_s16 }
   0x8   : > { %p51_p1 = scmp.eq.s32.totalorder %s50_s23, 0  ;;  %p61_p2 = scmp.eq.s32.totalorder %s4388_s18, 0 }
   0x9   : > { %p66_p3 = scmp.ne.s32.totalorder %s4380_s16, %s4376_s15  ;;  %p67_p4 = scmp.eq.s32.totalorder %s4445_s19, 0 }
   0xa   : > { %s4461_s24 = scalar_select %p51_p1, %s4384_s17, %s53_s22  }
   0xb   : > { %p4463_p5 = por %p61_p2, %p60_p0  ;;  %p4467_p6 = por %p67_p4, %p66_p3 }
   0xc   : > { %p137_p7 = scmp.eq.s32.totalorder %s4445_s19, 1  ;;  %p143_p8 = scmp.eq.s32.totalorder %s3575_s20, 1 }
   0xd   : > { %p3993_p10 = scmp.lt.s32.totalorder %s4388_s18, 2  ;;  %s175_s29 = sand.u32 1, %s4384_s17  }
   0xe   : > { %p4474_p11 = por %p137_p7, %p60_p0  ;;  %p4478_p12 = por %p143_p8, %p66_p3 }
   0xf   : > { %s3625_s30 = sshll.u32 %s4388_s18, 11  ;;  %s3578_s5 = sshll.u32 %s175_s29, 7 }
  0x10   : > { %s6438_s27 = scalar_select %p4474_p11, 1, 0 }
  0x11   : > { %s6439_s28 = scalar_select %p4478_p12, 1, 0 }
  0x12   : > { %s4487_s8 = scalar_lea.hbm %s6337_s1, %s3625_s30  ;;  %s179_s9 = scalar_lea.vmem [#allocation2], %s3578_s5 }
  0x13   : > { %s186_s10 = sshll.u32 %s179_s9, 4  ;;  %p4491_p13 = pnand %p3993_p10, %p4463_p5  ;;  %s4495_s10 = int_to_ptr.vmem [resolvable:$true] %s186_s10 }
  0x14   : > { %s4497_s12 = scalar_lea.sflag [#allocation3], %s175_s29  ;;  %s4292_s13 = scalar_lea.hbm %s4487_s8, 2048 }
  0x15   : > { %p4293_p0 = scmp.ne.s32.totalorder %s4487_s8, %s4292_s13  ;;  %p4294_p1 = pneg %p4491_p13 }
  0x16   : > { %s4297_s22 = scalar_lea.hbm %s6337_s1, 4096  ;;  %p4298_p4 = scmp.lt.u32.totalorder %s4487_s8, %s6337_s1 }
  0x17   : > { %p4295_p2 = pnand %p4294_p1, %p4293_p0  ;;  %p4299_p5 = scmp.lt.u32.totalorder %s4297_s22, %s4292_s13 }
  0x18   : > { %p4301_p8 = scmp.lt.u32.totalorder %s4292_s13, %s4487_s8 }
  0x19   : > { %p4296_p3 = pneg %p4295_p2  ;;  %p4300_p7 = por %p4299_p5, %p4298_p4 }
  0x1b   : > { %p4302_p10 = por %p4301_p8, %p4300_p7 }
  0x1d   : > { %p4303_p9 = pnand %p4302_p10, %p4296_p3 }
  0x1f   : > { %4306 = shalt.err (!%p4303_p9)
}
  0x20   : > { %s4307_s29 = scalar_lea.vmem %s4495_s10, 2048  ;;  %s4390_s30 = smov [#allocation2]  }
  0x21   : > { %p4308_p0 = scmp.ne.s32.totalorder %s4495_s10, %s4307_s29  ;;  %s4312_s5 = sshll.u32 %s4390_s30, 4  ;;  %s4313_s5 = int_to_ptr.vmem [resolvable:$false] %s4312_s5 }
  0x22   : > { %s4314_s6 = scalar_lea.vmem %s4313_s5, 4096  ;;  %p4315_p11 = scmp.lt.s32.totalorder %s4495_s10, %s4313_s5 }
  0x23   : > { %p4310_p2 = pnand %p4308_p0, %p4294_p1  ;;  %p4316_p4 = scmp.lt.s32.totalorder %s4314_s6, %s4307_s29 }
  0x25   : > { %p4311_p12 = pneg %p4310_p2  ;;  %p4317_p5 = por %p4316_p4, %p4315_p11 }
  0x27   : > { %p4318_p7 = pnand %p4317_p5, %p4311_p12 }
  0x29   : > { %4321 = shalt.err (!%p4318_p7)
}
  0x2a   : > { %s4391_s7 = smov 64   ;;  %s4392_s9 = smov 4  }
  0x2b   : > { %3988 = dma.hbm_to_vmem [thread:$0]  (!%p4491_p13), %s4487_s8, 2048, %s4495_s10, %s4497_s12, %s4391_s7, %s4391_s7, %s4392_s9  }
  0x2c   : > { %p3581_p9 = scmp.ge.s32.totalorder %s4388_s18, 1  ;;  %p203_p1 = scmp.lt.s32.totalorder %s4388_s18, 3 }
  0x2e   : > { %p204_p3 = pnand %p3581_p9, %p203_p1 }
  0x30   : > { %207 = sbr.rel (%p204_p3) target bundleno = 902 (0x386), region = 36 }
  0x37   : > { %s4528_s13 = sand.u32 1, %s4380_s16  }
  0x38   : > { %s3582_s14 = sshll.u32 %s4528_s13, 7  ;;  %s210_s20 = scalar_lea.sflag [#allocation3], %s4528_s13 }
  0x39   : > { %s4532_s22 = scalar_lea.vmem [#allocation2], %s3582_s14 }
  0x3a   : > { %4367 = dma.done.wait (%p4467_p6), %s210_s20, 2048  }
  0x3b   : > { %4369 = vsyncadd (%p4467_p6), %s210_s20, 4294965248  ;;  %s3584_s8 = sshll.u32 %s4445_s19, 2  ;;  %v262_v0 = vld [vmem:[%s6339_s3] sm:$0xff]  ;;  %v263_v1 = vld [vmem:[%s6339_s3 + $0x8] sm:$0xff]  ;;  %v379_v8 = vlaneseq  ;;  %vm1568_vm1 = vcmask 7168   ;;  %s3626_s14 = sshll.u32 %s4445_s19, 9 }
  0x3c   : > { %p249_p11 = scmp.lt.s32.totalorder %s3584_s8, 7  ;;  %v264_v2 = vld [vmem:[%s6339_s3 + $0x10] sm:$0xff]  ;;  %v4551_v3 = vpack.c.bf16 %v263_v1, %v262_v0  ;;  %v265_v4 = vld [vmem:[%s6339_s3 + $0x18] sm:$0xff]  ;;  %v266_v6 = vld [vmem:[%s6339_s3 + $0x20] sm:$0xff]  ;;  %s6285_s19 = scalar_lea.hbm %s6340_s4, %s3626_s14 }
  0x3d   : > { %v4556_v5 = vpack.c.bf16 %v265_v4, %v264_v2  ;;  %v267_v7 = vld [vmem:[%s6339_s3 + $0x28] sm:$0xff]  ;;  %v4578_v10 = vld [vmem:[%s4532_s22 + $0x20] sm:$0xff]   ;;  %v268_v12 = vld [vmem:[%s6339_s3 + $0x30] sm:$0xff]  ;;  %v4594_v16 = vshrl.u32 %v379_v8, 7  ;;  %s3465_s23 = scalar_lea.sflag [#allocation4], %s4528_s13  ;;  %p6584_p12 = scmp.ne.s32.totalorder %s6438_s27, 0 }
  0x3e   : > { %s6592_s8 = smov (!%p249_p11, %s3584_s8), 7  ;;  %3902 = vmatprep.subr.bf16.mxu0 %v4551_v3  ;;  %3965 = vmatprep.subr.bf16.mxu1 %v4551_v3  ;;  %v4575_v9 = vpack.c.bf16 %v267_v7, %v266_v6  ;;  %6441 = vst [vmem:[#allocation8_spill] sm:$0xff] %v4578_v10  ;;  %v269_v13 = vld [vmem:[%s6339_s3 + $0x38] sm:$0xff]  ;;  %v6372_v14 = vunpack.c.l.bf16 %v4578_v10  ;;  %v270_v18 = vld [vmem:[%s6339_s3 + $0x40] sm:$0xff]  ;;  %v271_v19 = vld [vmem:[%s6339_s3 + $0x48] sm:$0xff]  ;;  %v6373_v52 = vunpack.c.h.bf16 %v4578_v10  ;;  %s4396_s29 = smov [#allocation5]  }
  0x3f   : > { %s3585_s10 = sshll.u32 %s6592_s8, 2  ;;  %3904 = vmatpush3.bf16.msra.mxu0 %v4551_v3  ;;  %3973 = vmatpush3.bf16.msra.mxu1 %v4551_v3  ;;  %s3587_s30 = sshll.u32 %s6592_s8, 3  ;;  %v4600_v17 = vpack.c.bf16 %v269_v13, %v268_v12  ;;  %v4617_v20 = vsub.s32 0, %v4594_v16  ;;  %v4620_v21 = vsub.s32 2, %v4594_v16  ;;  %v4627_v23 = vpack.c.bf16 %v271_v19, %v270_v18  ;;  %v272_v24 = vld [vmem:[%s6339_s3 + $0x50] sm:$0xff]  ;;  %v273_v25 = vld [vmem:[%s6339_s3 + $0x58] sm:$0xff] }
  0x40   : > { %s4567_s12 = scalar_lea.vmem %s6336_s0, %s3585_s10  ;;  %3906 = vmatprep.subr.bf16.mxu0 %v4556_v5  ;;  %3966 = vmatprep.subr.bf16.mxu1 %v4556_v5  ;;  %s4605_s6 = scalar_lea.vmem %s6338_s2, %s3587_s30  ;;  %v4636_v26 = vsub.s32 3, %v4594_v16  ;;  %v4639_v27 = vsub.s32 1, %v4594_v16  ;;  %v4647_v30 = vpack.c.bf16 %v273_v25, %v272_v24  ;;  %v274_v31 = vld [vmem:[%s6339_s3 + $0x60] sm:$0xff]  ;;  %v275_v32 = vld [vmem:[%s6339_s3 + $0x68] sm:$0xff]  ;;  %v4658_v35 = vsub.s32 5, %v4594_v16  ;;  %v276_v38 = vld [vmem:[%s6339_s3 + $0x70] sm:$0xff] }
  0x41   : > { %v4581_v11 = vld [vmem:[%s4567_s12] sm:$0xff]   ;;  %3865 = vmatprep.mubr.f32.mxu1 %v6372_v14  ;;  %v4661_v36 = vsub.s32 4, %v4594_v16  ;;  %v4667_v37 = vpack.c.bf16 %v275_v32, %v274_v31  ;;  %v277_v39 = vld [vmem:[%s6339_s3 + $0x78] sm:$0xff]  ;;  %v4678_v42 = vsub.s32 7, %v4594_v16  ;;  %v4681_v43 = vsub.s32 6, %v4594_v16  ;;  %v636_v47 = vld [vmem:[%s4605_s6 + $0x8] sm:$0xff] }
  0x42   : > { %v4591_v15 = vunpack.c.l.bf16 %v4581_v11  ;;  %v635_v22 = vld [vmem:[%s4605_s6] sm:$0xff]  ;;  %v4687_v44 = vpack.c.bf16 %v277_v39, %v276_v38  ;;  %v4697_v48 = vld [vmem:[%s4532_s22 + $0x28] sm:$0xff]   ;;  %v705_v50 = vrot.slane %v636_v47, %v4639_v27  ;;  %v698_v51 = vrot.slane %v636_v47, %v4617_v20  ;;  %v4711_v55 = vld [vmem:[%s4532_s22 + $0x30] sm:$0xff]   ;;  %s4326_s30 = sshll.u32 %s4396_s29, 4  ;;  %s4327_s30 = int_to_ptr.vmem [resolvable:$false] %s4326_s30 }
  0x43   : > { %3908 = vmatpush3.bf16.msra.mxu0 %v4556_v5  ;;  %3974 = vmatpush3.bf16.msra.mxu1 %v4556_v5  ;;  %v656_v28 = vrot.slane %v635_v22, %v4620_v21  ;;  %v642_v29 = vrot.slane %v635_v22, %v4617_v20  ;;  %v663_v33 = vrot.slane %v635_v22, %v4636_v26  ;;  %v3699_v49 = vld [vmem:[%s4567_s12 + $0x8] sm:$0xff]   ;;  %v4704_v53 = vunpack.c.h.bf16 %v4581_v11  ;;  %v4716_v57 = vld [vmem:[%s4532_s22] sm:$0xff]   ;;  %v4732_v63 = vld [vmem:[%s4532_s22 + $0x38] sm:$0xff]   ;;  %s3583_s12 = sshll.u32 %s4528_s13, 5  ;;  %s4328_s26 = scalar_lea.vmem %s4327_s30, 1024 }
  0x44   : > { %6442 = vst [vmem:[#allocation9_spill] sm:$0xff] %v4591_v15  ;;  %3910 = vmatprep.subr.bf16.mxu0 %v4575_v9  ;;  %3967 = vmatprep.subr.bf16.mxu1 %v4575_v9  ;;  %v649_v34 = vrot.slane %v635_v22, %v4639_v27  ;;  %v677_v40 = vrot.slane %v635_v22, %v4658_v35  ;;  %6443 = vst [vmem:[#allocation10_spill] sm:$0xff] %v4697_v48  ;;  %v6370_v54 = vunpack.c.l.bf16 %v4697_v48  ;;  %v4748_v6 = vld [vmem:[%s4532_s22 + $0x40] sm:$0xff]   ;;  %v637_v11 = vld [vmem:[%s4605_s6 + $0x10] sm:$0xff] }
  0x45   : > { %3815 = vmatprep.mubr.f32.mxu0 %v4591_v15  ;;  %658 = vbcast.lane.b32.xlu1 %v656_v28, 256  ;;  %v670_v41 = vrot.slane %v635_v22, %v4661_v36  ;;  %v691_v45 = vrot.slane %v635_v22, %v4678_v42  ;;  %v684_v46 = vrot.slane %v635_v22, %v4681_v43  ;;  %v4713_v56 = vunpack.c.l.bf16 %v3699_v49  ;;  %v4764_v13 = vld [vmem:[%s4532_s22 + $0x48] sm:$0xff]   ;;  %v4777_v24 = vld [vmem:[%s4532_s22 + $0x50] sm:$0xff]   ;;  %v4790_v31 = vld [vmem:[%s4532_s22 + $0x58] sm:$0xff]  }
  0x46   : > { %644 = vbcast.lane.b32.xlu0 %v642_v29, 256  ;;  %6444 = vst [vmem:[#allocation11_spill] sm:$0xff] %v4704_v53  ;;  %6445 = vst [vmem:[#allocation12_spill] sm:$0xff] %v4711_v55  ;;  %v719_v58 = vrot.slane %v636_v47, %v4636_v26  ;;  %v712_v59 = vrot.slane %v636_v47, %v4620_v21  ;;  %v6371_v60 = vunpack.c.h.bf16 %v4697_v48  ;;  %v4724_v61 = vunpack.c.h.bf16 %v3699_v49  ;;  %v4803_v38 = vld [vmem:[%s4532_s22 + $0x60] sm:$0xff]  }
  0x47   : > { %3912 = vmatpush3.bf16.msra.mxu0 %v4575_v9  ;;  %3975 = vmatpush3.bf16.msra.mxu1 %v4575_v9  ;;  %6446 = vst [vmem:[#allocation13_spill] sm:$0xff] %v4713_v56  ;;  %6447 = vst [vmem:[#allocation14_spill] sm:$0xff] %v4716_v57  ;;  %v6368_v62 = vunpack.c.l.bf16 %v4711_v55  ;;  %v6357_v0 = vunpack.c.l.bf16 %v4716_v57  ;;  %v733_v1 = vrot.slane %v636_v47, %v4658_v35  ;;  %v6366_v4 = vunpack.c.l.bf16 %v4732_v63 }
  0x48   : > { %3914 = vmatprep.subr.bf16.mxu0 %v4600_v17  ;;  %3968 = vmatprep.subr.bf16.mxu1 %v4600_v17  ;;  %6448 = vst [vmem:[#allocation15_spill] sm:$0xff] %v4724_v61  ;;  %6449 = vst [vmem:[#allocation16_spill] sm:$0xff] %v4732_v63  ;;  %v726_v2 = vrot.slane %v636_v47, %v4661_v36  ;;  %v747_v7 = vrot.slane %v636_v47, %v4678_v42  ;;  %v6365_v12 = vunpack.c.l.bf16 %v4748_v6 }
  0x49   : > { %665 = vbcast.lane.b32.xlu1 %v663_v33, 256  ;;  %6450 = vst [vmem:[#allocation17_spill] sm:$0xff] %v4748_v6  ;;  %v740_v8 = vrot.slane %v636_v47, %v4681_v43  ;;  %6451 = vst [vmem:[#allocation18_spill] sm:$0xff] %v4764_v13  ;;  %v761_v18 = vrot.slane %v637_v11, %v4639_v27  ;;  %v754_v19 = vrot.slane %v637_v11, %v4617_v20  ;;  %v4820_v47 = vld [vmem:[%s4532_s22 + $0x68] sm:$0xff]  }
  0x4a   : > { %651 = vbcast.lane.b32.xlu0 %v649_v34, 256  ;;  %v6363_v22 = vunpack.c.l.bf16 %v4764_v13  ;;  %6452 = vst [vmem:[#allocation19_spill] sm:$0xff] %v4777_v24  ;;  %v775_v25 = vrot.slane %v637_v11, %v4636_v26  ;;  %v768_v28 = vrot.slane %v637_v11, %v4620_v21  ;;  %v6360_v29 = vunpack.c.l.bf16 %v4777_v24  ;;  %6453 = vst [vmem:[#allocation20_spill] sm:$0xff] %v4790_v31 }
  0x4b   : > { %3916 = vmatpush3.bf16.msra.mxu0 %v4600_v17  ;;  %3976 = vmatpush3.bf16.msra.mxu1 %v4600_v17  ;;  %v789_v32 = vrot.slane %v637_v11, %v4658_v35  ;;  %v782_v33 = vrot.slane %v637_v11, %v4661_v36  ;;  %v6359_v34 = vunpack.c.l.bf16 %v4790_v31  ;;  %6454 = vst [vmem:[#allocation21_spill] sm:$0xff] %v4803_v38  ;;  %6456 = vst [vmem:[#allocation23_spill] sm:$0xff] %v4820_v47 }
  0x4c   : > { %3918 = vmatprep.subr.bf16.mxu0 %v4627_v23  ;;  %3969 = vmatprep.subr.bf16.mxu1 %v4627_v23  ;;  %v803_v39 = vrot.slane %v637_v11, %v4678_v42 }
  0x4d   : > { %679 = vbcast.lane.b32.xlu1 %v677_v40, 256  ;;  %v796_v40 = vrot.slane %v637_v11, %v4681_v43  ;;  %v4854_v11 = vld [vmem:[%s4532_s22 + $0x18] sm:$0xff]  }
  0x4e   : > { %672 = vbcast.lane.b32.xlu0 %v670_v41, 256  ;;  %v638_v41 = vld [vmem:[%s4605_s6 + $0x18] sm:$0xff]  ;;  %6459 = vst [vmem:[#allocation26_spill] sm:$0xff] %v4854_v11  ;;  %s6017_s6 = scalar_lea.vmem [#allocation5], %s3583_s12 }
  0x4f   : > { %3920 = vmatpush3.bf16.msra.mxu0 %v4627_v23  ;;  %3977 = vmatpush3.bf16.msra.mxu1 %v4627_v23  ;;  %v817_v49 = vrot.slane %v638_v41, %v4639_v27  ;;  %v4834_v27 = vld [vmem:[%s4532_s22 + $0x10] sm:$0xff]   ;;  %s3478_s20 = sshll.u32 %s6017_s6, 4  ;;  %s6287_s20 = int_to_ptr.vmem [resolvable:$true] %s3478_s20 }
  0x50   : > { %3922 = vmatprep.subr.bf16.mxu0 %v4647_v30  ;;  %3970 = vmatprep.subr.bf16.mxu1 %v4647_v30  ;;  %6457 = vst [vmem:[#allocation24_spill] sm:$0xff] %v4834_v27  ;;  %s4322_s25 = scalar_lea.vmem %s6287_s20, 512  ;;  %p4329_p10 = scmp.lt.s32.totalorder %s6287_s20, %s4327_s30 }
  0x51   : > { %693 = vbcast.lane.b32.xlu1 %v691_v45, 256  ;;  %v6355_v45 = vunpack.c.l.bf16 %v4803_v38  ;;  %p4323_p6 = scmp.ne.s32.totalorder %s6287_s20, %s4322_s25  ;;  %p4330_p0 = scmp.lt.s32.totalorder %s4328_s26, %s4322_s25 }
  0x52   : > { %686 = vbcast.lane.b32.xlu0 %v684_v46, 256  ;;  %v4817_v46 = vld [vmem:[%s4532_s22 + $0x8] sm:$0xff]  }
  0x53   : > { %3924 = vmatpush3.bf16.msra.mxu0 %v4647_v30  ;;  %3978 = vmatpush3.bf16.msra.mxu1 %v4647_v30  ;;  %6455 = vst [vmem:[#allocation22_spill] sm:$0xff] %v4817_v46  ;;  %p4324_p13 = pnand %p4323_p6, %p6584_p12  ;;  %p4331_p2 = por %p4330_p0, %p4329_p10 }
  0x54   : > { %3926 = vmatprep.subr.bf16.mxu0 %v4667_v37  ;;  %3971 = vmatprep.subr.bf16.mxu1 %v4667_v37 }
  0x55   : > { %707 = vbcast.lane.b32.xlu1 %v705_v50, 256  ;;  %v810_v50 = vrot.slane %v638_v41, %v4617_v20  ;;  %p4325_p8 = pneg %p4324_p13 }
  0x56   : > { %700 = vbcast.lane.b32.xlu0 %v698_v51, 256  ;;  %v6354_v51 = vunpack.c.h.bf16 %v4803_v38 }
  0x57   : > { %3928 = vmatpush3.bf16.msra.mxu0 %v4667_v37  ;;  %3979 = vmatpush3.bf16.msra.mxu1 %v4667_v37  ;;  %p4332_p4 = pnand %p4331_p2, %p4325_p8 }
  0x58   : > { %3930 = vmatprep.subr.bf16.mxu0 %v4687_v44  ;;  %3972 = vmatprep.subr.bf16.mxu1 %v4687_v44 }
  0x59   : > { %721 = vbcast.lane.b32.xlu1 %v719_v58, 256  ;;  %v6353_v58 = vunpack.c.l.bf16 %v4817_v46 }
  0x5a   : > { %714 = vbcast.lane.b32.xlu0 %v712_v59, 256  ;;  %v6352_v59 = vunpack.c.l.bf16 %v4820_v47 }
  0x5b   : > { %3932 = vmatpush3.bf16.msra.mxu0 %v4687_v44  ;;  %3980 = vmatpush3.bf16.msra.mxu1 %v4687_v44 }
  0x5c   : > { %3934 = vmatprep.subr.bf16.mxu0 %v4551_v3 }
  0x5d   : > { %735 = vbcast.lane.b32.xlu1 %v733_v1, 256  ;;  %v4837_v1 = vld [vmem:[%s4532_s22 + $0x70] sm:$0xff]  }
  0x5e   : > { %3866 = vmatmul.mubr.f32.vlgmr.msra.gmra.mrb[0].mxu1 %v6373_v52  ;;  %3816 = vmatmul.mubr.f32.vlgmr.msra.gmra.mrb[0].mxu0 %v4704_v53  ;;  %6458 = vst [vmem:[#allocation25_spill] sm:$0xff] %v4837_v1 }
  0x5f   : > { %3936 = vmatpush3.bf16.msra.mxu0 %v4551_v3  ;;  %3868 = vmatprep.mubr.f32.mxu1 %v6370_v54  ;;  %v6369_v3 = vunpack.c.h.bf16 %v4711_v55 }
  0x60   : > { %3938 = vmatprep.subr.bf16.mxu0 %v4556_v5  ;;  %3818 = vmatprep.mubr.f32.mxu0 %v4713_v56 }
  0x61   : > { %728 = vbcast.lane.b32.xlu0 %v726_v2, 256  ;;  %749 = vbcast.lane.b32.xlu1 %v747_v7, 256  ;;  %v831_v2 = vrot.slane %v638_v41, %v4636_v26  ;;  %v824_v7 = vrot.slane %v638_v41, %v4620_v21  ;;  %v6349_v26 = vunpack.c.l.bf16 %v4834_v27  ;;  %v6347_v21 = vunpack.c.l.bf16 %v4837_v1 }
  0x62   : > { %3869 = vmatmul.mubr.f32.gmra.mrb[2].mxu1 %v6371_v60  ;;  %3819 = vmatmul.mubr.f32.gmra.mrb[2].mxu0 %v4724_v61 }
  0x63   : > { %3940 = vmatpush3.bf16.msra.mxu0 %v4556_v5  ;;  %3871 = vmatprep.mubr.f32.mxu1 %v6368_v62  ;;  %v6367_v5 = vunpack.c.h.bf16 %v4732_v63 }
  0x64   : > { %3942 = vmatprep.subr.bf16.mxu0 %v4575_v9  ;;  %3853 = vmatprep.mubr.f32.mxu0 %v6357_v0 }
  0x65   : > { %742 = vbcast.lane.b32.xlu0 %v740_v8, 256  ;;  %763 = vbcast.lane.b32.xlu1 %v761_v18, 256  ;;  %v6350_v8 = vunpack.c.h.bf16 %v4820_v47  ;;  %v4857_v18 = vld [vmem:[%s4532_s22 + $0x78] sm:$0xff]   ;;  %s4394_s22 = smov 127  }
  0x66   : > { %3872 = vmatmul.mubr.f32.gmra.mrb[4].mxu1 %v6369_v3  ;;  %6460 = vst [vmem:[#allocation27_spill] sm:$0xff] %v4857_v18 }
  0x67   : > { %3944 = vmatpush3.bf16.msra.mxu0 %v4575_v9  ;;  %3874 = vmatprep.mubr.f32.mxu1 %v6366_v4  ;;  %v6362_v9 = vunpack.c.h.bf16 %v4748_v6 }
  0x68   : > { %3946 = vmatprep.subr.bf16.mxu0 %v4600_v17 }
  0x69   : > { %756 = vbcast.lane.b32.xlu0 %v754_v19, 256  ;;  %777 = vbcast.lane.b32.xlu1 %v775_v25, 256  ;;  %v845_v19 = vrot.slane %v638_v41, %v4658_v35  ;;  %v838_v25 = vrot.slane %v638_v41, %v4661_v36  ;;  %v6345_v35 = vunpack.c.l.bf16 %v4854_v11  ;;  %v6342_v36 = vunpack.c.l.bf16 %v4857_v18 }
  0x6a   : > { %3875 = vmatmul.mubr.f32.gmra.mrb[6].mxu1 %v6367_v5 }
  0x6b   : > { %3948 = vmatpush3.bf16.msra.mxu0 %v4600_v17  ;;  %3877 = vmatprep.mubr.f32.mxu1 %v6365_v12  ;;  %v6364_v17 = vunpack.c.h.bf16 %v4764_v13 }
  0x6c   : > { %3950 = vmatprep.subr.bf16.mxu0 %v4627_v23 }
  0x6d   : > { %770 = vbcast.lane.b32.xlu0 %v768_v28, 256  ;;  %791 = vbcast.lane.b32.xlu1 %v789_v32, 256  ;;  %v6348_v28 = vunpack.c.h.bf16 %v4834_v27  ;;  %v6346_v32 = vunpack.c.h.bf16 %v4837_v1 }
  0x6e   : > { %3878 = vmatmul.mubr.f32.gmra.mrb[8].mxu1 %v6362_v9 }
  0x6f   : > { %3952 = vmatpush3.bf16.msra.mxu0 %v4627_v23  ;;  %3880 = vmatprep.mubr.f32.mxu1 %v6363_v22  ;;  %v6361_v23 = vunpack.c.h.bf16 %v4777_v24 }
  0x70   : > { %3954 = vmatprep.subr.bf16.mxu0 %v4647_v30 }
  0x71   : > { %784 = vbcast.lane.b32.xlu0 %v782_v33, 256  ;;  %805 = vbcast.lane.b32.xlu1 %v803_v39, 256  ;;  %v859_v33 = vrot.slane %v638_v41, %v4678_v42  ;;  %v852_v39 = vrot.slane %v638_v41, %v4681_v43  ;;  %v4393_v42 = vmov 1966171168  }
  0x72   : > { %3881 = vmatmul.mubr.f32.gmra.mrb[10].mxu1 %v6364_v17  ;;  %v377_v43 = vunpack.c.l.s4 %v4393_v42 }
  0x73   : > { %3956 = vmatpush3.bf16.msra.mxu0 %v4647_v30  ;;  %3883 = vmatprep.mubr.f32.mxu1 %v6360_v29  ;;  %v6358_v30 = vunpack.c.h.bf16 %v4790_v31 }
  0x74   : > { %3958 = vmatprep.subr.bf16.mxu0 %v4667_v37  ;;  %v378_v41 = vunpack.c.0.s8 %v377_v43 }
  0x75   : > { %798 = vbcast.lane.b32.xlu0 %v796_v40, 256  ;;  %819 = vbcast.lane.b32.xlu1 %v817_v49, 256  ;;  %v6344_v40 = vunpack.c.h.bf16 %v4854_v11  ;;  %v6343_v49 = vunpack.c.h.bf16 %v4857_v18 }
  0x76   : > { %3884 = vmatmul.mubr.f32.gmra.mrb[12].mxu1 %v6361_v23 }
  0x77   : > { %3960 = vmatpush3.bf16.msra.mxu0 %v4667_v37  ;;  %3886 = vmatprep.mubr.f32.mxu1 %v6359_v34  ;;  %v6356_v37 = vunpack.c.h.bf16 %v4716_v57 }
  0x78   : > { %3962 = vmatprep.subr.bf16.mxu0 %v4687_v44 }
  0x79   : > { %812 = vbcast.lane.b32.xlu0 %v810_v50, 256  ;;  %833 = vbcast.lane.b32.xlu1 %v831_v2, 256  ;;  %v4890_v50 = vsub.s32 %v378_v41, %v4594_v16 }
  0x7a   : > { %3887 = vmatmul.mubr.f32.gmra.mrb[14].mxu1 %v6358_v30 }
  0x7b   : > { %3964 = vmatpush3.bf16.msra.mxu0 %v4687_v44  ;;  %3889 = vmatprep.mubr.f32.mxu1 %v6355_v45  ;;  %v6351_v44 = vunpack.c.h.bf16 %v4817_v46 }
  0x7d   : > { %826 = vbcast.lane.b32.xlu0 %v824_v7, 256  ;;  %847 = vbcast.lane.b32.xlu1 %v845_v19, 256 }
  0x7e   : > { %3854 = vmatmul.mubr.f32.vlgmr.msra.gmra.mrb[4].mxu0 %v6356_v37  ;;  %3890 = vmatmul.mubr.f32.gmra.mrb[16].mxu1 %v6354_v51 }
  0x7f   : > { %3856 = vmatprep.mubr.f32.mxu0 %v6353_v58  ;;  %3892 = vmatprep.mubr.f32.mxu1 %v6352_v59 }
  0x81   : > { %840 = vbcast.lane.b32.xlu0 %v838_v25, 256  ;;  %861 = vbcast.lane.b32.xlu1 %v859_v33, 256 }
  0x82   : > { %3857 = vmatmul.mubr.f32.gmra.mrb[6].mxu0 %v6351_v44  ;;  %3893 = vmatmul.mubr.f32.gmra.mrb[18].mxu1 %v6350_v8 }
  0x83   : > { %3859 = vmatprep.mubr.f32.mxu0 %v6349_v26  ;;  %3895 = vmatprep.mubr.f32.mxu1 %v6347_v21 }
  0x85   : > { %854 = vbcast.lane.b32.xlu0 %v852_v39, 256 }
  0x86   : > { %3860 = vmatmul.mubr.f32.gmra.mrb[8].mxu0 %v6348_v28  ;;  %3896 = vmatmul.mubr.f32.gmra.mrb[20].mxu1 %v6346_v32 }
  0x87   : > { %3862 = vmatprep.mubr.f32.mxu0 %v6345_v35  ;;  %3898 = vmatprep.mubr.f32.mxu1 %v6342_v36 }
  0x8a   : > { %3863 = vmatmul.mubr.f32.gmra.mrb[10].mxu0 %v6344_v40  ;;  %3899 = vmatmul.mubr.f32.gmra.mrb[22].mxu1 %v6343_v49 }
  0xb7   : > { %v4941_v45 = vpop.permute.xlu1 %658 }
  0xbb   : > { %v4964_v0 = vpop.permute.xlu1 %665 }
  0xbf   : > { %v4970_v30 = vpop.permute.xlu1 %679 }
  0xc0   : > { %6462 = vst [vmem:[#allocation29_spill] sm:$0xff] %v4970_v30 }
 0x131   : > { %v3867_v2 = vpop.f32.mrb[0].mxu1  ;;  %v3817_v7 = vpop.f32.mrb[0].mxu0 }
 0x132   : > { %1298 = vrot.lane.b32.xlu1 %v3867_v2, %s4394_s22  ;;  %v969_v19 = vpop.f32.mrb[1].mxu1  ;;  %v424_v25 = vcombine.high %v3817_v7, %v3817_v7  ;;  %v431_v33 = vrot.slane %v3817_v7, %v4890_v50  ;;  %v352_v39 = vpop.f32.mrb[1].mxu0 }
 0x133   : > { %1296 = vrot.lane.b32.xlu0 %v969_v19, %s4394_s22  ;;  %v375_v36 = vcombine.high %v352_v39, %v352_v39  ;;  %v382_v49 = vrot.slane %v352_v39, %v4890_v50 }
 0x134   : > { %v438_v42 = vrot.slane %v424_v25, %v4890_v50  ;;  %v439_v43 = vcombine.high %v431_v33, %v431_v33  ;;  %v4898_v16 = vrot.slane %v431_v33, %v4890_v50 }
 0x135   : > { %v3870_v41 = vpop.f32.mrb[2].mxu1  ;;  %v389_v40 = vrot.slane %v375_v36, %v4890_v50  ;;  %v4902_v2 = vrot.slane %v382_v49, %v4890_v50  ;;  %v3820_v35 = vpop.f32.mrb[2].mxu0  ;;  %v390_v59 = vcombine.high %v382_v49, %v382_v49 }
 0x136   : > { %1302 = vrot.lane.b32.xlu1 %v3870_v41, %s4394_s22  ;;  %v979_v7 = vpop.f32.mrb[3].mxu1  ;;  %v440_v19 = vcombine.high %v438_v42, %v438_v42  ;;  %v522_v32 = vcombine.high %v3820_v35, %v3820_v35  ;;  %v529_v39 = vrot.slane %v3820_v35, %v4890_v50  ;;  %v362_v21 = vpop.f32.mrb[3].mxu0  ;;  %v4907_v25 = vrot.slane %v439_v43, %v4890_v50 }
 0x137   : > { %1300 = vrot.lane.b32.xlu0 %v979_v7, %s4394_s22  ;;  %v473_v33 = vcombine.high %v362_v21, %v362_v21  ;;  %v480_v36 = vrot.slane %v362_v21, %v4890_v50  ;;  %v4924_v21 = vrot.slane %v438_v42, %v4890_v50  ;;  %v4938_v42 = vrot.slane %v390_v59, %v4890_v50 }
 0x138   : > { %v536_v28 = vrot.slane %v522_v32, %v4890_v50  ;;  %v4913_v26 = vrot.slane %v529_v39, %v4890_v50  ;;  %v4921_v7 = vrot.slane %v440_v19, %v4890_v50  ;;  %v537_v51 = vcombine.high %v529_v39, %v529_v39 }
 0x139   : > { %v3873_v41 = vpop.f32.mrb[4].mxu1  ;;  %v487_v8 = vrot.slane %v473_v33, %v4890_v50  ;;  %v488_v44 = vcombine.high %v480_v36, %v480_v36  ;;  %v4917_v35 = vrot.slane %v480_v36, %v4890_v50  ;;  %v391_v19 = vcombine.high %v389_v40, %v389_v40 }
 0x13a   : > { %1306 = vrot.lane.b32.xlu1 %v3873_v41, %s4394_s22  ;;  %v989_v43 = vpop.f32.mrb[5].mxu1  ;;  %v4944_v39 = vrot.slane %v537_v51, %v4890_v50  ;;  %v4960_v51 = vrot.slane %v536_v28, %v4890_v50  ;;  %v1127_v27 = vrot.slane %v4907_v25, %v4617_v20  ;;  %v471_v47 = vcombine.high %v4907_v25, %v4907_v25 }
 0x13b   : > { %1304 = vrot.lane.b32.xlu0 %v989_v43, %s4394_s22  ;;  %v489_v32 = vcombine.high %v487_v8, %v487_v8  ;;  %v4928_v58 = vrot.slane %v488_v44, %v4890_v50  ;;  %v4935_v49 = vrot.slane %v487_v8, %v4890_v50  ;;  %v538_v43 = vcombine.high %v536_v28, %v536_v28 }
 0x13c   : > { %v4951_v59 = vrot.slane %v391_v19, %v4890_v50  ;;  %v4954_v8 = vrot.slane %v389_v40, %v4890_v50  ;;  %6461 = vst [vmem:[#allocation28_spill] sm:$0xff] %v4960_v51  ;;  %v1123_v38 = vrot.slane %v4898_v16, %v4617_v20  ;;  %v469_v56 = vcombine.high %v4898_v16, %v4898_v16 }
 0x13d   : > { %v3876_v33 = vpop.f32.mrb[6].mxu1  ;;  %v4932_v41 = vrot.slane %v489_v32, %v4890_v50  ;;  %v1135_v6 = vrot.slane %v471_v47, %v4617_v20  ;;  %v1139_v48 = vrot.slane %v4924_v21, %v4617_v20  ;;  %v470_v51 = vcombine.high %v4924_v21, %v4924_v21 }
 0x13e   : > { %1310 = vrot.lane.b32.xlu1 %v3876_v33, %s4394_s22  ;;  %v999_v36 = vpop.f32.mrb[7].mxu1  ;;  %v4947_v33 = vpop.permute.xlu0 %644  ;;  %v1131_v63 = vrot.slane %v469_v56, %v4617_v20 }
 0x13f   : > { %1308 = vrot.lane.b32.xlu0 %v999_v36, %s4394_s22  ;;  %v4957_v36 = vrot.slane %v538_v43, %v4890_v50 }
 0x141   : > { %v3879_v44 = vpop.f32.mrb[8].mxu1 }
 0x142   : > { %1314 = vrot.lane.b32.xlu1 %v3879_v44, %s4394_s22  ;;  %v1009_v32 = vpop.f32.mrb[9].mxu1 }
 0x143   : > { %1312 = vrot.lane.b32.xlu0 %v1009_v32, %s4394_s22  ;;  %v4966_v32 = vpop.permute.xlu0 %651 }
 0x145   : > { %v3882_v37 = vpop.f32.mrb[10].mxu1 }
 0x146   : > { %1318 = vrot.lane.b32.xlu1 %v3882_v37, %s4394_s22  ;;  %v1019_v44 = vpop.f32.mrb[11].mxu1 }
 0x147   : > { %1316 = vrot.lane.b32.xlu0 %v1019_v44, %s4394_s22  ;;  %v4973_v37 = vpop.permute.xlu0 %672 }
 0x148   : > { %6463 = vst [vmem:[#allocation30_spill] sm:$0xff] %v4973_v37 }
 0x149   : > { %v3885_v19 = vpop.f32.mrb[12].mxu1 }
 0x14a   : > { %1322 = vrot.lane.b32.xlu1 %v3885_v19, %s4394_s22  ;;  %v1029_v40 = vpop.f32.mrb[13].mxu1  ;;  %v4978_v19 = vpop.permute.xlu1 %693 }
 0x14b   : > { %1320 = vrot.lane.b32.xlu0 %v1029_v40, %s4394_s22  ;;  %6464 = vst [vmem:[#allocation31_spill] sm:$0xff] %v4978_v19  ;;  %v4980_v40 = vpop.permute.xlu0 %686 }
 0x14c   : > { %6465 = vst [vmem:[#allocation32_spill] sm:$0xff] %v4980_v40 }
 0x14d   : > { %v3888_v43 = vpop.f32.mrb[14].mxu1 }
 0x14e   : > { %1326 = vrot.lane.b32.xlu1 %v3888_v43, %s4394_s22  ;;  %v1039_v28 = vpop.f32.mrb[15].mxu1 }
 0x14f   : > { %1324 = vrot.lane.b32.xlu0 %v1039_v28, %s4394_s22  ;;  %v4988_v4 = vpop.permute.xlu0 %700 }
 0x150   : > { %vm1512_vm2 = vcmp.gt.f32.partialorder %v4988_v4, 0.0 }
 0x151   : > { %v3855_v50 = vpop.f32.mrb[4].mxu0  ;;  %v3891_v44 = vpop.f32.mrb[16].mxu1 }
 0x152   : > { %1282 = vrot.lane.b32.xlu1 %v3855_v50, %s4394_s22  ;;  %v929_v34 = vpop.f32.mrb[5].mxu0  ;;  %v1049_v29 = vpop.f32.mrb[17].mxu1 }
 0x153   : > { %1280 = vrot.lane.b32.xlu0 %v929_v34, %s4394_s22  ;;  %v4986_v34 = vpop.permute.xlu1 %707 }
 0x154   : > { %vm1513_vm0 = vcmp.gt.f32.partialorder %v4986_v34, 0.0 }
 0x155   : > { %v3858_v23 = vpop.f32.mrb[6].mxu0  ;;  %v3894_v9 = vpop.f32.mrb[18].mxu1 }
 0x156   : > { %1330 = vrot.lane.b32.xlu1 %v3891_v44, %s4394_s22  ;;  %v939_v43 = vpop.f32.mrb[7].mxu0  ;;  %v1059_v22 = vpop.f32.mrb[19].mxu1 }
 0x157   : > { %1328 = vrot.lane.b32.xlu0 %v1049_v29, %s4394_s22  ;;  %v4993_v29 = vpop.permute.xlu1 %721 }
 0x158   : > { %vm1515_vm4 = vcmp.gt.f32.partialorder %v4993_v29, 0.0 }
 0x159   : > { %v3861_v28 = vpop.f32.mrb[8].mxu0  ;;  %v3897_v17 = vpop.f32.mrb[20].mxu1 }
 0x15a   : > { %1286 = vrot.lane.b32.xlu1 %v3858_v23, %s4394_s22  ;;  %v949_v50 = vpop.f32.mrb[9].mxu0  ;;  %v1069_v12 = vpop.f32.mrb[21].mxu1 }
 0x15b   : > { %1284 = vrot.lane.b32.xlu0 %v939_v43, %s4394_s22  ;;  %v4996_v23 = vpop.permute.xlu0 %714  ;;  %v5000_v43 = vpop.permute.xlu1 %735 }
 0x15c   : > { %vm1514_vm6 = vcmp.gt.f32.partialorder %v4996_v23, 0.0  ;;  %vm1517_vm7 = vcmp.gt.f32.partialorder %v5000_v43, 0.0 }
 0x15d   : > { %v3864_v5 = vpop.f32.mrb[10].mxu0  ;;  %v3900_v62 = vpop.f32.mrb[22].mxu1 }
 0x15e   : > { %1334 = vrot.lane.b32.xlu1 %v3894_v9, %s4394_s22  ;;  %v959_v44 = vpop.f32.mrb[11].mxu0  ;;  %v1079_v3 = vpop.f32.mrb[23].mxu1  ;;  %v4395_v9 = vmov 0  }
 0x15f   : > { %1332 = vrot.lane.b32.xlu0 %v1059_v22, %s4394_s22  ;;  %v5002_v54 = vpop.permute.xlu0 %728  ;;  %4035 = vset.pattern.permute.xlu1 %v4395_v9  ;;  %v5007_v22 = vpop.permute.xlu1 %749 }
 0x160   : > { %4034 = vset.pattern.permute.xlu0 %v4395_v9  ;;  %vm1516_vm8 = vcmp.gt.f32.partialorder %v5002_v54, 0.0  ;;  %vm1519_vm14 = vcmp.gt.f32.partialorder %v5007_v22, 0.0 }
 0x162   : > { %1290 = vrot.lane.b32.xlu1 %v3861_v28, %s4394_s22 }
 0x163   : > { %1288 = vrot.lane.b32.xlu0 %v949_v50, %s4394_s22 }
 0x166   : > { %1338 = vrot.lane.b32.xlu1 %v3897_v17, %s4394_s22  ;;  %v5010_v17 = vpop.permute.xlu0 %742 }
 0x167   : > { %1336 = vrot.lane.b32.xlu0 %v1069_v12, %s4394_s22  ;;  %v5012_v12 = vpop.permute.xlu1 %763 }
 0x16a   : > { %1294 = vrot.lane.b32.xlu1 %v3864_v5, %s4394_s22  ;;  %v5014_v28 = vpop.permute.xlu0 %756 }
 0x16b   : > { %1292 = vrot.lane.b32.xlu0 %v959_v44, %s4394_s22  ;;  %v5016_v50 = vpop.permute.xlu1 %777 }
 0x16e   : > { %1342 = vrot.lane.b32.xlu1 %v3900_v62, %s4394_s22  ;;  %v5018_v5 = vpop.permute.xlu0 %770 }
 0x16f   : > { %1340 = vrot.lane.b32.xlu0 %v1079_v3, %s4394_s22  ;;  %v5020_v44 = vpop.permute.xlu1 %791 }
 0x172   : > { %v5022_v60 = vpop.permute.xlu0 %784 }
 0x173   : > { %v5024_v9 = vpop.permute.xlu1 %805 }
 0x176   : > { %v5026_v62 = vpop.permute.xlu0 %798 }
 0x177   : > { %v5028_v14 = vpop.permute.xlu1 %819 }
 0x17a   : > { %v5030_v3 = vpop.permute.xlu0 %812 }
 0x17b   : > { %v5032_v52 = vpop.permute.xlu1 %833 }
 0x17c   : > { %6466 = vst [vmem:[#allocation33_spill] sm:$0xff] %v5032_v52 }
 0x17e   : > { %v5034_v18 = vpop.permute.xlu0 %826 }
 0x17f   : > { %6467 = vst [vmem:[#allocation34_spill] sm:$0xff] %v5034_v18  ;;  %v5036_v11 = vpop.permute.xlu1 %847 }
 0x180   : > { %6468 = vst [vmem:[#allocation35_spill] sm:$0xff] %v5036_v11 }
 0x182   : > { %v5038_v15 = vpop.permute.xlu0 %840 }
 0x183   : > { %6469 = vst [vmem:[#allocation36_spill] sm:$0xff] %v5038_v15  ;;  %v5040_v61 = vpop.permute.xlu1 %861 }
 0x184   : > { %6470 = vst [vmem:[#allocation37_spill] sm:$0xff] %v5040_v61  ;;  %v472_v61 = vcombine.high %v4921_v7, %v4921_v7 }
 0x186   : > { %v5042_v1 = vpop.permute.xlu0 %854 }
 0x187   : > { %6471 = vst [vmem:[#allocation38_spill] sm:$0xff] %v5042_v1 }
 0x1a4   : > { %v1299_v46 = vpop.permute.xlu1 %1298 }
 0x1a5   : > { %v1385_v57 = vadd.f32 %v1299_v46, %v1127_v27  ;;  %v1297_v31 = vpop.permute.xlu0 %1296 }
 0x1a6   : > { %v1384_v24 = vadd.f32 %v1297_v31, %v1123_v38  ;;  %v1143_v31 = vrot.slane %v4921_v7, %v4617_v20 }
 0x1a7   : > { %vm1417_vm3 = vcmp.gt.f32.partialorder %v1385_v57, 0.0  ;;  %v1449_v13 = vmul.f32 0.2, %v1385_v57 }
 0x1a8   : > { %vm1416_vm5 = vcmp.gt.f32.partialorder %v1384_v24, 0.0  ;;  %v1448_v25 = vmul.f32 0.2, %v1384_v24  ;;  %v1303_v53 = vpop.permute.xlu1 %1302 }
 0x1a9   : > { %v1481_v46 = vsel %vm1417_vm3, %v1385_v57, %v1449_v13  ;;  %v1387_v27 = vadd.f32 %v1303_v53, %v1135_v6  ;;  %v1301_v16 = vpop.permute.xlu0 %1300  ;;  %vm1521_vm3 = vcmp.gt.f32.partialorder %v5012_v12, 0.0 }
 0x1aa   : > { %v5063_v38 = vsel %vm1513_vm0, %v1481_v46, -9e+15  ;;  %v1480_v47 = vsel %vm1416_vm5, %v1384_v24, %v1448_v25  ;;  %v1386_v55 = vadd.f32 %v1301_v16, %v1131_v63  ;;  %vm1518_vm0 = vcmp.gt.f32.partialorder %v5010_v17, 0.0 }
 0x1ab   : > { %v1632_v53 = vsel %vm1568_vm1, %v5063_v38, -inf  ;;  %v5072_v56 = vsel %vm1512_vm2, %v1480_v47, -9e+15  ;;  %vm1419_vm9 = vcmp.gt.f32.partialorder %v1387_v27, 0.0  ;;  %v1451_v57 = vmul.f32 0.2, %v1387_v27 }
 0x1ac   : > { %v1633_v6 = vrot.slane %v1632_v53, 4  ;;  %v1625_v13 = vsel %vm1568_vm1, %v5072_v56, -inf  ;;  %vm1418_vm10 = vcmp.gt.f32.partialorder %v1386_v55, 0.0  ;;  %v1450_v63 = vmul.f32 0.2, %v1386_v55  ;;  %v1307_v24 = vpop.permute.xlu1 %1306 }
 0x1ad   : > { %v1626_v34 = vrot.slane %v1625_v13, 4  ;;  %v1483_v25 = vsel %vm1419_vm9, %v1387_v27, %v1451_v57  ;;  %v1389_v46 = vadd.f32 %v1307_v24, %v1143_v31  ;;  %v1305_v16 = vpop.permute.xlu0 %1304  ;;  %vm1520_vm5 = vcmp.gt.f32.partialorder %v5014_v28, 0.0 }
 0x1ae   : > { %v1634_v1 = vmax.f32 %v1632_v53, %v1633_v6  ;;  %v5080_v4 = vsel %vm1515_vm4, %v1483_v25, -9e+15  ;;  %v1482_v47 = vsel %vm1418_vm10, %v1386_v55, %v1450_v63  ;;  %v1388_v19 = vadd.f32 %v1305_v16, %v1139_v48 }
 0x1af   : > { %v1627_v40 = vmax.f32 %v1625_v13, %v1626_v34  ;;  %v1646_v15 = vsel %vm1568_vm1, %v5080_v4, -inf  ;;  %v5086_v11 = vsel %vm1514_vm6, %v1482_v47, -9e+15  ;;  %vm1421_vm11 = vcmp.gt.f32.partialorder %v1389_v46, 0.0 }
 0x1b0   : > { %v1635_v27 = vrot.slane %v1634_v1, 2  ;;  %v1647_v31 = vrot.slane %v1646_v15, 4  ;;  %v1639_v7 = vsel %vm1568_vm1, %v5086_v11, -inf  ;;  %v1453_v53 = vmul.f32 0.2, %v1389_v46 }
 0x1b1   : > { %v1628_v29 = vrot.slane %v1627_v40, 2  ;;  %v1640_v57 = vrot.slane %v1639_v7, 4  ;;  %vm1420_vm12 = vcmp.gt.f32.partialorder %v1388_v19, 0.0  ;;  %v1452_v55 = vmul.f32 0.2, %v1388_v19 }
 0x1b2   : > { %v1636_v48 = vmax.f32 %v1634_v1, %v1635_v27  ;;  %v1648_v6 = vmax.f32 %v1646_v15, %v1647_v31  ;;  %v1485_v13 = vsel %vm1421_vm11, %v1389_v46, %v1453_v53  ;;  %v1151_v63 = vrot.slane %v472_v61, %v4617_v20  ;;  %v1311_v15 = vpop.permute.xlu1 %1310 }
 0x1b3   : > { %v1629_v24 = vmax.f32 %v1627_v40, %v1628_v29  ;;  %v1641_v23 = vmax.f32 %v1639_v7, %v1640_v57  ;;  %v5093_v34 = vsel %vm1517_vm7, %v1485_v13, -9e+15  ;;  %v1484_v25 = vsel %vm1420_vm12, %v1388_v19, %v1452_v55 }
 0x1b4   : > { %v1637_v16 = vrot.slane %v1636_v48, 1  ;;  %v1649_v47 = vrot.slane %v1648_v6, 2  ;;  %v1660_v10 = vsel %vm1568_vm1, %v5093_v34, -inf  ;;  %v5099_v37 = vsel %vm1516_vm8, %v1484_v25, -9e+15 }
 0x1b5   : > { %v1630_v1 = vrot.slane %v1629_v24, 1  ;;  %v1642_v46 = vrot.slane %v1641_v23, 2  ;;  %v1661_v61 = vrot.slane %v1660_v10, 4  ;;  %v1653_v40 = vsel %vm1568_vm1, %v5099_v37, -inf }
 0x1b6   : > { %v1638_v43 = vmax.f32 %v1636_v48, %v1637_v16  ;;  %v1650_v27 = vmax.f32 %v1648_v6, %v1649_v47  ;;  %v1654_v31 = vrot.slane %v1653_v40, 4  ;;  %v1391_v29 = vadd.f32 %v1311_v15, %v1151_v63 }
 0x1b7   : > { %v1631_v19 = vmax.f32 %v1629_v24, %v1630_v1  ;;  %v1643_v7 = vmax.f32 %v1641_v23, %v1642_v46  ;;  %v1662_v53 = vmax.f32 %v1660_v10, %v1661_v61  ;;  %v1309_v46 = vpop.permute.xlu0 %1308  ;;  %v1147_v61 = vrot.slane %v470_v51, %v4617_v20 }
 0x1b8   : > { %v1802_v57 = vsub.f32 -inf, %v1638_v43  ;;  %v1898_v55 = vsub.f32 %v5063_v38, %v1638_v43  ;;  %v1651_v54 = vrot.slane %v1650_v27, 1  ;;  %v1655_v13 = vmax.f32 %v1653_v40, %v1654_v31 }
 0x1b9   : > { %v1801_v25 = vsub.f32 -inf, %v1631_v19  ;;  %v1644_v30 = vrot.slane %v1643_v7, 1  ;;  %v1663_v18 = vrot.slane %v1662_v53, 2  ;;  %v1897_v48 = vsub.f32 %v5072_v56, %v1631_v19 }
 0x1ba   : > { %v1843_v52 = vmul.f32 1.442695, %v1802_v57  ;;  %v1652_v6 = vmax.f32 %v1650_v27, %v1651_v54  ;;  %v1656_v16 = vrot.slane %v1655_v13, 2  ;;  %v1939_v24 = vmul.f32 1.442695, %v1898_v55 }
 0x1bb   : > { %v1841_v23 = vmul.f32 1.442695, %v1801_v25  ;;  %v1645_v10 = vmax.f32 %v1643_v7, %v1644_v30  ;;  %v1664_v63 = vmax.f32 %v1662_v53, %v1663_v18  ;;  %v1455_v15 = vmul.f32 0.2, %v1391_v29  ;;  %v1315_v7 = vpop.permute.xlu1 %1314 }
 0x1bc   : > { %4036 = vpow2.f32 %v1843_v52  ;;  %v1804_v47 = vsub.f32 -inf, %v1652_v6  ;;  %v1657_v38 = vmax.f32 %v1655_v13, %v1656_v16  ;;  %vm1423_vm13 = vcmp.gt.f32.partialorder %v1391_v29, 0.0 }
 0x1bd   : > { %v1665_v1 = vrot.slane %v1664_v63, 1  ;;  %4038 = vpow2.f32 %v1841_v23  ;;  %v1937_v21 = vmul.f32 1.442695, %v1897_v48  ;;  %v1803_v40 = vsub.f32 -inf, %v1645_v10 }
 0x1be   : > { %v1658_v43 = vrot.slane %v1657_v38, 1  ;;  %4040 = vpow2.f32 %v1939_v24  ;;  %v1900_v56 = vsub.f32 %v5080_v4, %v1652_v6  ;;  %v1847_v30 = vmul.f32 1.442695, %v1804_v47 }
 0x1bf   : > { %v1666_v18 = vmax.f32 %v1664_v63, %v1665_v1  ;;  %v1487_v52 = vsel %vm1423_vm13, %v1391_v29, %v1455_v15  ;;  %v1390_v27 = vadd.f32 %v1309_v46, %v1147_v61  ;;  %v1899_v31 = vsub.f32 %v5086_v11, %v1645_v10 }
 0x1c0   : > { %v5111_v19 = vsel %vm1519_vm14, %v1487_v52, -9e+15  ;;  %v1159_v51 = vrot.slane %v4928_v58, %v4617_v20  ;;  %4042 = vpow2.f32 %v1937_v21  ;;  %v1845_v53 = vmul.f32 1.442695, %v1803_v40 }
 0x1c1   : > { %v1659_v57 = vmax.f32 %v1657_v38, %v1658_v43  ;;  %v1674_v22 = vsel %vm1568_vm1, %v5111_v19, -inf  ;;  %v1943_v55 = vmul.f32 1.442695, %v1900_v56  ;;  %4044 = vpow2.f32 %v1847_v30 }
 0x1c2   : > { %v1675_v4 = vrot.slane %v1674_v22, 4  ;;  %v1806_v54 = vsub.f32 -inf, %v1666_v18  ;;  %vm1422_vm15 = vcmp.gt.f32.partialorder %v1390_v27, 0.0  ;;  %v1393_v29 = vadd.f32 %v1315_v7, %v1159_v51 }
 0x1c3   : > { %v1941_v11 = vmul.f32 1.442695, %v1899_v31  ;;  %v1454_v25 = vmul.f32 0.2, %v1390_v27  ;;  %4046 = vpow2.f32 %v1845_v53  ;;  %v1805_v6 = vsub.f32 -inf, %v1659_v57 }
 0x1c4   : > { %v1676_v13 = vmax.f32 %v1674_v22, %v1675_v4  ;;  %vm1425_vm2 = vcmp.gt.f32.partialorder %v1393_v29, 0.0  ;;  %v1457_v16 = vmul.f32 0.2, %v1393_v29  ;;  %4048 = vpow2.f32 %v1943_v55 }
 0x1c5   : > { %v1486_v23 = vsel %vm1422_vm15, %v1390_v27, %v1454_v25  ;;  %v1851_v63 = vmul.f32 1.442695, %v1806_v54  ;;  %v1902_v47 = vsub.f32 %v5093_v34, %v1666_v18  ;;  %v1901_v46 = vsub.f32 %v5099_v37, %v1659_v57 }
 0x1c6   : > { %v5118_v48 = vpop.eup %4036  ;;  %v1677_v24 = vrot.slane %v1676_v13, 2  ;;  %v1550_v38 = vsel %vm1518_vm0, %v1486_v23, -9e+15  ;;  %v1489_v15 = vsel %vm1425_vm2, %v1393_v29, %v1457_v16  ;;  %4050 = vpow2.f32 %v1941_v11 }
 0x1c7   : > { %2320 = vperm.xlu0 %4034, %v5118_v48   ;;  %v5122_v10 = vpop.eup %4038  ;;  %v1667_v12 = vsel %vm1568_vm1, %v1550_v38, -inf  ;;  %v1553_v21 = vsel %vm1521_vm3, %v1489_v15, -9e+15  ;;  %v1849_v40 = vmul.f32 1.442695, %v1805_v6  ;;  %4052 = vpow2.f32 %v1851_v63 }
 0x1c8   : > { %v5127_v1 = vpop.eup %4040  ;;  %v1678_v61 = vmax.f32 %v1676_v13, %v1677_v24  ;;  %2315 = vperm.xlu1 %4035, %v5122_v10   ;;  %v1668_v43 = vrot.slane %v1667_v12, 4  ;;  %v1688_v56 = vsel %vm1568_vm1, %v1553_v21, -inf  ;;  %v1947_v18 = vmul.f32 1.442695, %v1902_v47 }
 0x1c9   : > { %v1689_v30 = vrot.slane %v1688_v56, 4  ;;  %4054 = vpow2.f32 %v1849_v40  ;;  %v1945_v7 = vmul.f32 1.442695, %v1901_v46  ;;  %vm1523_vm8 = vcmp.gt.f32.partialorder %v5016_v50, 0.0 }
 0x1ca   : > { %v1679_v34 = vrot.slane %v1678_v61, 1  ;;  %v5134_v17 = vpop.eup %4042  ;;  %v1669_v37 = vmax.f32 %v1667_v12, %v1668_v43  ;;  %4056 = vpow2.f32 %v1947_v18  ;;  %vm1522_vm9 = vcmp.gt.f32.partialorder %v5018_v5, 0.0 }
 0x1cb   : > { %2512 = vperm.xlu0 %4034, %v5127_v1   ;;  %v1690_v27 = vmax.f32 %v1688_v56, %v1689_v30  ;;  %v5137_v31 = vpop.eup %4044  ;;  %4058 = vpow2.f32 %v1945_v7  ;;  %v518_v7 = vcombine.high %v4917_v35, %v4917_v35  ;;  %vm1525_vm11 = vcmp.gt.f32.partialorder %v5020_v44, 0.0 }
 0x1cc   : > { %v1680_v52 = vmax.f32 %v1678_v61, %v1679_v34  ;;  %2507 = vperm.xlu1 %4035, %v5134_v17   ;;  %v1670_v51 = vrot.slane %v1669_v37, 2  ;;  %v1095_v44 = vrot.slane %v4938_v42, %v4617_v20  ;;  %vm1524_vm13 = vcmp.gt.f32.partialorder %v5022_v60, 0.0 }
 0x1cd   : > { %v1691_v57 = vrot.slane %v1690_v27, 2  ;;  %v5140_v22 = vpop.eup %4046  ;;  %vm1527_vm0 = vcmp.gt.f32.partialorder %v5024_v9, 0.0  ;;  %vm1526_vm3 = vcmp.gt.f32.partialorder %v5026_v62, 0.0  ;;  %v1191_v9 = vrot.slane %v4944_v39, %v4617_v20 }
 0x1ce   : > { %v1808_v53 = vsub.f32 -inf, %v1680_v52  ;;  %v1904_v55 = vsub.f32 %v5111_v19, %v1680_v52  ;;  %v1671_v4 = vmax.f32 %v1669_v37, %v1670_v51  ;;  %v5143_v54 = vpop.eup %4048  ;;  %v1155_v37 = vrot.slane %v4917_v35, %v4617_v20 }
 0x1cf   : > { %2330 = vperm.xlu0 %4034, %v5137_v31   ;;  %v1692_v11 = vmax.f32 %v1690_v27, %v1691_v57  ;;  %v520_v27 = vcombine.high %v4928_v58, %v4928_v58  ;;  %v1319_v57 = vpop.permute.xlu1 %1318 }
 0x1d0   : > { %v1855_v29 = vmul.f32 1.442695, %v1808_v53  ;;  %2325 = vperm.xlu1 %4035, %v5140_v22   ;;  %v1672_v13 = vrot.slane %v1671_v4, 1  ;;  %v5147_v6 = vpop.eup %4050  ;;  %v1951_v16 = vmul.f32 1.442695, %v1904_v55 }
 0x1d1   : > { %v1693_v25 = vrot.slane %v1692_v11, 1  ;;  %v5150_v19 = vpop.eup %4052 }
 0x1d2   : > { %4060 = vpow2.f32 %v1855_v29  ;;  %v1673_v24 = vmax.f32 %v1671_v4, %v1672_v13  ;;  %6472 = vst [vmem:[#allocation39_spill] sm:$0xff] %v5150_v19  ;;  %v1167_v29 = vrot.slane %v520_v27, %v4617_v20  ;;  %v521_v27 = vcombine.high %v4932_v41, %v4932_v41 }
 0x1d3   : > { %2522 = vperm.xlu0 %4034, %v5143_v54   ;;  %v1694_v23 = vmax.f32 %v1692_v11, %v1693_v25  ;;  %v5153_v46 = vpop.eup %4054  ;;  %4062 = vpow2.f32 %v1951_v16  ;;  %v1163_v11 = vrot.slane %v518_v7, %v4617_v20  ;;  %v1323_v16 = vpop.permute.xlu1 %1322 }
 0x1d4   : > { %2517 = vperm.xlu1 %4035, %v5147_v6   ;;  %v1807_v63 = vsub.f32 -inf, %v1673_v24  ;;  %v1903_v47 = vsub.f32 %v1550_v38, %v1673_v24  ;;  %6473 = vst [vmem:[#allocation40_spill] sm:$0xff] %v5153_v46  ;;  %v5156_v43 = vpop.eup %4056  ;;  %v1395_v35 = vadd.f32 %v1319_v57, %v1167_v29  ;;  %v519_v29 = vcombine.high %v4935_v49, %v4935_v49 }
 0x1d5   : > { %v1810_v15 = vsub.f32 -inf, %v1694_v23  ;;  %v1906_v12 = vsub.f32 %v1553_v21, %v1694_v23  ;;  %v5159_v34 = vpop.eup %4058  ;;  %v1313_v21 = vpop.permute.xlu0 %1312  ;;  %v1175_v23 = vrot.slane %v4932_v41, %v4617_v20 }
 0x1d6   : > { %v1853_v61 = vmul.f32 1.442695, %v1807_v63  ;;  %v1949_v56 = vmul.f32 1.442695, %v1903_v47  ;;  %v1392_v51 = vadd.f32 %v1313_v21, %v1155_v37  ;;  %v1459_v63 = vmul.f32 0.2, %v1395_v35 }
 0x1d7   : > { %2340 = vperm.xlu0 %4034, %v5150_v19   ;;  %v1859_v40 = vmul.f32 1.442695, %v1810_v15  ;;  %v1955_v38 = vmul.f32 1.442695, %v1906_v12  ;;  %vm1427_vm6 = vcmp.gt.f32.partialorder %v1395_v35, 0.0  ;;  %v1397_v15 = vadd.f32 %v1323_v16, %v1175_v23 }
 0x1d8   : > { %2335 = vperm.xlu1 %4035, %v5153_v46   ;;  %4064 = vpow2.f32 %v1853_v61  ;;  %v1456_v13 = vmul.f32 0.2, %v1392_v51  ;;  %vm1424_vm4 = vcmp.gt.f32.partialorder %v1392_v51, 0.0 }
 0x1d9   : > { %4066 = vpow2.f32 %v1859_v40  ;;  %v1317_v55 = vpop.permute.xlu0 %1316  ;;  %v1491_v40 = vsel %vm1427_vm6, %v1395_v35, %v1459_v63  ;;  %v1461_v37 = vmul.f32 0.2, %v1397_v15  ;;  %vm1429_vm10 = vcmp.gt.f32.partialorder %v1397_v15, 0.0 }
 0x1da   : > { %4068 = vpow2.f32 %v1949_v56  ;;  %v1394_v25 = vadd.f32 %v1317_v55, %v1163_v11  ;;  %v1488_v24 = vsel %vm1424_vm4, %v1392_v51, %v1456_v13  ;;  %v5201_v7 = vsel %vm1523_vm8, %v1491_v40, -9e+15  ;;  %v1327_v55 = vpop.permute.xlu1 %1326 }
 0x1db   : > { %2532 = vperm.xlu0 %4034, %v5156_v43   ;;  %4070 = vpow2.f32 %v1955_v38  ;;  %v5191_v61 = vsel %vm1520_vm5, %v1488_v24, -9e+15  ;;  %v1171_v38 = vrot.slane %v4935_v49, %v4617_v20  ;;  %v1493_v11 = vsel %vm1429_vm10, %v1397_v15, %v1461_v37 }
 0x1dc   : > { %2527 = vperm.xlu1 %4035, %v5159_v34   ;;  %v5162_v30 = vpop.eup %4060  ;;  %v1458_v47 = vmul.f32 0.2, %v1394_v25  ;;  %vm1426_vm7 = vcmp.gt.f32.partialorder %v1394_v25, 0.0  ;;  %v1681_v21 = vsel %vm1568_vm1, %v5191_v61, -inf  ;;  %v1183_v13 = vrot.slane %v521_v27, %v4617_v20 }
 0x1dd   : > { %6474 = vst [vmem:[#allocation41_spill] sm:$0xff] %v5162_v30  ;;  %v5165_v18 = vpop.eup %4062  ;;  %v1321_v12 = vpop.permute.xlu0 %1320  ;;  %v1682_v57 = vrot.slane %v1681_v21, 4  ;;  %v1702_v41 = vsel %vm1568_vm1, %v5201_v7, -inf  ;;  %v5213_v24 = vsel %vm1525_vm11, %v1493_v11, -9e+15  ;;  %v1179_v49 = vrot.slane %v519_v29, %v4617_v20 }
 0x1de   : > { %v1490_v56 = vsel %vm1426_vm7, %v1394_v25, %v1458_v47  ;;  %v1396_v28 = vadd.f32 %v1321_v12, %v1171_v38  ;;  %v1399_v35 = vadd.f32 %v1327_v55, %v1183_v13  ;;  %v1703_v23 = vrot.slane %v1702_v41, 4  ;;  %v1283_v12 = vpop.permute.xlu1 %1282 }
 0x1df   : > { %2350 = vperm.xlu0 %4034, %v5162_v30   ;;  %v5203_v51 = vsel %vm1522_vm9, %v1490_v56, -9e+15  ;;  %v1683_v16 = vmax.f32 %v1681_v21, %v1682_v57  ;;  %v1716_v40 = vsel %vm1568_vm1, %v5213_v24, -inf  ;;  %v1377_v57 = vadd.f32 %v1283_v12, %v1095_v44 }
 0x1e0   : > { %v1695_v50 = vsel %vm1568_vm1, %v5203_v51, -inf  ;;  %v1460_v5 = vmul.f32 0.2, %v1396_v28  ;;  %vm1428_vm12 = vcmp.gt.f32.partialorder %v1396_v28, 0.0  ;;  %v1463_v56 = vmul.f32 0.2, %v1399_v35 }
 0x1e1   : > { %v1325_v25 = vpop.permute.xlu0 %1324  ;;  %v1696_v63 = vrot.slane %v1695_v50, 4  ;;  %v1684_v38 = vrot.slane %v1683_v16, 2  ;;  %vm1431_vm14 = vcmp.gt.f32.partialorder %v1399_v35, 0.0  ;;  %v1704_v21 = vmax.f32 %v1702_v41, %v1703_v23 }
 0x1e2   : > { %v5170_v52 = vpop.eup %4064  ;;  %v1492_v47 = vsel %vm1428_vm12, %v1396_v28, %v1460_v5  ;;  %v1398_v15 = vadd.f32 %v1325_v25, %v1179_v49  ;;  %v1717_v28 = vrot.slane %v1716_v40, 4  ;;  %v1091_v11 = vrot.slane %v4902_v2, %v4617_v20 }
 0x1e3   : > { %2542 = vperm.xlu0 %4034, %v5165_v18   ;;  %6475 = vst [vmem:[#allocation42_spill] sm:$0xff] %v5170_v52  ;;  %2345 = vperm.xlu1 %4035, %v5170_v52   ;;  %v5177_v53 = vpop.eup %4066  ;;  %v1697_v37 = vmax.f32 %v1695_v50, %v1696_v63  ;;  %v5221_v27 = vsel %vm1524_vm13, %v1492_v47, -9e+15  ;;  %v1495_v13 = vsel %vm1431_vm14, %v1399_v35, %v1463_v56  ;;  %v1705_v41 = vrot.slane %v1704_v21, 2  ;;  %v1331_v56 = vpop.permute.xlu1 %1330 }
 0x1e4   : > { %6476 = vst [vmem:[#allocation43_spill] sm:$0xff] %v5177_v53  ;;  %v5180_v4 = vpop.eup %4068  ;;  %v1462_v29 = vmul.f32 0.2, %v1398_v15  ;;  %vm1430_vm15 = vcmp.gt.f32.partialorder %v1398_v15, 0.0  ;;  %v1709_v60 = vsel %vm1568_vm1, %v5221_v27, -inf  ;;  %v1685_v25 = vmax.f32 %v1683_v16, %v1684_v38 }
 0x1e5   : > { %v5185_v58 = vpop.eup %4070  ;;  %v1281_v55 = vpop.permute.xlu0 %1280  ;;  %v1698_v50 = vrot.slane %v1697_v37, 2  ;;  %v1441_v49 = vmul.f32 0.2, %v1377_v57  ;;  %v1718_v23 = vmax.f32 %v1716_v40, %v1717_v28  ;;  %v5228_v63 = vsel %vm1527_vm0, %v1495_v13, -9e+15 }
 0x1e6   : > { %6477 = vst [vmem:[#allocation44_spill] sm:$0xff] %v5185_v58  ;;  %v1376_v5 = vadd.f32 %v1281_v55, %v1091_v11  ;;  %v1494_v47 = vsel %vm1430_vm15, %v1398_v15, %v1462_v29  ;;  %vm1409_vm2 = vcmp.gt.f32.partialorder %v1377_v57, 0.0  ;;  %v1710_v12 = vrot.slane %v1709_v60, 4 }
 0x1e7   : > { %2360 = vperm.xlu0 %4034, %v5177_v53   ;;  %2537 = vperm.xlu1 %4035, %v5180_v4   ;;  %v1730_v44 = vsel %vm1568_vm1, %v5228_v63, -inf  ;;  %v5235_v16 = vsel %vm1526_vm3, %v1494_v47, -9e+15  ;;  %v1473_v38 = vsel %vm1409_vm2, %v1377_v57, %v1441_v49  ;;  %v1686_v40 = vrot.slane %v1685_v25, 1 }
 0x1e8   : > { %v1440_v35 = vmul.f32 0.2, %v1376_v5  ;;  %vm1408_vm4 = vcmp.gt.f32.partialorder %v1376_v5, 0.0  ;;  %v1706_v55 = vmax.f32 %v1704_v21, %v1705_v41  ;;  %v1699_v28 = vmax.f32 %v1697_v37, %v1698_v50 }
 0x1e9   : > { %v1719_v15 = vrot.slane %v1718_v23, 2  ;;  %vm1504_vm5 = vcmp.gt.f32.partialorder %v4947_v33, 0.0  ;;  %vm1505_vm6 = vcmp.gt.f32.partialorder %v4966_v32, 0.0  ;;  %v1711_v62 = vmax.f32 %v1709_v60, %v1710_v12  ;;  %v1329_v37 = vpop.permute.xlu0 %1328 }
 0x1ea   : > { %v1401_v29 = vadd.f32 %v1331_v56, %v1191_v9  ;;  %v1731_v11 = vrot.slane %v1730_v44, 4  ;;  %v1723_v13 = vsel %vm1568_vm1, %v5235_v16, -inf  ;;  %v5241_v53 = vsel %vm1505_vm6, %v1473_v38, -9e+15 }
 0x1eb   : > { %2552 = vperm.xlu0 %4034, %v5185_v58   ;;  %v1472_v47 = vsel %vm1408_vm4, %v1376_v5, %v1440_v35  ;;  %vm1529_vm7 = vcmp.gt.f32.partialorder %v5028_v14, 0.0  ;;  %v1187_v21 = vrot.slane %v4913_v26, %v4617_v20  ;;  %v422_v57 = vcombine.high %v4938_v42, %v4938_v42 }
 0x1ec   : > { %v420_v32 = vcombine.high %v4902_v2, %v4902_v2  ;;  %v1687_v60 = vmax.f32 %v1685_v25, %v1686_v40  ;;  %v1707_v41 = vrot.slane %v1706_v55, 1  ;;  %v1700_v50 = vrot.slane %v1699_v28, 1 }
 0x1ed   : > { %v1720_v49 = vmax.f32 %v1718_v23, %v1719_v15  ;;  %v1724_v12 = vrot.slane %v1723_v13, 4  ;;  %v1576_v5 = vsel %vm1568_vm1, %v5241_v53, -inf  ;;  %v5254_v35 = vsel %vm1504_vm5, %v1472_v47, -9e+15 }
 0x1ee   : > { %v1465_v9 = vmul.f32 0.2, %v1401_v29  ;;  %v1712_v56 = vrot.slane %v1711_v62, 2  ;;  %v1732_v38 = vmax.f32 %v1730_v44, %v1731_v11  ;;  %vm1433_vm8 = vcmp.gt.f32.partialorder %v1401_v29, 0.0 }
 0x1ef   : > { %v1400_v42 = vadd.f32 %v1329_v37, %v1187_v21  ;;  %v1103_v52 = vrot.slane %v422_v57, %v4617_v20  ;;  %v5258_v2 = vrot.slane %v420_v32, %v4617_v20  ;;  %v569_v25 = vcombine.high %v4944_v39, %v4944_v39 }
 0x1f0   : > { %v567_v23 = vcombine.high %v4913_v26, %v4913_v26  ;;  %vm1528_vm9 = vcmp.gt.f32.partialorder %v5030_v3, 0.0  ;;  %v1809_v33 = vsub.f32 -inf, %v1687_v60  ;;  %v1708_v40 = vmax.f32 %v1706_v55, %v1707_v41 }
 0x1f1   : > { %v1577_v15 = vrot.slane %v1576_v5, 4  ;;  %v1569_v44 = vsel %vm1568_vm1, %v5254_v35, -inf  ;;  %v1905_v11 = vsub.f32 %v5191_v61, %v1687_v60  ;;  %v1721_v47 = vrot.slane %v1720_v49, 1 }
 0x1f2   : > { %v1725_v21 = vmax.f32 %v1723_v13, %v1724_v12  ;;  %v1497_v37 = vsel %vm1433_vm8, %v1401_v29, %v1465_v9  ;;  %v1701_v57 = vmax.f32 %v1699_v28, %v1700_v50  ;;  %v1713_v32 = vmax.f32 %v1711_v62, %v1712_v56  ;;  %v1287_v29 = vpop.permute.xlu1 %1286 }
 0x1f3   : > { %v1733_v30 = vrot.slane %v1732_v38, 2  ;;  %v1464_v39 = vmul.f32 0.2, %v1400_v42  ;;  %v1570_v58 = vrot.slane %v1569_v44, 4  ;;  %vm1432_vm10 = vcmp.gt.f32.partialorder %v1400_v42, 0.0 }
 0x1f4   : > { %v5269_v26 = vrot.slane %v569_v25, %v4617_v20  ;;  %v5272_v55 = vrot.slane %v567_v23, %v4617_v20  ;;  %v1857_v41 = vmul.f32 1.442695, %v1809_v33  ;;  %v1812_v46 = vsub.f32 -inf, %v1708_v40 }
 0x1f5   : > { %v1578_v19 = vmax.f32 %v1576_v5, %v1577_v15  ;;  %v5276_v61 = vsel %vm1529_vm7, %v1497_v37, -9e+15  ;;  %v1953_v28 = vmul.f32 1.442695, %v1905_v11  ;;  %v1908_v62 = vsub.f32 %v5201_v7, %v1708_v40 }
 0x1f6   : > { %v1722_v13 = vmax.f32 %v1720_v49, %v1721_v47  ;;  %v1726_v60 = vrot.slane %v1725_v21, 2  ;;  %v1811_v50 = vsub.f32 -inf, %v1701_v57  ;;  %v1714_v12 = vrot.slane %v1713_v32, 1 }
 0x1f7   : > { %v1734_v9 = vmax.f32 %v1732_v38, %v1733_v30  ;;  %v1496_v56 = vsel %vm1432_vm10, %v1400_v42, %v1464_v39  ;;  %v1907_v25 = vsub.f32 %v5203_v51, %v1701_v57  ;;  %v1571_v23 = vmax.f32 %v1569_v44, %v1570_v58  ;;  %v1285_v39 = vpop.permute.xlu0 %1284 }
 0x1f8   : > { %v1744_v5 = vsel %vm1568_vm1, %v5276_v61, -inf  ;;  %v1379_v33 = vadd.f32 %v1287_v29, %v1103_v52  ;;  %4072 = vpow2.f32 %v1857_v41  ;;  %v1863_v14 = vmul.f32 1.442695, %v1812_v46 }
 0x1f9   : > { %v1579_v15 = vrot.slane %v1578_v19, 2  ;;  %v1111_v11 = vrot.slane %v4951_v59, %v4617_v20  ;;  %vm1507_vm11 = vcmp.gt.f32.partialorder %v4964_v0, 0.0  ;;  %v1959_v7 = vmul.f32 1.442695, %v1908_v62 }
 0x1fa   : > { %v1814_v49 = vsub.f32 -inf, %v1722_v13  ;;  %v1727_v40 = vmax.f32 %v1725_v21, %v1726_v60  ;;  %v5287_v30 = vsel %vm1528_vm9, %v1496_v56, -9e+15  ;;  %v1861_v58 = vmul.f32 1.442695, %v1811_v50 }
 0x1fb   : > { %v1715_v51 = vmax.f32 %v1713_v32, %v1714_v12  ;;  %v1735_v38 = vrot.slane %v1734_v9, 1  ;;  %v1745_v42 = vrot.slane %v1744_v5, 4  ;;  %4074 = vpow2.f32 %v1953_v28  ;;  %v1335_v12 = vpop.permute.xlu1 %1334 }
 0x1fc   : > { %v1957_v52 = vmul.f32 1.442695, %v1907_v25  ;;  %v1572_v46 = vrot.slane %v1571_v23, 2  ;;  %v1443_v44 = vmul.f32 0.2, %v1379_v33  ;;  %v1910_v47 = vsub.f32 %v5213_v24, %v1722_v13 }
 0x1fd   : > { %v1580_v37 = vmax.f32 %v1578_v19, %v1579_v15  ;;  %v1737_v57 = vsel %vm1568_vm1, %v5287_v30, -inf  ;;  %vm1411_vm12 = vcmp.gt.f32.partialorder %v1379_v33, 0.0  ;;  %4076 = vpow2.f32 %v1863_v14 }
 0x1fe   : > { %v1867_v21 = vmul.f32 1.442695, %v1814_v49  ;;  %v1728_v3 = vrot.slane %v1727_v40, 1  ;;  %v423_v32 = vcombine.high %v4951_v59, %v4951_v59  ;;  %4078 = vpow2.f32 %v1959_v7 }
 0x1ff   : > { %v1813_v41 = vsub.f32 -inf, %v1715_v51  ;;  %v1736_v29 = vmax.f32 %v1734_v9, %v1735_v38  ;;  %v1746_v28 = vmax.f32 %v1744_v5, %v1745_v42  ;;  %4080 = vpow2.f32 %v1861_v58  ;;  %v6478_v42 = vld [vmem:[#allocation33_spill] sm:$0xff] }
 0x200   : > { %v1573_v62 = vmax.f32 %v1571_v23, %v1572_v46  ;;  %v1738_v60 = vrot.slane %v1737_v57, 4  ;;  %v1475_v24 = vsel %vm1411_vm12, %v1379_v33, %v1443_v44  ;;  %4082 = vpow2.f32 %v1957_v52 }
 0x201   : > { %v1963_v19 = vmul.f32 1.442695, %v1910_v47  ;;  %v1581_v13 = vrot.slane %v1580_v37, 1  ;;  %v1378_v50 = vadd.f32 %v1285_v39, %v5258_v2  ;;  %4084 = vpow2.f32 %v1867_v21 }
 0x202   : > { %v1909_v56 = vsub.f32 %v5221_v27, %v1715_v51  ;;  %v1729_v25 = vmax.f32 %v1727_v40, %v1728_v3  ;;  %v1107_v14 = vrot.slane %v4954_v8, %v4617_v20  ;;  %v5298_v15 = vpop.eup %4072  ;;  %vm1506_vm13 = vcmp.gt.f32.partialorder %v4941_v45, 0.0 }
 0x203   : > { %v1865_v9 = vmul.f32 1.442695, %v1813_v41  ;;  %v1816_v23 = vsub.f32 -inf, %v1736_v29  ;;  %v1747_v5 = vrot.slane %v1746_v28, 2  ;;  %v5303_v33 = vsel %vm1507_vm11, %v1475_v24, -9e+15 }
 0x204   : > { %v1912_v2 = vsub.f32 %v5228_v63, %v1736_v29  ;;  %v1574_v7 = vrot.slane %v1573_v62, 1  ;;  %v1739_v49 = vmax.f32 %v1737_v57, %v1738_v60  ;;  %v1403_v27 = vadd.f32 %v1335_v12, %v5269_v26 }
 0x205   : > { %4086 = vpow2.f32 %v1963_v19  ;;  %v1582_v40 = vmax.f32 %v1580_v37, %v1581_v13  ;;  %v1442_v58 = vmul.f32 0.2, %v1378_v50  ;;  %v5309_v38 = vpop.eup %4074  ;;  %vm1531_vm14 = vcmp.gt.f32.partialorder %v6478_v42, 0.0  ;;  %v6481_v42 = vld [vmem:[#allocation34_spill] sm:$0xff] }
 0x206   : > { %v1961_v52 = vmul.f32 1.442695, %v1909_v56  ;;  %v1815_v0 = vsub.f32 -inf, %v1729_v25  ;;  %v1590_v46 = vsel %vm1568_vm1, %v5303_v33, -inf  ;;  %vm1410_vm15 = vcmp.gt.f32.partialorder %v1378_v50, 0.0 }
 0x207   : > { %4088 = vpow2.f32 %v1865_v9  ;;  %v1871_v63 = vmul.f32 1.442695, %v1816_v23  ;;  %v1911_v26 = vsub.f32 %v5235_v16, %v1729_v25  ;;  %v1748_v44 = vmax.f32 %v1746_v28, %v1747_v5  ;;  %v5315_v47 = vpop.eup %4076 }
 0x208   : > { %v1967_v37 = vmul.f32 1.442695, %v1912_v2  ;;  %v1575_v57 = vmax.f32 %v1573_v62, %v1574_v7  ;;  %v1740_v21 = vrot.slane %v1739_v49, 2  ;;  %v1467_v3 = vmul.f32 0.2, %v1403_v27  ;;  %v5317_v39 = vpop.eup %4078  ;;  %v1333_v7 = vpop.permute.xlu0 %1332 }
 0x209   : > { %v1794_v41 = vsub.f32 -inf, %v1582_v40  ;;  %v1591_v29 = vrot.slane %v1590_v46, 4  ;;  %v1474_v60 = vsel %vm1410_vm15, %v1378_v50, %v1442_v58  ;;  %vm1435_vm0 = vcmp.gt.f32.partialorder %v1403_v27, 0.0  ;;  %v5319_v24 = vpop.eup %4080 }
 0x20a   : > { %4090 = vpow2.f32 %v1961_v52  ;;  %v1869_v19 = vmul.f32 1.442695, %v1815_v0  ;;  %v1890_v13 = vsub.f32 %v5241_v53, %v1582_v40  ;;  %v421_v16 = vcombine.high %v4954_v8, %v4954_v8  ;;  %v5324_v28 = vpop.eup %4082  ;;  %v6479_v0 = vld [vmem:[#allocation28_spill] sm:$0xff] }
 0x20b   : > { %4092 = vpow2.f32 %v1871_v63  ;;  %v1965_v62 = vmul.f32 1.442695, %v1911_v26  ;;  %v1749_v12 = vrot.slane %v1748_v44, 1  ;;  %v5328_v25 = vpop.eup %4084  ;;  %v1793_v50 = vsub.f32 -inf, %v1575_v57 }
 0x20c   : > { %v1741_v9 = vmax.f32 %v1739_v49, %v1740_v21  ;;  %v5332_v23 = vsel %vm1506_vm13, %v1474_v60, -9e+15  ;;  %v1499_v53 = vsel %vm1435_vm0, %v1403_v27, %v1467_v3  ;;  %4094 = vpow2.f32 %v1967_v37 }
 0x20d   : > { %v1827_v5 = vmul.f32 1.442695, %v1794_v41  ;;  %v1592_v2 = vmax.f32 %v1590_v46, %v1591_v29  ;;  %v2080_v40 = vsel %vm1568_vm1, %v5127_v1, 0.0  ;;  %4096 = vpow2.f32 %v1869_v19 }
 0x20e   : > { %v1923_v58 = vmul.f32 1.442695, %v1890_v13  ;;  %v1889_v52 = vsub.f32 %v5254_v35, %v1575_v57  ;;  %v1750_v45 = vmax.f32 %v1748_v44, %v1749_v12  ;;  %v1583_v27 = vsel %vm1568_vm1, %v5332_v23, -inf }
 0x20f   : > { %v5339_v49 = vpop.eup %4086  ;;  %v5345_v46 = vsel %vm1531_vm14, %v1499_v53, -9e+15  ;;  %v2081_v26 = vrot.slane %v2080_v40, 4  ;;  %4098 = vpow2.f32 %v1965_v62  ;;  %v1825_v1 = vmul.f32 1.442695, %v1793_v50  ;;  %v1289_v53 = vpop.permute.xlu0 %1288 }
 0x210   : > { %v1742_v37 = vrot.slane %v1741_v9, 1  ;;  %v1402_v21 = vadd.f32 %v1333_v7, %v5272_v55  ;;  %4100 = vpow2.f32 %v1827_v5  ;;  %v1593_v57 = vrot.slane %v1592_v2, 2 }
 0x211   : > { %v5348_v35 = vpop.eup %4088  ;;  %v5354_v44 = vrot.slane %v423_v32, %v4617_v20  ;;  %v2082_v3 = vadd.f32 %v2081_v26, %v2080_v40  ;;  %vm1530_vm2 = vcmp.gt.f32.partialorder %v6481_v42, 0.0  ;;  %v1921_v41 = vmul.f32 1.442695, %v1889_v52 }
 0x212   : > { %v1584_v29 = vrot.slane %v1583_v27, 4  ;;  %v1758_v60 = vsel %vm1568_vm1, %v5345_v46, -inf  ;;  %v2073_v55 = vsel %vm1568_vm1, %v5134_v17, 0.0  ;;  %4102 = vpow2.f32 %v1923_v58  ;;  %v1291_v17 = vpop.permute.xlu1 %1290 }
 0x213   : > { %6480 = vst [vmem:[#allocation33_spill] sm:$0xff] %v5354_v44  ;;  %v1818_v19 = vsub.f32 -inf, %v1750_v45  ;;  %v1914_v13 = vsub.f32 %v5276_v61, %v1750_v45  ;;  %4104 = vpow2.f32 %v1825_v1  ;;  %v5366_v12 = vmax.f32 %v1741_v9, %v1742_v37 }
 0x214   : > { %v5364_v32 = vpop.eup %4090  ;;  %vm1434_vm3 = vcmp.gt.f32.partialorder %v1402_v21, 0.0  ;;  %v1466_v50 = vmul.f32 0.2, %v1402_v21  ;;  %v1594_v7 = vmax.f32 %v1592_v2, %v1593_v57  ;;  %v1759_v40 = vrot.slane %v1758_v60, 4 }
 0x215   : > { %v5368_v5 = vpop.eup %4092  ;;  %v2083_v58 = vrot.slane %v2082_v3, 2  ;;  %v2074_v52 = vrot.slane %v2073_v55, 4  ;;  %4106 = vpow2.f32 %v1921_v41  ;;  %v1585_v61 = vmax.f32 %v1583_v27, %v1584_v29 }
 0x216   : > { %v5371_v45 = vrot.slane %v421_v16, %v4617_v20  ;;  %v2094_v26 = vsel %vm1568_vm1, %v5143_v54, 0.0  ;;  %v5375_v9 = vpop.eup %4094  ;;  %v5377_v1 = vmul.f32 1.442695, %v1818_v19  ;;  %v5379_v37 = vmul.f32 1.442695, %v1914_v13 }
 0x217   : > { %6483 = vst [vmem:[#allocation34_spill] sm:$0xff] %v5375_v9  ;;  %v2084_v63 = vadd.f32 %v2083_v58, %v2082_v3  ;;  %v2075_v2 = vadd.f32 %v2074_v52, %v2073_v55  ;;  %v5381_v57 = vpop.eup %4096  ;;  %v1817_v51 = vsub.f32 -inf, %v5366_v12  ;;  %v1498_v27 = vsel %vm1434_vm3, %v1402_v21, %v1466_v50  ;;  %v5392_v55 = vpop.permute.xlu0 %1336 }
 0x218   : > { %6482 = vst [vmem:[#allocation28_spill] sm:$0xff] %v5371_v45  ;;  %v1381_v16 = vadd.f32 %v1291_v17, %v1111_v11  ;;  %v2095_v41 = vrot.slane %v2094_v26, 4  ;;  %v1595_v29 = vrot.slane %v1594_v7, 1  ;;  %v1760_v19 = vmax.f32 %v1758_v60, %v1759_v40 }
 0x219   : > { %v2085_v13 = vrot.slane %v2084_v63, 1  ;;  %v5390_v62 = vpop.eup %4098  ;;  %v1586_v3 = vrot.slane %v1585_v61, 2  ;;  %v2076_v58 = vrot.slane %v2075_v2, 2  ;;  %v2087_v21 = vsel %vm1568_vm1, %v5147_v6, 0.0 }
 0x21a   : > { %v2096_v52 = vadd.f32 %v2095_v41, %v2094_v26  ;;  %v5396_v50 = vpop.eup %4100  ;;  %v5400_v59 = vsel %vm1530_vm2, %v1498_v27, -9e+15  ;;  %v1994_v11 = vmul.f32 0.0, %v5118_v48  ;;  %v2088_v40 = vrot.slane %v2087_v21, 4  ;;  %v6487_v48 = vld [vmem:[#allocation29_spill] sm:$0xff] }
 0x21b   : > { %6484 = vst [vmem:[#allocation45_spill] sm:$0xff] %v5396_v50  ;;  %v2086_v60 = vadd.f32 %v2085_v13, %v2084_v63  ;;  %vm1413_vm4 = vcmp.gt.f32.partialorder %v1381_v16, 0.0  ;;  %v1380_v17 = vadd.f32 %v1289_v53, %v1107_v14  ;;  %v2077_v56 = vadd.f32 %v2076_v58, %v2075_v2 }
 0x21c   : > { %v2097_v26 = vrot.slane %v2096_v52, 2  ;;  %v5406_v41 = vpop.eup %4102  ;;  %v1761_v6 = vrot.slane %v1760_v19, 2  ;;  %v2089_v45 = vadd.f32 %v2088_v40, %v2087_v21  ;;  %v2108_v42 = vsel %vm1568_vm1, %v5156_v43, 0.0  ;;  %v5419_v43 = vpop.permute.xlu0 %1292 }
 0x21d   : > { %6485 = vst [vmem:[#allocation46_spill] sm:$0xff] %v5406_v41  ;;  %v2250_v54 = vadd.f32 %v2086_v60, %v1994_v11  ;;  %v5410_v27 = vpop.eup %4104  ;;  %vm1509_vm5 = vcmp.gt.f32.partialorder %v6487_v48, 0.0  ;;  %v1751_v63 = vsel %vm1568_vm1, %v5400_v59, -inf  ;;  %v1445_v13 = vmul.f32 0.2, %v1381_v16 }
 0x21e   : > { %6486 = vst [vmem:[#allocation47_spill] sm:$0xff] %v5410_v27  ;;  %v2078_v8 = vrot.slane %v2077_v56, 1  ;;  %v2098_v14 = vadd.f32 %v2097_v26, %v2096_v52  ;;  %v1596_v53 = vmax.f32 %v1594_v7, %v1595_v29  ;;  %v1587_v2 = vmax.f32 %v1585_v61, %v1586_v3  ;;  %v6489_v7 = vld [vmem:[#allocation30_spill] sm:$0xff] }
 0x21f   : > { %2928 = vperm.xlu1 %4035, %v2250_v54   ;;  %v2109_v58 = vrot.slane %v2108_v42, 4  ;;  %v2101_v21 = vsel %vm1568_vm1, %v5159_v34, 0.0  ;;  %v5417_v11 = vpop.eup %4106  ;;  %v1993_v60 = vmul.f32 0.0, %v5122_v10  ;;  %v2090_v50 = vrot.slane %v2089_v45, 2 }
 0x220   : > { %6488 = vst [vmem:[#allocation29_spill] sm:$0xff] %v5417_v11  ;;  %v2079_v40 = vadd.f32 %v2078_v8, %v2077_v56  ;;  %v2099_v27 = vrot.slane %v2098_v14, 1  ;;  %v1762_v41 = vmax.f32 %v1760_v19, %v1761_v6  ;;  %v1752_v9 = vrot.slane %v1751_v63, 4 }
 0x221   : > { %v2110_v44 = vadd.f32 %v2109_v58, %v2108_v42  ;;  %v2102_v52 = vrot.slane %v2101_v21, 4  ;;  %vm1508_vm6 = vcmp.gt.f32.partialorder %v6489_v7, 0.0  ;;  %v1477_v61 = vsel %vm1413_vm4, %v1381_v16, %v1445_v13 }
 0x222   : > { %v2249_v54 = vadd.f32 %v2079_v40, %v1993_v60  ;;  %v1996_v34 = vmul.f32 0.0, %v5137_v31  ;;  %v2100_v29 = vadd.f32 %v2099_v27, %v2098_v14  ;;  %v1796_v3 = vsub.f32 -inf, %v1596_v53  ;;  %v5432_v14 = vpop.permute.xlu0 %1340 }
 0x223   : > { %vm1412_vm7 = vcmp.gt.f32.partialorder %v1380_v17, 0.0  ;;  %v1444_v26 = vmul.f32 0.2, %v1380_v17  ;;  %v2103_v11 = vadd.f32 %v2102_v52, %v2101_v21  ;;  %v1588_v10 = vrot.slane %v1587_v2, 1 }
 0x224   : > { %2923 = vperm.xlu1 %4035, %v2249_v54   ;;  %v2252_v56 = vadd.f32 %v2100_v29, %v1996_v34  ;;  %v2091_v8 = vadd.f32 %v2090_v50, %v2089_v45  ;;  %v2111_v19 = vrot.slane %v2110_v44, 2  ;;  %v1873_v6 = vmul.f32 1.442695, %v1817_v51 }
 0x225   : > { %v1892_v42 = vsub.f32 %v5303_v33, %v1596_v53  ;;  %v1753_v58 = vmax.f32 %v1751_v63, %v1752_v9  ;;  %v2122_v16 = vsel %vm1568_vm1, %v5165_v18, 0.0  ;;  %4108 = vpow2.f32 %v5377_v1  ;;  %v1339_v9 = vpop.permute.xlu1 %1338 }
 0x226   : > { %v6490_v31 = vsub.f32 %v5287_v30, %v5366_v12  ;;  %v1763_v13 = vrot.slane %v1762_v41, 1  ;;  %2938 = vperm.xlu0 %4034, %v2252_v56   ;;  %v2104_v21 = vrot.slane %v2103_v11, 2  ;;  %4110 = vpow2.f32 %v5379_v37 }
 0x227   : > { %v1831_v51 = vmul.f32 1.442695, %v1796_v3  ;;  %v5437_v33 = vsel %vm1509_vm5, %v1477_v61, -9e+15  ;;  %v1476_v18 = vsel %vm1412_vm7, %v1380_v17, %v1444_v26  ;;  %v1589_v45 = vmax.f32 %v1587_v2, %v1588_v10 }
 0x228   : > { %v1969_v27 = vmul.f32 1.442695, %v6490_v31  ;;  %2355 = vperm.xlu1 %4035, %v5298_v15   ;;  %v2092_v30 = vrot.slane %v2091_v8, 1  ;;  %v2112_v12 = vadd.f32 %v2111_v19, %v2110_v44  ;;  %v2123_v1 = vrot.slane %v2122_v16, 4 }
 0x229   : > { %4112 = vpow2.f32 %v1873_v6  ;;  %v1927_v50 = vmul.f32 1.442695, %v1892_v42  ;;  %v1754_v63 = vrot.slane %v1753_v58, 2  ;;  %v6491_v37 = vcombine.high %v4957_v36, %v4957_v36 }
 0x22a   : > { %4114 = vpow2.f32 %v1969_v27  ;;  %v5447_v48 = vmax.f32 %v1762_v41, %v1763_v13  ;;  %v6492_v17 = vcombine.high %v6479_v0, %v6479_v0  ;;  %2370 = vperm.xlu0 %4034, %v5315_v47   ;;  %v2105_v44 = vadd.f32 %v2104_v21, %v2103_v11 }
 0x22b   : > { %v5445_v53 = vrot.slane %v6491_v37, %v4617_v20  ;;  %4116 = vpow2.f32 %v1831_v51  ;;  %v5460_v40 = vsel %vm1568_vm1, %v5437_v33, -inf  ;;  %v5464_v41 = vsel %vm1508_vm6, %v1476_v18, -9e+15 }
 0x22c   : > { %v5453_v2 = vrot.slane %v6492_v17, %v4617_v20  ;;  %v6493_v52 = vrot.slane %v4957_v36, %v4617_v20  ;;  %v1795_v54 = vsub.f32 -inf, %v1589_v45  ;;  %2547 = vperm.xlu1 %4035, %v5309_v38   ;;  %v2093_v11 = vadd.f32 %v2092_v30, %v2091_v8 }
 0x22d   : > { %v2113_v34 = vrot.slane %v2112_v12, 1  ;;  %v2124_v29 = vadd.f32 %v2123_v1, %v2122_v16  ;;  %4118 = vpow2.f32 %v1927_v50  ;;  %v1891_v3 = vsub.f32 %v5332_v23, %v1589_v45  ;;  %v6494_v45 = vld [vmem:[#allocation39_spill] sm:$0xff] }
 0x22e   : > { %v5469_v61 = vadd.f32 %v1339_v9, %v6493_v52  ;;  %v5473_v26 = vmax.f32 %v1753_v58, %v1754_v63  ;;  %v2150_v7 = vsel %vm1568_vm1, %v5317_v39, 0.0  ;;  %v1820_v10 = vsub.f32 -inf, %v5447_v48  ;;  %2562 = vperm.xlu0 %4034, %v5317_v39  }
 0x22f   : > { %v1995_v36 = vmul.f32 0.0, %v5140_v22  ;;  %v2106_v56 = vrot.slane %v2105_v44, 1  ;;  %v2151_v19 = vrot.slane %v2150_v7, 4  ;;  %v1605_v6 = vrot.slane %v5460_v40, 4  ;;  %v5487_v58 = vpop.eup %4108 }
 0x230   : > { %v2115_v23 = vsel %vm1568_vm1, %v5180_v4, 0.0  ;;  %v2164_v42 = vsel %vm1568_vm1, %v5339_v49, 0.0  ;;  %2365 = vperm.xlu1 %4035, %v5319_v24   ;;  %v2114_v16 = vadd.f32 %v2113_v34, %v2112_v12  ;;  %v2125_v22 = vrot.slane %v2124_v29, 2  ;;  %v5490_v13 = vpop.eup %4110  ;;  %v6495_v12 = vld [vmem:[#allocation40_spill] sm:$0xff] }
 0x231   : > { %v2251_v39 = vadd.f32 %v2093_v11, %v1995_v36  ;;  %v2152_v31 = vadd.f32 %v2151_v19, %v2150_v7  ;;  %v1829_v21 = vmul.f32 1.442695, %v1795_v54  ;;  %v5492_v51 = vmul.f32 1.442695, %v1891_v3  ;;  %v6496_v54 = vld [vmem:[#allocation8_spill] sm:$0xff] }
 0x232   : > { %v2165_v4 = vrot.slane %v2164_v42, 4  ;;  %v1998_v9 = vmul.f32 0.0, %v6494_v45  ;;  %v2107_v30 = vadd.f32 %v2106_v56, %v2105_v44  ;;  %v2116_v1 = vrot.slane %v2115_v23, 4  ;;  %v6498_v44 = vld [vmem:[#allocation44_spill] sm:$0xff] }
 0x233   : > { %2933 = vperm.xlu0 %4034, %v2251_v39   ;;  %v2153_v50 = vrot.slane %v2152_v31, 2  ;;  %v5496_v63 = vpop.eup %4112  ;;  %v1997_v37 = vmul.f32 0.0, %v6495_v12  ;;  %v2129_v17 = vsel %vm1568_vm1, %v5309_v38, 0.0  ;;  %v6497_v11 = vunpack.c.h.bf16 %v6496_v54 }
 0x234   : > { %v2166_v52 = vadd.f32 %v2165_v4, %v2164_v42  ;;  %v5503_v3 = vpop.eup %4114  ;;  %2557 = vperm.xlu1 %4035, %v5324_v28   ;;  %v2254_v7 = vadd.f32 %v2114_v16, %v1998_v9  ;;  %v2126_v36 = vadd.f32 %v2125_v22, %v2124_v29  ;;  %v2136_v56 = vsel %vm1568_vm1, %v6498_v44, 0.0 }
 0x235   : > { %v2154_v19 = vadd.f32 %v2153_v50, %v2152_v31  ;;  %v5508_v39 = vpop.eup %4116  ;;  %v5510_v45 = vmul.f32 1.442695, %v1820_v10  ;;  %v5514_v38 = vsel %vm1568_vm1, %v5464_v41, -inf  ;;  %vm1437_vm8 = vcmp.gt.f32.partialorder %v5469_v61, 0.0 }
 0x236   : > { %v2167_v42 = vrot.slane %v2166_v52, 2  ;;  %v2253_v4 = vadd.f32 %v2107_v30, %v1997_v37  ;;  %v2117_v16 = vadd.f32 %v2116_v1, %v2115_v23  ;;  %v2130_v29 = vrot.slane %v2129_v17, 4 }
 0x237   : > { %2948 = vperm.xlu0 %4034, %v2254_v7   ;;  %v2155_v22 = vrot.slane %v2154_v19, 1  ;;  %v5517_v9 = vpop.eup %4118  ;;  %v2137_v31 = vrot.slane %v2136_v56, 4  ;;  %v2171_v10 = vsel %vm1568_vm1, %v5390_v62, 0.0  ;;  %v2004_v44 = vmul.f32 0.0, %v5315_v47 }
 0x238   : > { %v2168_v50 = vadd.f32 %v2167_v42, %v2166_v52  ;;  %2943 = vperm.xlu1 %4035, %v2253_v4   ;;  %v2172_v18 = vrot.slane %v2171_v10, 4  ;;  %v1606_v7 = vmax.f32 %v5460_v40, %v1605_v6  ;;  %v1598_v23 = vrot.slane %v5514_v38, 4  ;;  %v6499_v42 = vld [vmem:[#allocation35_spill] sm:$0xff] }
 0x239   : > { %v2156_v8 = vadd.f32 %v2155_v22, %v2154_v19  ;;  %4120 = vpow2.f32 %v1829_v21  ;;  %v2131_v37 = vadd.f32 %v2130_v29, %v2129_v17  ;;  %vm1533_vm9 = vcmp.gt.f32.partialorder %v6499_v42, 0.0 }
 0x23a   : > { %v2169_v30 = vrot.slane %v2168_v50, 1  ;;  %v2006_v47 = vmul.f32 0.0, %v5328_v25  ;;  %v2138_v6 = vadd.f32 %v2137_v31, %v2136_v56  ;;  %v2157_v21 = vsel %vm1568_vm1, %v5364_v32, 0.0 }
 0x23b   : > { %2380 = vperm.xlu0 %4034, %v5328_v25   ;;  %v5525_v52 = vadd.f32 %v2156_v8, %v2004_v44  ;;  %v1469_v17 = vmul.f32 0.2, %v5469_v61  ;;  %v6500_v8 = vrot.slane %v6479_v0, %v4617_v20  ;;  %v2158_v31 = vrot.slane %v2157_v21, 4  ;;  %v6503_v0 = vld [vmem:[#allocation36_spill] sm:$0xff] }
 0x23c   : > { %v2170_v19 = vadd.f32 %v2169_v30, %v2168_v50  ;;  %2375 = vperm.xlu1 %4035, %v5348_v35   ;;  %v6501_v50 = vld [vmem:[#allocation41_spill] sm:$0xff]  ;;  %vm1532_vm10 = vcmp.gt.f32.partialorder %v6503_v0, 0.0  ;;  %4122 = vpow2.f32 %v5492_v51  ;;  %v2192_v51 = vsel %vm1568_vm1, %v5490_v13, 0.0 }
 0x23d   : > { %vm3394_vm5 = vcmask 1041409  }
 0x23e   : > { %v5537_v29 = vadd.f32 %v2170_v19, %v2006_v47  ;;  %v2159_v47 = vadd.f32 %v2158_v31, %v2157_v21  ;;  %v1607_v19 = vrot.slane %v1606_v7, 2 }
 0x23f   : > { %2572 = vperm.xlu0 %4034, %v5339_v49  }
 0x240   : > { %2567 = vperm.xlu1 %4035, %v5364_v32   ;;  %v1599_v32 = vmax.f32 %v5514_v38, %v1598_v23 }
 0x242   : > { %v1600_v31 = vrot.slane %v1599_v32, 2 }
 0x243   : > { %v5556_v21 = vpop.eup %4120 }
 0x244   : > { %2385 = vperm.xlu1 %4035, %v5381_v57  }
 0x246   : > { %v5456_v60 = vpop.permute.xlu0 %2320 }
 0x247   : > { %v2442_v30 = vmul.f32 0.0, %v5456_v60  ;;  %v2007_v60 = vmul.f32 0.0, %v5381_v57 }
 0x248   : > { %2577 = vperm.xlu1 %4035, %v5390_v62  }
 0x24a   : > { %v2513_v27 = vpop.permute.xlu0 %2512 }
 0x24b   : > { %v2634_v34 = vmul.f32 %v6497_v11, %v2513_v27  ;;  %v2127_v11 = vrot.slane %v2126_v36, 1 }
 0x24d   : > { %v2711_v27 = vrot.slane %v2634_v34, 4  ;;  %v2128_v40 = vadd.f32 %v2127_v11, %v2126_v36  ;;  %v2132_v36 = vrot.slane %v2131_v37, 2 }
 0x24f   : > { %v2712_v12 = vadd.f32 %v2711_v27, %v2634_v34  ;;  %v2173_v34 = vadd.f32 %v2172_v18, %v2171_v10  ;;  %v2118_v27 = vrot.slane %v2117_v16, 2  ;;  %v1404_v18 = vadd.f32 %v5392_v55, %v6500_v8 }
 0x250   : > { %v6502_v10 = vrot.slane %v5473_v26, 1 }
 0x251   : > { %v2713_v1 = vrot.slane %v2712_v12, 2  ;;  %v2174_v22 = vrot.slane %v2173_v34, 2  ;;  %v2119_v44 = vadd.f32 %v2118_v27, %v2117_v16  ;;  %v2160_v27 = vrot.slane %v2159_v47, 2 }
 0x252   : > { %v1757_v11 = vmax.f32 %v5473_v26, %v6502_v10  ;;  %v2133_v26 = vadd.f32 %v2132_v36, %v2131_v37  ;;  %vm1436_vm11 = vcmp.gt.f32.partialorder %v1404_v18, 0.0  ;;  %v2193_v10 = vrot.slane %v2192_v51, 4 }
 0x253   : > { %v2714_v4 = vadd.f32 %v2713_v1, %v2712_v12  ;;  %v2000_v12 = vmul.f32 0.0, %v6501_v50  ;;  %v2175_v56 = vadd.f32 %v2174_v22, %v2173_v34  ;;  %v2139_v1 = vrot.slane %v2138_v6, 2 }
 0x254   : > { %v1501_v34 = vsel %vm1437_vm8, %v5469_v61, %v1469_v17  ;;  %v1468_v22 = vmul.f32 0.2, %v1404_v18  ;;  %v1819_v38 = vsub.f32 -inf, %v1757_v11  ;;  %v1915_v23 = vsub.f32 %v5400_v59, %v1757_v11 }
 0x255   : > { %v2715_v25 = vrot.slane %v2714_v4, 1  ;;  %v2256_v55 = vadd.f32 %v2128_v40, %v2000_v12  ;;  %v2176_v49 = vrot.slane %v2175_v56, 1  ;;  %v2143_v40 = vsel %vm1568_vm1, %v5324_v28, 0.0  ;;  %v1295_v12 = vpop.permute.xlu1 %1294 }
 0x256   : > { %v5560_v61 = vsel %vm1533_vm9, %v1501_v34, -9e+15  ;;  %v2140_v37 = vadd.f32 %v2139_v1, %v2138_v6  ;;  %v5567_v50 = vmax.f32 %v1606_v7, %v1607_v19  ;;  %v1500_v28 = vsel %vm1436_vm11, %v1404_v18, %v1468_v22 }
 0x257   : > { %v2716_v20 = vadd.f32 %v2715_v25, %v2714_v4  ;;  %2958 = vperm.xlu0 %4034, %v2256_v55   ;;  %v2177_v16 = vadd.f32 %v2176_v49, %v2175_v56  ;;  %v2120_v4 = vrot.slane %v2119_v44, 1  ;;  %v2161_v25 = vadd.f32 %v2160_v27, %v2159_v47  ;;  %v6504_v55 = vld [vmem:[#allocation33_spill] sm:$0xff]  ;;  %v6506_v49 = vld [vmem:[#allocation42_spill] sm:$0xff] }
 0x258   : > { %v2134_v42 = vrot.slane %v2133_v26, 1  ;;  %v2144_v36 = vrot.slane %v2143_v40, 4  ;;  %v1772_v57 = vsel %vm1568_vm1, %v5560_v61, -inf  ;;  %v2141_v59 = vrot.slane %v2140_v37, 1  ;;  %v6508_v27 = vld [vmem:[#allocation45_spill] sm:$0xff] }
 0x259   : > { %v5550_v8 = vadd.f32 %v2716_v20, %v2442_v30  ;;  %v5563_v17 = vadd.f32 %v2177_v16, %v2007_v60  ;;  %v2162_v56 = vrot.slane %v2161_v25, 1  ;;  %v2121_v6 = vadd.f32 %v2120_v4, %v2119_v44  ;;  %v6505_v44 = vld [vmem:[#allocation34_spill] sm:$0xff]  ;;  %2280 = vperm.xlu1 %4035, %v6508_v27  }
 0x25a   : > { %v2005_v7 = vmul.f32 0.0, %v5348_v35  ;;  %v1877_v11 = vmul.f32 1.442695, %v1819_v38  ;;  %v1973_v30 = vmul.f32 1.442695, %v1915_v23  ;;  %v5581_v1 = vadd.f32 %v1295_v12, %v6504_v55  ;;  %v6507_v16 = vld [vmem:[#allocation46_spill] sm:$0xff] }
 0x25b   : > { %2390 = vperm.xlu0 %4034, %v5368_v5   ;;  %v2163_v18 = vadd.f32 %v2162_v56, %v2161_v25  ;;  %v5578_v20 = vsel %vm1532_vm10, %v1500_v28, -9e+15  ;;  %v1999_v47 = vmul.f32 0.0, %v6506_v49  ;;  %v2135_v19 = vadd.f32 %v2134_v42, %v2133_v26  ;;  %v6510_v42 = vld [vmem:[#allocation29_spill] sm:$0xff] }
 0x25c   : > { %v2145_v62 = vadd.f32 %v2144_v36, %v2143_v40  ;;  %v1609_v35 = vrot.slane %v5567_v50, 1  ;;  %v1773_v22 = vrot.slane %v1772_v57, 4  ;;  %v2194_v60 = vadd.f32 %v2193_v10, %v2192_v51  ;;  %v6509_v40 = vld [vmem:[#allocation28_spill] sm:$0xff]  ;;  %v6511_v51 = vld [vmem:[#allocation43_spill] sm:$0xff]  ;;  %v5599_v10 = vpop.eup %4122 }
 0x25d   : > { %v5585_v34 = vadd.f32 %v2163_v18, %v2005_v7  ;;  %v2024_v0 = vsel %vm1568_vm1, %v6507_v16, 0.0  ;;  %v2255_v4 = vadd.f32 %v2121_v6, %v1999_v47  ;;  %v2001_v25 = vmul.f32 0.0, %v5298_v15  ;;  %v6512_v47 = vld [vmem:[#allocation32_spill] sm:$0xff] }
 0x25e   : > { %v2142_v38 = vadd.f32 %v2141_v59, %v2140_v37  ;;  %v2025_v23 = vrot.slane %v2024_v0, 4  ;;  %v1765_v26 = vsel %vm1568_vm1, %v5578_v20, -inf  ;;  %v1382_v28 = vadd.f32 %v5419_v43, %v6509_v40 }
 0x25f   : > { %2582 = vperm.xlu0 %4034, %v6505_v44   ;;  %v2195_v12 = vrot.slane %v2194_v60, 2  ;;  %v2017_v36 = vsel %vm1568_vm1, %v6510_v42, 0.0  ;;  %v2257_v56 = vadd.f32 %v2135_v19, %v2001_v25  ;;  %v2002_v7 = vmul.f32 0.0, %v6511_v51  ;;  %v6513_v25 = vld [vmem:[#allocation31_spill] sm:$0xff] }
 0x260   : > { %v2146_v18 = vrot.slane %v2145_v62, 2  ;;  %v2026_v6 = vadd.f32 %v2025_v23, %v2024_v0  ;;  %4124 = vpow2.f32 %v1973_v30  ;;  %v5601_v15 = vmax.f32 %v1599_v32, %v1600_v31 }
 0x261   : > { %v2196_v37 = vadd.f32 %v2195_v12, %v2194_v60  ;;  %v2018_v59 = vrot.slane %v2017_v36, 4  ;;  %4126 = vpow2.f32 %v1877_v11  ;;  %v1766_v55 = vrot.slane %v1765_v26, 4  ;;  %2963 = vperm.xlu1 %4035, %v2257_v56   ;;  %v1343_v60 = vpop.permute.xlu1 %1342 }
 0x262   : > { %v2258_v43 = vadd.f32 %v2142_v38, %v2002_v7  ;;  %v2027_v49 = vrot.slane %v2026_v6, 2  ;;  %vm1510_vm12 = vcmp.gt.f32.partialorder %v6512_v47, 0.0  ;;  %vm1415_vm13 = vcmp.gt.f32.partialorder %v5581_v1, 0.0 }
 0x263   : > { %2953 = vperm.xlu0 %4034, %v2255_v4   ;;  %v1447_v19 = vmul.f32 0.2, %v5581_v1  ;;  %v2197_v4 = vrot.slane %v2196_v37, 1  ;;  %v2019_v0 = vadd.f32 %v2018_v59, %v2017_v36  ;;  %vm1511_vm14 = vcmp.gt.f32.partialorder %v6513_v25, 0.0 }
 0x264   : > { %v1774_v30 = vmax.f32 %v1772_v57, %v1773_v22  ;;  %vm1414_vm15 = vcmp.gt.f32.partialorder %v1382_v28, 0.0  ;;  %v2147_v32 = vadd.f32 %v2146_v18, %v2145_v62  ;;  %v2028_v31 = vadd.f32 %v2027_v49, %v2026_v6  ;;  %v6514_v18 = vld [vmem:[#allocation38_spill] sm:$0xff]  ;;  %v6515_v49 = vld [vmem:[#allocation37_spill] sm:$0xff] }
 0x265   : > { %v1446_v11 = vmul.f32 0.2, %v1382_v28  ;;  %v2010_v38 = vmul.f32 0.0, %v5487_v58  ;;  %v2198_v23 = vadd.f32 %v2197_v4, %v2196_v37  ;;  %v2020_v40 = vrot.slane %v2019_v0, 2  ;;  %2395 = vperm.xlu1 %4035, %v5496_v63  }
 0x266   : > { %v1767_v12 = vmax.f32 %v1765_v26, %v1766_v55  ;;  %v1406_v56 = vadd.f32 %v5432_v14, %v5453_v2  ;;  %v2029_v36 = vrot.slane %v2028_v31, 1  ;;  %v2185_v57 = vsel %vm1568_vm1, %v5503_v3, 0.0 }
 0x267   : > { %2968 = vperm.xlu0 %4034, %v2258_v43   ;;  %v1602_v22 = vrot.slane %v5601_v15, 1  ;;  %v5614_v62 = vadd.f32 %v2198_v23, %v2010_v38  ;;  %v2021_v51 = vadd.f32 %v2020_v40, %v2019_v0  ;;  %v2186_v7 = vrot.slane %v2185_v57, 4 }
 0x268   : > { %vm1534_vm0 = vcmp.gt.f32.partialorder %v6514_v18, 0.0  ;;  %v1407_v6 = vadd.f32 %v1343_v60, %v5445_v53  ;;  %v2148_v26 = vrot.slane %v2147_v32, 1  ;;  %v1986_v14 = vmul.f32 0.0, %v6508_v27  ;;  %v6516_v27 = vld [vmem:[#allocation47_spill] sm:$0xff] }
 0x269   : > { %v2030_v2 = vadd.f32 %v2029_v36, %v2028_v31  ;;  %v1479_v37 = vsel %vm1415_vm13, %v5581_v1, %v1447_v19  ;;  %v1478_v59 = vsel %vm1414_vm15, %v1382_v28, %v1446_v11  ;;  %v2022_v55 = vrot.slane %v2021_v51, 1  ;;  %2467 = vperm.xlu1 %4035, %v6510_v42  }
 0x26a   : > { %v2187_v43 = vadd.f32 %v2186_v7, %v2185_v57  ;;  %vm1535_vm2 = vcmp.gt.f32.partialorder %v6515_v49, 0.0  ;;  %v1775_v4 = vrot.slane %v1774_v30, 2  ;;  %v1768_v0 = vrot.slane %v1767_v12, 2 }
 0x26b   : > { %2400 = vperm.xlu0 %4034, %v5487_v58   ;;  %v1470_v38 = vmul.f32 0.2, %v1406_v56  ;;  %v5626_v53 = vadd.f32 %v2030_v2, %v1986_v14  ;;  %v5628_v58 = vpop.eup %4124  ;;  %vm1438_vm3 = vcmp.gt.f32.partialorder %v1406_v56, 0.0  ;;  %v1985_v31 = vmul.f32 0.0, %v6516_v27 }
 0x26c   : > { %v2023_v60 = vadd.f32 %v2022_v55, %v2021_v51  ;;  %v2188_v1 = vrot.slane %v2187_v43, 2  ;;  %v5631_v19 = vpop.eup %4126  ;;  %v5635_v28 = vsel %vm1510_vm12, %v1478_v59, -9e+15  ;;  %v1471_v11 = vmul.f32 0.2, %v1407_v6 }
 0x26d   : > { %v2149_v23 = vadd.f32 %v2148_v26, %v2147_v32  ;;  %v2031_v42 = vsel %vm1568_vm1, %v5599_v10, 0.0  ;;  %v5642_v40 = vsel %vm1511_vm14, %v1479_v37, -9e+15  ;;  %vm1439_vm4 = vcmp.gt.f32.partialorder %v1407_v6, 0.0  ;;  %2587 = vperm.xlu1 %4035, %v5503_v3  }
 0x26e   : > { %v5644_v36 = vadd.f32 %v2023_v60, %v1985_v31  ;;  %v2189_v57 = vadd.f32 %v2188_v1, %v2187_v43  ;;  %v1502_v51 = vsel %vm1438_vm3, %v1406_v56, %v1470_v38  ;;  %v2003_v47 = vmul.f32 0.0, %v5319_v24 }
 0x26f   : > { %2472 = vperm.xlu0 %4034, %v6507_v16   ;;  %v2032_v7 = vrot.slane %v2031_v42, 4  ;;  %v2199_v16 = vsel %vm1568_vm1, %v5628_v58, 0.0  ;;  %v1769_v32 = vmax.f32 %v1767_v12, %v1768_v0  ;;  %v1611_v26 = vsel %vm1568_vm1, %v5635_v28, -inf }
 0x270   : > { %v2190_v25 = vrot.slane %v2189_v57, 1  ;;  %v2200_v14 = vrot.slane %v2199_v16, 4  ;;  %v1776_v2 = vmax.f32 %v1774_v30, %v1775_v4  ;;  %v1503_v37 = vsel %vm1439_vm4, %v1407_v6, %v1471_v11 }
 0x271   : > { %v2259_v59 = vadd.f32 %v2149_v23, %v2003_v47  ;;  %v2033_v56 = vadd.f32 %v2032_v7, %v2031_v42  ;;  %v5655_v3 = vsel %vm1534_vm0, %v1502_v51, -9e+15  ;;  %v2009_v24 = vmul.f32 0.0, %v5496_v63 }
 0x272   : > { %v2191_v55 = vadd.f32 %v2190_v25, %v2189_v57  ;;  %v2201_v43 = vadd.f32 %v2200_v14, %v2199_v16  ;;  %v1603_v12 = vmax.f32 %v5601_v15, %v1602_v22  ;;  %v1618_v0 = vsel %vm1568_vm1, %v5642_v40, -inf }
 0x273   : > { %2592 = vperm.xlu0 %4034, %v5490_v13   ;;  %v1612_v38 = vrot.slane %v1611_v26, 4  ;;  %2973 = vperm.xlu1 %4035, %v2259_v59   ;;  %v2034_v30 = vrot.slane %v2033_v56, 2  ;;  %v1770_v6 = vrot.slane %v1769_v32, 1  ;;  %v5663_v13 = vsel %vm1535_vm2, %v1503_v37, -9e+15 }
 0x274   : > { %v5665_v18 = vadd.f32 %v2191_v55, %v2009_v24  ;;  %v2202_v4 = vrot.slane %v2201_v43, 2  ;;  %v1610_v63 = vmax.f32 %v5567_v50, %v1609_v35  ;;  %v1777_v31 = vrot.slane %v1776_v2, 1 }
 0x275   : > { %v1779_v15 = vsel %vm1568_vm1, %v5655_v3, -inf  ;;  %v2035_v22 = vadd.f32 %v2034_v30, %v2033_v56  ;;  %4128 = vpow2.f32 %v5510_v45  ;;  %v1619_v60 = vrot.slane %v1618_v0, 4 }
 0x276   : > { %v2203_v49 = vadd.f32 %v2202_v4, %v2201_v43  ;;  %v6517_v1 = vsub.f32 %v5345_v46, %v5447_v48  ;;  %v1797_v23 = vsub.f32 -inf, %v1603_v12  ;;  %v1786_v42 = vsel %vm1568_vm1, %v5663_v13, -inf  ;;  %v5695_v4 = vpop.permute.xlu1 %2315 }
 0x277   : > { %2275 = vperm.xlu0 %4034, %v6516_v27   ;;  %2285 = vperm.xlu1 %4035, %v5556_v21   ;;  %v2036_v50 = vrot.slane %v2035_v22, 1  ;;  %v1771_v35 = vmax.f32 %v1769_v32, %v1770_v6  ;;  %v1613_v57 = vmax.f32 %v1611_v26, %v1612_v38  ;;  %v1780_v51 = vrot.slane %v1779_v15, 4 }
 0x278   : > { %v1975_v11 = vmul.f32 1.442695, %v6517_v1  ;;  %v2204_v27 = vrot.slane %v2203_v49, 1  ;;  %v1798_v47 = vsub.f32 -inf, %v1610_v63  ;;  %v1778_v7 = vmax.f32 %v1776_v2, %v1777_v31 }
 0x279   : > { %v1987_v45 = vmul.f32 0.0, %v5556_v21  ;;  %v2037_v16 = vadd.f32 %v2036_v50, %v2035_v22  ;;  %v1620_v46 = vmax.f32 %v1618_v0, %v1619_v60  ;;  %v1787_v48 = vrot.slane %v1786_v42, 4 }
 0x27a   : > { %v2011_v25 = vmul.f32 0.0, %v5631_v19  ;;  %v2205_v14 = vadd.f32 %v2204_v27, %v2203_v49  ;;  %v1833_v37 = vmul.f32 1.442695, %v1797_v23  ;;  %v1821_v32 = vsub.f32 -inf, %v1771_v35 }
 0x27b   : > { %2978 = vperm.xlu0 %4034, %v5525_v52   ;;  %2405 = vperm.xlu1 %4035, %v5631_v19   ;;  %v5684_v59 = vadd.f32 %v2037_v16, %v1987_v45  ;;  %v1614_v26 = vrot.slane %v1613_v57, 2  ;;  %v1781_v56 = vmax.f32 %v1779_v15, %v1780_v51  ;;  %4130 = vpow2.f32 %v1975_v11 }
 0x27c   : > { %v5686_v24 = vadd.f32 %v2205_v14, %v2011_v25  ;;  %v1835_v52 = vmul.f32 1.442695, %v1798_v47  ;;  %v1822_v21 = vsub.f32 -inf, %v1778_v7  ;;  %v1621_v2 = vrot.slane %v1620_v46, 2 }
 0x27d   : > { %v1788_v55 = vmax.f32 %v1786_v42, %v1787_v48  ;;  %v1893_v43 = vsub.f32 %v5464_v41, %v1603_v12  ;;  %4132 = vpow2.f32 %v1833_v37  ;;  %v1881_v19 = vmul.f32 1.442695, %v1821_v32 }
 0x27e   : > { %v1615_v38 = vmax.f32 %v1613_v57, %v1614_v26  ;;  %v1782_v30 = vrot.slane %v1781_v56, 2  ;;  %v1894_v6 = vsub.f32 %v5437_v33, %v1610_v63  ;;  %4134 = vpow2.f32 %v1835_v52  ;;  %v5706_v57 = vpop.permute.xlu0 %2330 }
 0x27f   : > { %2290 = vperm.xlu0 %4034, %v5508_v39   ;;  %2477 = vperm.xlu1 %4035, %v5599_v10   ;;  %v5691_v0 = vpop.eup %4128  ;;  %v1883_v31 = vmul.f32 1.442695, %v1822_v21  ;;  %v1622_v15 = vmax.f32 %v1620_v46, %v1621_v2  ;;  %v1789_v22 = vrot.slane %v1788_v55, 2  ;;  %v1929_v60 = vmul.f32 1.442695, %v1893_v43 }
 0x280   : > { %v2178_v41 = vsel %vm1568_vm1, %v6505_v44, 0.0  ;;  %4136 = vpow2.f32 %v1881_v19  ;;  %v1917_v10 = vsub.f32 %v5578_v20, %v1771_v35  ;;  %v1616_v12 = vrot.slane %v1615_v38, 1 }
 0x281   : > { %v1783_v49 = vmax.f32 %v1781_v56, %v1782_v30  ;;  %v1931_v33 = vmul.f32 1.442695, %v1894_v6  ;;  %v2179_v63 = vrot.slane %v2178_v41, 4  ;;  %4138 = vpow2.f32 %v1883_v31 }
 0x282   : > { %v1918_v1 = vsub.f32 %v5560_v61, %v1778_v7  ;;  %v1623_v11 = vrot.slane %v1622_v15, 1  ;;  %v1790_v23 = vmax.f32 %v1788_v55, %v1789_v22  ;;  %4140 = vpow2.f32 %v1929_v60  ;;  %v2523_v26 = vpop.permute.xlu0 %2522 }
 0x283   : > { %2410 = vperm.xlu0 %4034, %v5691_v0   ;;  %2597 = vperm.xlu1 %4035, %v5628_v58   ;;  %v2508_v58 = vpop.permute.xlu1 %2507  ;;  %v2180_v44 = vadd.f32 %v2179_v63, %v2178_v41  ;;  %v1977_v50 = vmul.f32 1.442695, %v1917_v10  ;;  %v1617_v20 = vmax.f32 %v1615_v38, %v1616_v12  ;;  %v1784_v35 = vrot.slane %v1783_v49, 1 }
 0x284   : > { %4142 = vpow2.f32 %v1931_v33  ;;  %v1979_v61 = vmul.f32 1.442695, %v1918_v1  ;;  %v1624_v47 = vmax.f32 %v1622_v15, %v1623_v11  ;;  %v1791_v7 = vrot.slane %v1790_v23, 1 }
 0x285   : > { %v5703_v42 = vpop.eup %4130  ;;  %v2181_v51 = vrot.slane %v2180_v44, 2  ;;  %4144 = vpow2.f32 %v1977_v50  ;;  %v1799_v16 = vsub.f32 -inf, %v1617_v20  ;;  %v1785_v46 = vmax.f32 %v1783_v49, %v1784_v35 }
 0x286   : > { %4146 = vpow2.f32 %v1979_v61  ;;  %v1800_v37 = vsub.f32 -inf, %v1624_v47  ;;  %v1792_v32 = vmax.f32 %v1790_v23, %v1791_v7  ;;  %v2008_v56 = vmul.f32 0.0, %v5368_v5  ;;  %v5729_v41 = vpop.permute.xlu0 %2340 }
 0x287   : > { %2482 = vperm.xlu0 %4034, %v5517_v9   ;;  %2988 = vperm.xlu1 %4035, %v5537_v29   ;;  %v5709_v27 = vpop.eup %4132  ;;  %v2182_v29 = vadd.f32 %v2181_v51, %v2180_v44  ;;  %v5715_v48 = vpop.permute.xlu1 %2325  ;;  %v1837_v2 = vmul.f32 1.442695, %v1799_v16  ;;  %v1823_v55 = vsub.f32 -inf, %v1785_v46  ;;  %v6519_v6 = vunpack.c.l.bf16 %v6496_v54 }
 0x288   : > { %v5712_v45 = vpop.eup %4134  ;;  %v1839_v38 = vmul.f32 1.442695, %v1800_v37  ;;  %v1824_v30 = vsub.f32 -inf, %v1792_v32  ;;  %v1895_v5 = vsub.f32 %v5635_v28, %v1617_v20  ;;  %v1896_v10 = vsub.f32 %v5642_v40, %v1624_v47 }
 0x289   : > { %v2183_v25 = vrot.slane %v2182_v29, 1  ;;  %v2633_v31 = vmul.f32 %v6519_v6, %v2508_v58  ;;  %4148 = vpow2.f32 %v1837_v2  ;;  %v1885_v60 = vmul.f32 1.442695, %v1823_v55  ;;  %v6524_v6 = vld [vmem:[#allocation12_spill] sm:$0xff] }
 0x28a   : > { %v5717_v14 = vpop.eup %4136  ;;  %4150 = vpow2.f32 %v1839_v38  ;;  %v1887_v49 = vmul.f32 1.442695, %v1824_v30  ;;  %v1919_v63 = vsub.f32 %v5655_v3, %v1785_v46  ;;  %v2038_v54 = vsel %vm1568_vm1, %v5517_v9, 0.0  ;;  %v2533_v44 = vpop.permute.xlu0 %2532  ;;  %v6520_v3 = vld [vmem:[#allocation10_spill] sm:$0xff] }
 0x28b   : > { %2602 = vperm.xlu0 %4034, %v5703_v42   ;;  %2295 = vperm.xlu1 %4035, %v5709_v27   ;;  %v2184_v52 = vadd.f32 %v2183_v25, %v2182_v29  ;;  %v5721_v21 = vpop.eup %4138  ;;  %v2518_v15 = vpop.permute.xlu1 %2517  ;;  %v2705_v33 = vrot.slane %v2633_v31, 4  ;;  %v1933_v11 = vmul.f32 1.442695, %v1895_v5  ;;  %4152 = vpow2.f32 %v1885_v60 }
 0x28c   : > { %v4141_v19 = vpop.eup %4140  ;;  %v1935_v28 = vmul.f32 1.442695, %v1896_v10  ;;  %4154 = vpow2.f32 %v1887_v49  ;;  %v1920_v40 = vsub.f32 %v5663_v13, %v1792_v32  ;;  %v2039_v50 = vrot.slane %v2038_v54, 4 }
 0x28d   : > { %v5724_v43 = vadd.f32 %v2184_v52, %v2008_v56  ;;  %v2706_v58 = vadd.f32 %v2705_v33, %v2633_v31  ;;  %v1981_v20 = vmul.f32 1.442695, %v1919_v63  ;;  %v6521_v35 = vunpack.c.h.bf16 %v6520_v3 }
 0x28e   : > { %v4143_v22 = vpop.eup %4142  ;;  %4156 = vpow2.f32 %v1933_v11  ;;  %v6522_v9 = vunpack.c.l.bf16 %v6520_v3  ;;  %v2206_v47 = vsel %vm1568_vm1, %v5703_v42, 0.0  ;;  %v1983_v7 = vmul.f32 1.442695, %v1920_v40 }
 0x28f   : > { %2300 = vperm.xlu0 %4034, %v5712_v45   ;;  %2415 = vperm.xlu1 %4035, %v5717_v14   ;;  %6518 = vst [vmem:[#allocation30_spill] sm:$0xff] %v5724_v43  ;;  %v4145_v12 = vpop.eup %4144  ;;  %v5735_v23 = vpop.permute.xlu1 %2335  ;;  %v2636_v51 = vmul.f32 %v6521_v35, %v2523_v26  ;;  %4158 = vpow2.f32 %v1935_v28  ;;  %v2707_v29 = vrot.slane %v2706_v58, 2  ;;  %v2040_v16 = vadd.f32 %v2039_v50, %v2038_v54 }
 0x290   : > { %v4147_v1 = vpop.eup %4146  ;;  %v2635_v61 = vmul.f32 %v6522_v9, %v2518_v15  ;;  %4160 = vpow2.f32 %v1981_v20  ;;  %v2207_v25 = vrot.slane %v2206_v47, 4  ;;  %v5751_v26 = vpop.permute.xlu0 %2350  ;;  %v2045_v52 = vsel %vm1568_vm1, %v4141_v19, 0.0 }
 0x291   : > { %6523 = vst [vmem:[#allocation39_spill] sm:$0xff] %v5751_v26  ;;  %4162 = vpow2.f32 %v1983_v7  ;;  %v2041_v56 = vrot.slane %v2040_v16, 2  ;;  %v6525_v31 = vunpack.c.h.bf16 %v6524_v6  ;;  %v2052_v5 = vsel %vm1568_vm1, %v4143_v22, 0.0 }
 0x292   : > { %v2717_v32 = vrot.slane %v2635_v61, 4  ;;  %v2208_v55 = vadd.f32 %v2207_v25, %v2206_v47  ;;  %v6526_v60 = vunpack.c.l.bf16 %v6524_v6  ;;  %v2213_v33 = vsel %vm1568_vm1, %v4145_v12, 0.0 }
 0x293   : > { %2420 = vperm.xlu0 %4034, %v5721_v21   ;;  %2487 = vperm.xlu1 %4035, %v4141_v19   ;;  %v5746_v13 = vpop.eup %4148  ;;  %v2528_v46 = vpop.permute.xlu1 %2527  ;;  %v2638_v15 = vmul.f32 %v6525_v31, %v2533_v44  ;;  %v2046_v19 = vrot.slane %v2045_v52, 4  ;;  %v2042_v28 = vadd.f32 %v2041_v56, %v2040_v16  ;;  %v2053_v50 = vrot.slane %v2052_v5, 4 }
 0x294   : > { %v5749_v37 = vpop.eup %4150  ;;  %v2718_v30 = vadd.f32 %v2717_v32, %v2635_v61  ;;  %v2637_v10 = vmul.f32 %v6526_v60, %v2528_v46  ;;  %v2543_v11 = vpop.permute.xlu0 %2542  ;;  %v2209_v44 = vrot.slane %v2208_v55, 2  ;;  %v2441_v20 = vmul.f32 0.0, %v5695_v4 }
 0x295   : > { %v5754_v42 = vpop.eup %4152  ;;  %v2735_v35 = vrot.slane %v2638_v15, 4  ;;  %v5772_v61 = vmul.f32 0.0, %v5706_v57  ;;  %v2047_v7 = vadd.f32 %v2046_v19, %v2045_v52  ;;  %v2043_v16 = vrot.slane %v2042_v28, 1 }
 0x296   : > { %v5758_v38 = vpop.eup %4154  ;;  %v2719_v3 = vrot.slane %v2718_v30, 2  ;;  %v2729_v47 = vrot.slane %v2637_v10, 4  ;;  %v5779_v4 = vmul.f32 0.0, %v5729_v41  ;;  %v2210_v57 = vadd.f32 %v2209_v44, %v2208_v55 }
 0x297   : > { %2492 = vperm.xlu0 %4034, %v4143_v22   ;;  %2607 = vperm.xlu1 %4035, %v4145_v12   ;;  %v5766_v49 = vpop.permute.xlu1 %2345  ;;  %v2220_v22 = vsel %vm1568_vm1, %v4147_v1, 0.0  ;;  %v5775_v12 = vmul.f32 0.0, %v5715_v48  ;;  %v2054_v32 = vadd.f32 %v2053_v50, %v2052_v5  ;;  %v2736_v6 = vadd.f32 %v2735_v35, %v2638_v15 }
 0x298   : > { %6527 = vst [vmem:[#allocation40_spill] sm:$0xff] %v5766_v49  ;;  %v4157_v63 = vpop.eup %4156  ;;  %6528 = vst [vmem:[#allocation8_spill] sm:$0xff] %v5779_v4  ;;  %v2720_v48 = vadd.f32 %v2719_v3, %v2718_v30  ;;  %v5783_v31 = vpop.permute.xlu0 %2360  ;;  %v2730_v60 = vadd.f32 %v2729_v47, %v2637_v10  ;;  %v2048_v19 = vrot.slane %v2047_v7, 2  ;;  %v2044_v5 = vadd.f32 %v2043_v16, %v2042_v28 }
 0x299   : > { %v4159_v40 = vpop.eup %4158  ;;  %6529 = vst [vmem:[#allocation44_spill] sm:$0xff] %v5783_v31  ;;  %v2059_v41 = vsel %vm1568_vm1, %v4157_v63, 0.0  ;;  %v2211_v30 = vrot.slane %v2210_v57, 1  ;;  %v2055_v15 = vrot.slane %v2054_v32, 2  ;;  %v2737_v3 = vrot.slane %v2736_v6, 2 }
 0x29a   : > { %v4161_v9 = vpop.eup %4160  ;;  %v2721_v31 = vrot.slane %v2720_v48, 1  ;;  %vm3397_vm8 = vcmask 1042434   ;;  %vm3400_vm10 = vcmask 1043459   ;;  %vm3403_vm13 = vcmask 1044484  }
 0x29b   : > { %2612 = vperm.xlu0 %4034, %v4147_v1   ;;  %2993 = vperm.xlu1 %4035, %v5563_v17   ;;  %v2723_v17 = vrot.slane %v2636_v51, 4  ;;  %v2066_v1 = vsel %vm1568_vm1, %v4159_v40, 0.0  ;;  %v5781_v25 = vpop.permute.xlu1 %2537  ;;  %v4163_v56 = vpop.eup %4162  ;;  %v2738_v49 = vadd.f32 %v2737_v3, %v2736_v6  ;;  %vm3406_vm14 = vcmask 1045509  }
 0x29c   : > { %v2234_v50 = vsel %vm1568_vm1, %v4163_v56, 0.0  ;;  %vm3409_vm15 = vcmask 1046534   ;;  %vm3412_vm0 = vcmask 1047559  }
 0x29d   : > { %v2724_v2 = vadd.f32 %v2723_v17, %v2636_v51  ;;  %v2214_v51 = vrot.slane %v2213_v33, 4  ;;  %v2221_v17 = vrot.slane %v2220_v22, 4 }
 0x29f   : > { %2983 = vperm.xlu0 %4034, %v5585_v34   ;;  %2305 = vperm.xlu1 %4035, %v5746_v13   ;;  %v2708_v34 = vadd.f32 %v2707_v29, %v2706_v58  ;;  %v2725_v58 = vrot.slane %v2724_v2, 2  ;;  %v2215_v52 = vadd.f32 %v2214_v51, %v2213_v33  ;;  %v2222_v44 = vadd.f32 %v2221_v17, %v2220_v22 }
 0x2a0   : > { %v2060_v51 = vrot.slane %v2059_v41, 4  ;;  %v2212_v17 = vadd.f32 %v2211_v30, %v2210_v57  ;;  %v6532_v30 = vld [vmem:[#allocation11_spill] sm:$0xff] }
 0x2a1   : > { %v2709_v54 = vrot.slane %v2708_v34, 1  ;;  %v2726_v46 = vadd.f32 %v2725_v58, %v2724_v2  ;;  %v2067_v2 = vrot.slane %v2066_v1, 4  ;;  %v2216_v35 = vrot.slane %v2215_v52, 2 }
 0x2a2   : > { %v2223_v47 = vrot.slane %v2222_v44, 2 }
 0x2a3   : > { %2310 = vperm.xlu0 %4034, %v5749_v37   ;;  %2425 = vperm.xlu1 %4035, %v5754_v42   ;;  %v2710_v29 = vadd.f32 %v2709_v54, %v2708_v34  ;;  %v2227_v34 = vsel %vm1568_vm1, %v4161_v9, 0.0  ;;  %v2727_v10 = vrot.slane %v2726_v46, 1  ;;  %v2068_v28 = vadd.f32 %v2067_v2, %v2066_v1 }
 0x2a4   : > { %v2228_v33 = vrot.slane %v2227_v34, 4  ;;  %v2217_v26 = vadd.f32 %v2216_v35, %v2215_v52  ;;  %v2224_v4 = vadd.f32 %v2223_v47, %v2222_v44  ;;  %v5802_v52 = vadd.f32 %v2721_v31, %v2720_v48 }
 0x2a5   : > { %v5787_v54 = vadd.f32 %v2710_v29, %v2441_v20  ;;  %v1988_v20 = vmul.f32 0.0, %v5508_v39  ;;  %v2235_v29 = vrot.slane %v2234_v50, 4  ;;  %v2728_v43 = vadd.f32 %v2727_v10, %v2726_v46 }
 0x2a6   : > { %v2012_v39 = vmul.f32 0.0, %v5691_v0  ;;  %v2069_v1 = vrot.slane %v2068_v28, 2  ;;  %v2739_v46 = vrot.slane %v2738_v49, 1  ;;  %v1989_v31 = vmul.f32 0.0, %v5709_v27 }
 0x2a7   : > { %2430 = vperm.xlu0 %4034, %v5758_v38   ;;  %2497 = vperm.xlu1 %4035, %v4157_v63   ;;  %v2929_v63 = vpop.permute.xlu1 %2928  ;;  %v2244_v16 = vadd.f32 %v2044_v5, %v1988_v20  ;;  %v2860_v5 = vadd.f32 %v2728_v43, %v5772_v61  ;;  %v1990_v27 = vmul.f32 0.0, %v5712_v45 }
 0x2a8   : > { %4164 = vrcp.f32 %v2929_v63  ;;  %v2268_v57 = vadd.f32 %v2212_v17, %v2012_v39  ;;  %v5811_v61 = vadd.f32 %v2739_v46, %v2738_v49  ;;  %v6534_v17 = vld [vmem:[#allocation17_spill] sm:$0xff]  ;;  %v2014_v39 = vmul.f32 0.0, %v5721_v21 }
 0x2ab   : > { %2502 = vperm.xlu0 %4034, %v4159_v40   ;;  %2617 = vperm.xlu1 %4035, %v4161_v9   ;;  %v6530_v40 = vld [vmem:[#allocation16_spill] sm:$0xff]  ;;  %v2731_v9 = vrot.slane %v2730_v60, 2  ;;  %v2924_v63 = vpop.permute.xlu1 %2923 }
 0x2ac   : > { %v6531_v58 = vunpack.c.h.bf16 %v6530_v40  ;;  %4166 = vrcp.f32 %v2924_v63  ;;  %v6533_v35 = vunpack.c.l.bf16 %v6530_v40 }
 0x2ae   : > { %v2640_v55 = vmul.f32 %v6531_v58, %v2543_v11  ;;  %v2049_v11 = vadd.f32 %v2048_v19, %v2047_v7  ;;  %v2229_v58 = vadd.f32 %v2228_v33, %v2227_v34  ;;  %v2732_v19 = vadd.f32 %v2731_v9, %v2730_v60 }
 0x2af   : > { %2622 = vperm.xlu0 %4034, %v4163_v56   ;;  %3008 = vperm.xlu1 %4035, %v5614_v62   ;;  %v5795_v62 = vpop.permute.xlu0 %2552  ;;  %v2056_v56 = vadd.f32 %v2055_v15, %v2054_v32  ;;  %v3116_v15 = vrot.slane %v6532_v30, 1  ;;  %v5806_v33 = vpop.permute.xlu1 %2355 }
 0x2b0   : > { %v2747_v22 = vrot.slane %v2640_v55, 4  ;;  %v2050_v7 = vrot.slane %v2049_v11, 1  ;;  %v2230_v6 = vrot.slane %v2229_v58, 2  ;;  %v2733_v44 = vrot.slane %v2732_v19, 1 }
 0x2b1   : > { %v2057_v32 = vrot.slane %v2056_v56, 1 }
 0x2b2   : > { %v5799_v2 = vadd.f32 %v2747_v22, %v2640_v55  ;;  %v2051_v60 = vadd.f32 %v2050_v7, %v2049_v11  ;;  %v2070_v55 = vadd.f32 %v2069_v1, %v2068_v28  ;;  %v2231_v3 = vadd.f32 %v2230_v6, %v2229_v58  ;;  %v4165_v43 = vpop.eup %4164 }
 0x2b3   : > { %2888 = vperm.xlu0 %4034, %v5626_v53   ;;  %2883 = vperm.xlu1 %4035, %v5644_v36   ;;  %v2061_v53 = vadd.f32 %v2060_v51, %v2059_v41  ;;  %v2236_v36 = vadd.f32 %v2235_v29, %v2234_v50  ;;  %v2939_v34 = vpop.permute.xlu0 %2938  ;;  %v2218_v41 = vrot.slane %v2217_v26, 1  ;;  %v2058_v10 = vadd.f32 %v2057_v32, %v2056_v56  ;;  %v2548_v49 = vpop.permute.xlu1 %2547 }
 0x2b4   : > { %4168 = vrcp.f32 %v2939_v34  ;;  %v2749_v48 = vrot.slane %v5799_v2, 2  ;;  %v5816_v51 = vmul.f32 %v6533_v35, %v5781_v25  ;;  %v3060_v28 = vmul.f32 %v4165_v43, %v5550_v8 }
 0x2b5   : > { %v2062_v0 = vrot.slane %v2061_v53, 2  ;;  %v2237_v50 = vrot.slane %v2236_v36, 2  ;;  %v2219_v20 = vadd.f32 %v2218_v41, %v2217_v26  ;;  %v2071_v22 = vrot.slane %v2070_v55, 1 }
 0x2b6   : > { %v5823_v47 = vadd.f32 %v2733_v44, %v2732_v19  ;;  %v2013_v29 = vmul.f32 0.0, %v5717_v14  ;;  %v6535_v26 = vunpack.c.l.bf16 %v6534_v17  ;;  %v2246_v8 = vadd.f32 %v2058_v10, %v1990_v27  ;;  %v4167_v1 = vpop.eup %4166  ;;  %v6536_v19 = vld [vmem:[#allocation18_spill] sm:$0xff] }
 0x2b7   : > { %2898 = vperm.xlu0 %4034, %v2244_v16   ;;  %3003 = vperm.xlu1 %4035, %v5665_v18   ;;  %v2225_v18 = vrot.slane %v2224_v4, 1  ;;  %v5818_v9 = vpop.permute.xlu0 %2370  ;;  %v2063_v11 = vadd.f32 %v2062_v0, %v2061_v53  ;;  %v2238_v25 = vadd.f32 %v2237_v50, %v2236_v36  ;;  %v5826_v16 = vadd.f32 %v3116_v15, %v3060_v28  ;;  %v5836_v6 = vpop.permute.xlu1 %2365 }
 0x2b8   : > { %v2641_v56 = vmul.f32 %v6535_v26, %v2548_v49  ;;  %v2232_v58 = vrot.slane %v2231_v3, 1  ;;  %v2269_v45 = vadd.f32 %v2219_v20, %v2013_v29  ;;  %v6537_v63 = vunpack.c.h.bf16 %v6536_v19 }
 0x2b9   : > { %v2226_v40 = vadd.f32 %v2225_v18, %v2224_v4  ;;  %v2064_v7 = vrot.slane %v2063_v11, 1  ;;  %v3251_v14 = vmul.f32 1.442695, %v5826_v16  ;;  %v3058_v32 = vmul.f32 %v4167_v1, %v5787_v54 }
 0x2ba   : > { %v2753_v4 = vrot.slane %v2641_v56, 4  ;;  %v1992_v34 = vmul.f32 0.0, %v5749_v37  ;;  %v2239_v41 = vrot.slane %v2238_v25, 1  ;;  %v2233_v44 = vadd.f32 %v2232_v58, %v2231_v3 }
 0x2bb   : > { %3018 = vperm.xlu0 %4034, %v2268_v57   ;;  %2893 = vperm.xlu1 %4035, %v5684_v59   ;;  %v2245_v59 = vadd.f32 %v2051_v60, %v1989_v31  ;;  %v2563_v53 = vpop.permute.xlu0 %2562  ;;  %v2072_v57 = vadd.f32 %v2071_v22, %v2070_v55  ;;  %v2270_v46 = vadd.f32 %v2226_v40, %v2014_v39  ;;  %4170 = vpow2.f32 %v3251_v14  ;;  %v2558_v20 = vpop.permute.xlu1 %2557 }
 0x2bc   : > { %v2644_v36 = vmul.f32 %v6537_v63, %v2563_v53  ;;  %v2754_v21 = vadd.f32 %v2753_v4, %v2641_v56  ;;  %v5840_v15 = vadd.f32 %v6532_v30, %v3058_v32  ;;  %v2015_v55 = vmul.f32 0.0, %v5754_v42 }
 0x2bd   : > { %v2065_v54 = vadd.f32 %v2064_v7, %v2063_v11  ;;  %v2248_v37 = vadd.f32 %v2072_v57, %v1992_v34  ;;  %v1991_v3 = vmul.f32 0.0, %v5746_v13  ;;  %v2240_v28 = vadd.f32 %v2239_v41, %v2238_v25 }
 0x2be   : > { %v4169_v0 = vpop.eup %4168  ;;  %v2771_v60 = vrot.slane %v2644_v36, 4  ;;  %v2755_v31 = vrot.slane %v2754_v21, 2  ;;  %v3249_v43 = vmul.f32 1.442695, %v5840_v15  ;;  %v2271_v42 = vadd.f32 %v2233_v44, %v2015_v55 }
 0x2bf   : > { %3013 = vperm.xlu0 %4034, %v5686_v24   ;;  %2903 = vperm.xlu1 %4035, %v2245_v59   ;;  %v3118_v24 = vrot.slane %v6532_v30, 3  ;;  %v3064_v18 = vmul.f32 %v4169_v0, %v2860_v5  ;;  %v2934_v50 = vpop.permute.xlu0 %2933  ;;  %v6538_v5 = vunpack.c.l.bf16 %v6536_v19  ;;  %v6539_v11 = vunpack.c.h.bf16 %v6534_v17  ;;  %v6541_v0 = vld [vmem:[#allocation30_spill] sm:$0xff] }
 0x2c0   : > { %v2772_v10 = vadd.f32 %v2771_v60, %v2644_v36  ;;  %4172 = vrcp.f32 %v2934_v50  ;;  %v2756_v59 = vadd.f32 %v2755_v31, %v2754_v21  ;;  %v2247_v40 = vadd.f32 %v2065_v54, %v1991_v3  ;;  %v6540_v36 = vld [vmem:[#allocation8_spill] sm:$0xff]  ;;  %v6542_v50 = vld [vmem:[#allocation19_spill] sm:$0xff] }
 0x2c1   : > { %v5844_v35 = vadd.f32 %v3118_v24, %v3064_v18  ;;  %v2643_v22 = vmul.f32 %v6538_v5, %v2558_v20  ;;  %v2642_v49 = vmul.f32 %v6539_v11, %v5795_v62  ;;  %4174 = vpow2.f32 %v3249_v43  ;;  %v2944_v62 = vpop.permute.xlu1 %2943 }
 0x2c2   : > { %v2773_v27 = vrot.slane %v2772_v10, 2  ;;  %v2016_v26 = vmul.f32 0.0, %v5758_v38  ;;  %v2757_v56 = vrot.slane %v2756_v59, 1  ;;  %v5856_v25 = vadd.f32 %v2749_v48, %v5799_v2 }
 0x2c3   : > { %2908 = vperm.xlu0 %4034, %v2246_v8   ;;  %3023 = vperm.xlu1 %4035, %v2269_v45   ;;  %v2949_v29 = vpop.permute.xlu0 %2948  ;;  %v2765_v13 = vrot.slane %v2643_v22, 4  ;;  %v3255_v58 = vmul.f32 1.442695, %v5844_v35  ;;  %v2449_v17 = vmul.f32 0.0, %v5806_v33  ;;  %v2859_v38 = vadd.f32 %v5802_v52, %v5775_v12 }
 0x2c4   : > { %v2774_v8 = vadd.f32 %v2773_v27, %v2772_v10  ;;  %4176 = vrcp.f32 %v2949_v29  ;;  %v2272_v24 = vadd.f32 %v2240_v28, %v2016_v26  ;;  %v2758_v53 = vadd.f32 %v2757_v56, %v2756_v59 }
 0x2c5   : > { %v2766_v39 = vadd.f32 %v2765_v13, %v2643_v22  ;;  %4178 = vrcp.f32 %v2944_v62  ;;  %v2445_v7 = vmul.f32 0.0, %v5735_v23  ;;  %v2741_v1 = vrot.slane %v5816_v51, 4  ;;  %v4171_v14 = vpop.eup %4170  ;;  %v5873_v32 = vpop.permute.xlu1 %2375 }
 0x2c6   : > { %v2775_v45 = vrot.slane %v2774_v8, 1  ;;  %v2759_v2 = vrot.slane %v2642_v49, 4  ;;  %v2452_v33 = vmul.f32 0.0, %v5818_v9  ;;  %v5867_v4 = vadd.f32 %v2758_v53, %v2449_v17 }
 0x2c7   : > { %3028 = vperm.xlu0 %4034, %v2270_v46   ;;  %2918 = vperm.xlu1 %4035, %v2248_v37   ;;  %v5864_v48 = vpop.permute.xlu0 %2380  ;;  %v2767_v63 = vrot.slane %v2766_v39, 2  ;;  %v2862_v57 = vadd.f32 %v5811_v61, %v6540_v36  ;;  %v2861_v12 = vadd.f32 %v5823_v47, %v2445_v7  ;;  %v3597_v52 = vadd.f32 -1.0, %v4171_v14 }
 0x2c8   : > { %v2776_v19 = vadd.f32 %v2775_v45, %v2774_v8  ;;  %v3117_v23 = vrot.slane %v6532_v30, 2  ;;  %v2751_v34 = vrot.slane %v5856_v25, 1  ;;  %4180 = vpow2.f32 %v3255_v58 }
 0x2c9   : > { %v2768_v41 = vadd.f32 %v2767_v63, %v2766_v39  ;;  %v2742_v21 = vadd.f32 %v2741_v1, %v5816_v51  ;;  %vm3210_vm1 = vcmp.gt.f32.partialorder %v5826_v16, 0.0  ;;  %v2760_v44 = vadd.f32 %v2759_v2, %v2642_v49  ;;  %v2568_v20 = vpop.permute.xlu1 %2567  ;;  %v6545_v63 = vld [vmem:[#allocation39_spill] sm:$0xff] }
 0x2ca   : > { %v4173_v46 = vpop.eup %4172  ;;  %v5876_v9 = vadd.f32 %v2776_v19, %v2452_v33  ;;  %v3338_v60 = vsel %vm3210_vm1, %v5826_v16, %v3597_v52  ;;  %v6543_v55 = vunpack.c.h.bf16 %v6542_v50  ;;  %v2451_v10 = vmul.f32 0.0, %v5836_v6  ;;  %v6546_v52 = vld [vmem:[#allocation20_spill] sm:$0xff] }
 0x2cb   : > { %3033 = vperm.xlu0 %4034, %v2271_v42   ;;  %2913 = vperm.xlu1 %4035, %v2247_v40   ;;  %v3062_v61 = vmul.f32 %v4173_v46, %v2859_v38  ;;  %v2573_v47 = vpop.permute.xlu0 %2572  ;;  %v2769_v18 = vrot.slane %v2768_v41, 1  ;;  %v4175_v31 = vpop.eup %4174  ;;  %v3120_v43 = vrot.slane %v6532_v30, 5  ;;  %v3119_v51 = vrot.slane %v6532_v30, 4 }
 0x2cc   : > { %v2646_v54 = vmul.f32 %v6543_v55, %v2573_v47  ;;  %v3596_v28 = vadd.f32 -1.0, %v4175_v31  ;;  %v6544_v16 = vunpack.c.l.bf16 %v6542_v50  ;;  %v3414_v22 = vrot.slane %v3338_v60, 7  ;;  %v6549_v50 = vld [vmem:[#allocation40_spill] sm:$0xff] }
 0x2cd   : > { %v5885_v37 = vadd.f32 %v3117_v23, %v3062_v61  ;;  %v2770_v59 = vadd.f32 %v2769_v18, %v2768_v41  ;;  %vm3209_vm6 = vcmp.gt.f32.partialorder %v5840_v15, 0.0  ;;  %v2743_v29 = vrot.slane %v2742_v21, 2  ;;  %v5901_v17 = vpop.permute.xlu1 %2385 }
 0x2ce   : > { %v4177_v3 = vpop.eup %4176  ;;  %v2783_v27 = vrot.slane %v2646_v54, 4  ;;  %v2645_v5 = vmul.f32 %v6544_v16, %v2568_v20  ;;  %v3337_v40 = vsel %vm3209_vm6, %v5840_v15, %v3596_v28  ;;  %v2761_v53 = vrot.slane %v2760_v44, 2 }
 0x2cf   : > { %3038 = vperm.xlu0 %4034, %v2272_v24   ;;  %2998 = vperm.xlu1 %4035, %v6541_v0   ;;  %v3253_v42 = vmul.f32 1.442695, %v5885_v37  ;;  %v3068_v6 = vmul.f32 %v4177_v3, %v2862_v57  ;;  %v4179_v49 = vpop.eup %4178  ;;  %v5894_v26 = vadd.f32 %v2770_v59, %v2451_v10  ;;  %v5897_v8 = vsel %vm3394_vm5, %v3414_v22, %v3337_v40 }
 0x2d0   : > { %v2784_v56 = vadd.f32 %v2783_v27, %v2646_v54  ;;  %v3066_v58 = vmul.f32 %v4179_v49, %v2861_v12  ;;  %v2777_v24 = vrot.slane %v2645_v5, 4  ;;  %v2752_v2 = vadd.f32 %v2751_v34, %v5856_v25 }
 0x2d1   : > { %4182 = vpow2.f32 %v3253_v42  ;;  %v5899_v13 = vadd.f32 %v3120_v43, %v3068_v6  ;;  %v2744_v14 = vadd.f32 %v2743_v29, %v2742_v21  ;;  %v2578_v19 = vpop.permute.xlu1 %2577  ;;  %v2448_v36 = vmul.f32 0.0, %v6545_v63 }
 0x2d2   : > { %v2785_v62 = vrot.slane %v2784_v56, 2  ;;  %v5904_v39 = vadd.f32 %v3119_v51, %v3066_v58  ;;  %v4181_v38 = vpop.eup %4180  ;;  %v2778_v1 = vadd.f32 %v2777_v24, %v2645_v5  ;;  %v6547_v23 = vunpack.c.l.bf16 %v6546_v52 }
 0x2d3   : > { %v3259_v45 = vmul.f32 1.442695, %v5899_v13  ;;  %v2762_v41 = vadd.f32 %v2761_v53, %v2760_v44  ;;  %v3599_v0 = vadd.f32 -1.0, %v4181_v38  ;;  %v2454_v61 = vmul.f32 0.0, %v5864_v48 }
 0x2d4   : > { %v2786_v7 = vadd.f32 %v2785_v62, %v2784_v56  ;;  %v3257_v33 = vmul.f32 1.442695, %v5904_v39  ;;  %v2779_v12 = vrot.slane %v2778_v1, 2  ;;  %v2647_v46 = vmul.f32 %v6547_v23, %v2578_v19 }
 0x2d5   : > { %v6548_v21 = vunpack.c.h.bf16 %v6546_v52  ;;  %v5917_v55 = vmul.f32 0.0, %v6549_v50  ;;  %v2864_v54 = vadd.f32 %v2752_v2, %v2448_v36  ;;  %v2745_v31 = vrot.slane %v2744_v14, 1 }
 0x2d6   : > { %v2959_v11 = vpop.permute.xlu0 %2958  ;;  %v2787_v57 = vrot.slane %v2786_v7, 1  ;;  %v2780_v25 = vadd.f32 %v2779_v12, %v2778_v1  ;;  %v2789_v34 = vrot.slane %v2647_v46, 4  ;;  %vm3212_vm7 = vcmp.gt.f32.partialorder %v5844_v35, 0.0 }
 0x2d7   : > { %4184 = vrcp.f32 %v2959_v11  ;;  %v2763_v3 = vrot.slane %v2762_v41, 1  ;;  %v3340_v28 = vsel %vm3212_vm7, %v5844_v35, %v3599_v0  ;;  %v2453_v59 = vmul.f32 0.0, %v5873_v32 }
 0x2d8   : > { %4186 = vpow2.f32 %v3259_v45  ;;  %v2788_v60 = vadd.f32 %v2787_v57, %v2786_v7  ;;  %v5920_v10 = vpop.permute.xlu1 %2280  ;;  %v2781_v43 = vrot.slane %v2780_v25, 1  ;;  %v2790_v48 = vadd.f32 %v2789_v34, %v2647_v46 }
 0x2d9   : > { %4188 = vpow2.f32 %v3257_v33  ;;  %vm3211_vm9 = vcmp.gt.f32.partialorder %v5885_v37, 0.0  ;;  %v3122_v11 = vrot.slane %v6532_v30, 7  ;;  %v3418_v62 = vrot.slane %v3340_v28, 5 }
 0x2da   : > { %v5906_v15 = vpop.permute.xlu0 %2390  ;;  %v5922_v44 = vadd.f32 %v2788_v60, %v2454_v61  ;;  %v2782_v22 = vadd.f32 %v2781_v43, %v2780_v25  ;;  %v2791_v42 = vrot.slane %v2790_v48, 2  ;;  %v2746_v2 = vadd.f32 %v2745_v31, %v2744_v14 }
 0x2db   : > { %v4183_v20 = vpop.eup %4182  ;;  %vm3214_vm11 = vcmp.gt.f32.partialorder %v5899_v13, 0.0  ;;  %v2455_v57 = vmul.f32 0.0, %v5901_v17  ;;  %v2764_v52 = vadd.f32 %v2763_v3, %v2762_v41  ;;  %vm3213_vm12 = vcmp.gt.f32.partialorder %v5904_v39, 0.0 }
 0x2dc   : > { %v3598_v5 = vadd.f32 -1.0, %v4183_v20  ;;  %v5929_v56 = vadd.f32 %v2782_v22, %v2453_v59  ;;  %v2792_v35 = vadd.f32 %v2791_v42, %v2790_v48  ;;  %v2456_v17 = vmul.f32 0.0, %v5906_v15 }
 0x2dd   : > { %v3121_v34 = vrot.slane %v6532_v30, 6 }
 0x2de   : > { %v2583_v47 = vpop.permute.xlu0 %2582  ;;  %v3339_v40 = vsel %vm3211_vm9, %v5885_v37, %v3598_v5  ;;  %v2793_v38 = vrot.slane %v2792_v35, 1 }
 0x2df   : > { %v2648_v18 = vmul.f32 %v6548_v21, %v2583_v47  ;;  %v3416_v24 = vrot.slane %v3339_v40, 6  ;;  %v6550_v21 = vld [vmem:[#allocation14_spill] sm:$0xff]  ;;  %v6555_v40 = vld [vmem:[#allocation21_spill] sm:$0xff] }
 0x2e0   : > { %v2964_v29 = vpop.permute.xlu1 %2963  ;;  %v2794_v12 = vadd.f32 %v2793_v38, %v2792_v35  ;;  %v6556_v35 = vunpack.c.l.bf16 %v6555_v40 }
 0x2e1   : > { %v2795_v51 = vrot.slane %v2648_v18, 4  ;;  %v4185_v16 = vpop.eup %4184  ;;  %v3417_v33 = vsel %vm3397_vm8, %v3416_v24, %v5897_v8 }
 0x2e2   : > { %v2954_v27 = vpop.permute.xlu0 %2953  ;;  %v3072_v49 = vmul.f32 %v4185_v16, %v2864_v54  ;;  %v4187_v32 = vpop.eup %4186  ;;  %v3419_v36 = vsel %vm3400_vm10, %v3418_v62, %v3417_v33  ;;  %v5945_v0 = vadd.f32 %v2794_v12, %v2455_v57 }
 0x2e3   : > { %v2796_v6 = vadd.f32 %v2795_v51, %v2648_v18  ;;  %4190 = vrcp.f32 %v2954_v27  ;;  %v3601_v45 = vadd.f32 -1.0, %v4187_v32  ;;  %v4189_v1 = vpop.eup %4188  ;;  %v6551_v18 = vunpack.c.l.bf16 %v6550_v21  ;;  %v6554_v27 = vld [vmem:[#allocation13_spill] sm:$0xff] }
 0x2e4   : > { %4192 = vrcp.f32 %v2964_v29  ;;  %v5934_v37 = vadd.f32 %v3122_v11, %v3072_v49  ;;  %v5936_v19 = vpop.permute.xlu1 %2395  ;;  %v3600_v63 = vadd.f32 -1.0, %v4189_v1  ;;  %v3123_v16 = vrot.slane %v6554_v27, 1 }
 0x2e5   : > { %v2797_v58 = vrot.slane %v2796_v6, 2  ;;  %v3342_v23 = vsel %vm3214_vm11, %v5899_v13, %v3601_v45  ;;  %v2863_v13 = vadd.f32 %v2746_v2, %v5917_v55  ;;  %v6553_v55 = vunpack.c.h.bf16 %v6550_v21 }
 0x2e6   : > { %v2969_v53 = vpop.permute.xlu0 %2968  ;;  %v3341_v8 = vsel %vm3213_vm12, %v5904_v39, %v3600_v63  ;;  %v3263_v47 = vmul.f32 1.442695, %v5934_v37  ;;  %v3422_v25 = vrot.slane %v3342_v23, 3  ;;  %v6552_v39 = vld [vmem:[#allocation44_spill] sm:$0xff]  ;;  %v6557_v1 = vunpack.c.h.bf16 %v6555_v40  ;;  %v6558_v40 = vld [vmem:[#allocation22_spill] sm:$0xff] }
 0x2e7   : > { %v2798_v7 = vadd.f32 %v2797_v58, %v2796_v6  ;;  %4194 = vrcp.f32 %v2969_v53  ;;  %v3420_v61 = vrot.slane %v3341_v8, 4  ;;  %v2450_v31 = vmul.f32 0.0, %v6552_v39 }
 0x2e8   : > { %v2468_v41 = vpop.permute.xlu1 %2467  ;;  %4196 = vpow2.f32 %v3263_v47  ;;  %vm3216_vm2 = vcmp.gt.f32.partialorder %v5934_v37, 0.0 }
 0x2e9   : > { %v2799_v14 = vrot.slane %v2798_v7, 1  ;;  %v2625_v50 = vmul.f32 %v6551_v18, %v2468_v41  ;;  %v3421_v43 = vsel %vm3403_vm13, %v3420_v61, %v3419_v36  ;;  %v2866_v59 = vadd.f32 %v2764_v52, %v2450_v31 }
 0x2ea   : > { %v5942_v46 = vpop.permute.xlu0 %2400  ;;  %v5958_v15 = vsel %vm3406_vm14, %v3422_v25, %v3421_v43 }
 0x2eb   : > { %v2800_v60 = vadd.f32 %v2799_v14, %v2798_v7  ;;  %v2657_v3 = vrot.slane %v2625_v50, 4 }
 0x2ec   : > { %v2588_v5 = vpop.permute.xlu1 %2587 }
 0x2ed   : > { %v4191_v54 = vpop.eup %4190  ;;  %v5955_v48 = vadd.f32 %v2800_v60, %v2456_v17  ;;  %v2658_v11 = vadd.f32 %v2657_v3, %v2625_v50  ;;  %v2649_v58 = vmul.f32 %v6556_v35, %v2588_v5  ;;  %v2434_v50 = vmul.f32 0.0, %v5920_v10 }
 0x2ee   : > { %v2473_v51 = vpop.permute.xlu0 %2472  ;;  %v3070_v20 = vmul.f32 %v4191_v54, %v2863_v13  ;;  %v4193_v30 = vpop.eup %4192  ;;  %v2458_v5 = vmul.f32 0.0, %v5942_v46  ;;  %v6559_v35 = vunpack.c.l.bf16 %v6558_v40 }
 0x2ef   : > { %v2626_v28 = vmul.f32 %v6553_v55, %v2473_v51  ;;  %v3074_v6 = vmul.f32 %v4193_v30, %v5867_v4  ;;  %v2659_v53 = vrot.slane %v2658_v11, 2  ;;  %v2801_v7 = vrot.slane %v2649_v58, 4 }
 0x2f0   : > { %v5963_v42 = vadd.f32 %v3121_v34, %v3070_v20  ;;  %v2457_v30 = vmul.f32 0.0, %v5936_v19 }
 0x2f1   : > { %v4195_v22 = vpop.eup %4194  ;;  %v2663_v49 = vrot.slane %v2626_v28, 4  ;;  %v5970_v24 = vadd.f32 %v6554_v27, %v3074_v6  ;;  %v2660_v36 = vadd.f32 %v2659_v53, %v2658_v11  ;;  %v2802_v52 = vadd.f32 %v2801_v7, %v2649_v58 }
 0x2f2   : > { %v3076_v29 = vmul.f32 %v4195_v22, %v2866_v59  ;;  %v2593_v32 = vpop.permute.xlu0 %2592  ;;  %v3261_v62 = vmul.f32 1.442695, %v5963_v42  ;;  %v2974_v2 = vpop.permute.xlu1 %2973  ;;  %vm3215_vm3 = vcmp.gt.f32.partialorder %v5963_v42, 0.0  ;;  %v3124_v53 = vrot.slane %v6554_v27, 2 }
 0x2f3   : > { %v2664_v38 = vadd.f32 %v2663_v49, %v2626_v28  ;;  %v2650_v4 = vmul.f32 %v6557_v1, %v2593_v32  ;;  %v3265_v33 = vmul.f32 1.442695, %v5970_v24  ;;  %v2661_v8 = vrot.slane %v2660_v36, 1  ;;  %v4197_v41 = vpop.eup %4196 }
 0x2f4   : > { %v5972_v45 = vadd.f32 %v3123_v16, %v3076_v29  ;;  %4198 = vpow2.f32 %v3261_v62  ;;  %v2803_v47 = vrot.slane %v2802_v52, 2  ;;  %v3603_v43 = vadd.f32 -1.0, %v4197_v41 }
 0x2f5   : > { %v2665_v57 = vrot.slane %v2664_v38, 2  ;;  %4200 = vpow2.f32 %v3265_v33  ;;  %v2807_v23 = vrot.slane %v2650_v4, 4  ;;  %v2662_v25 = vadd.f32 %v2661_v8, %v2660_v36 }
 0x2f6   : > { %v3267_v63 = vmul.f32 1.442695, %v5972_v45  ;;  %v2276_v12 = vpop.permute.xlu0 %2275  ;;  %v5978_v61 = vpop.permute.xlu1 %2285  ;;  %v2804_v21 = vadd.f32 %v2803_v47, %v2802_v52  ;;  %v3344_v11 = vsel %vm3216_vm2, %v5934_v37, %v3603_v43  ;;  %vm3217_vm4 = vcmp.gt.f32.partialorder %v5970_v24, 0.0 }
 0x2f7   : > { %v2666_v14 = vadd.f32 %v2665_v57, %v2664_v38  ;;  %v2808_v17 = vadd.f32 %v2807_v23, %v2650_v4  ;;  %v2433_v60 = vmul.f32 0.0, %v2276_v12  ;;  %v3125_v38 = vrot.slane %v6554_v27, 3  ;;  %v6560_v23 = vld [vmem:[#allocation23_spill] sm:$0xff] }
 0x2f8   : > { %4202 = vpow2.f32 %v3267_v63  ;;  %v2805_v51 = vrot.slane %v2804_v21, 1  ;;  %v3426_v33 = vrot.slane %v3344_v11, 1  ;;  %vm3218_vm1 = vcmp.gt.f32.partialorder %v5972_v45, 0.0 }
 0x2f9   : > { %4204 = vrcp.f32 %v2974_v2  ;;  %v2667_v13 = vrot.slane %v2666_v14, 1  ;;  %v2809_v18 = vrot.slane %v2808_v17, 2  ;;  %v5981_v39 = vadd.f32 %v2662_v25, %v2433_v60 }
 0x2fa   : > { %v2979_v34 = vpop.permute.xlu0 %2978  ;;  %v5983_v31 = vpop.permute.xlu1 %2405  ;;  %v2806_v59 = vadd.f32 %v2805_v51, %v2804_v21 }
 0x2fb   : > { %4206 = vrcp.f32 %v2979_v34  ;;  %v2668_v54 = vadd.f32 %v2667_v13, %v2666_v14  ;;  %v2810_v20 = vadd.f32 %v2809_v18, %v2808_v17  ;;  %v6561_v14 = vunpack.c.l.bf16 %v6560_v23 }
 0x2fc   : > { %v5994_v49 = vadd.f32 %v2806_v59, %v2457_v30 }
 0x2fd   : > { %v5985_v3 = vadd.f32 %v2668_v54, %v2434_v50  ;;  %v2811_v10 = vrot.slane %v2810_v20, 1 }
 0x2fe   : > { %v5987_v55 = vpop.permute.xlu0 %2290  ;;  %v4199_v28 = vpop.eup %4198 }
 0x2ff   : > { %v3602_v16 = vadd.f32 -1.0, %v4199_v28  ;;  %v2478_v22 = vpop.permute.xlu1 %2477  ;;  %v4201_v6 = vpop.eup %4200  ;;  %v2812_v29 = vadd.f32 %v2811_v10, %v2810_v20  ;;  %v2435_v28 = vmul.f32 0.0, %v5978_v61 }
 0x300   : > { %v2627_v58 = vmul.f32 %v6559_v35, %v2478_v22  ;;  %v3604_v62 = vadd.f32 -1.0, %v4201_v6  ;;  %v2459_v6 = vmul.f32 0.0, %v5983_v31 }
 0x301   : > { %v3343_v32 = vsel %vm3215_vm3, %v5963_v42, %v3602_v16  ;;  %v6004_v4 = vadd.f32 %v2812_v29, %v2458_v5 }
 0x302   : > { %v4203_v19 = vpop.eup %4202  ;;  %v6002_v46 = vpop.permute.xlu0 %2410  ;;  %v3424_v1 = vrot.slane %v3343_v32, 2  ;;  %v2669_v2 = vrot.slane %v2627_v58, 4 }
 0x303   : > { %v4205_v7 = vpop.eup %4204  ;;  %v3605_v37 = vadd.f32 -1.0, %v4203_v19  ;;  %v2598_v63 = vpop.permute.xlu1 %2597 }
 0x304   : > { %v3078_v42 = vmul.f32 %v4205_v7, %v5894_v26  ;;  %v3425_v57 = vsel %vm3409_vm15, %v3424_v1, %v5958_v15  ;;  %v2670_v52 = vadd.f32 %v2669_v2, %v2627_v58  ;;  %v2651_v8 = vmul.f32 %v6561_v14, %v2598_v63 }
 0x305   : > { %v4207_v36 = vpop.eup %4206  ;;  %v3346_v12 = vsel %vm3218_vm1, %v5972_v45, %v3605_v37  ;;  %v3427_v47 = vsel %vm3412_vm0, %v3426_v33, %v3425_v57  ;;  %v3345_v26 = vsel %vm3217_vm4, %v5970_v24, %v3604_v62  ;;  %v6562_v33 = vunpack.c.h.bf16 %v6558_v40 }
 0x306   : > { %v3428_v17 = vrot.slane %v3346_v12, 7  ;;  %v3187_v60 = vadd.f32 %v3124_v53, %v3078_v42  ;;  %v3080_v41 = vmul.f32 %v4207_v36, %v5876_v9  ;;  %v2483_v13 = vpop.permute.xlu0 %2482  ;;  %v2671_v25 = vrot.slane %v2670_v52, 2  ;;  %3461 = vst [vmem:[%s6017_s6 + $0x8] sm:$0xff] %v3427_v47  ;;  %v6564_v47 = vld [vmem:[#allocation24_spill] sm:$0xff] }
 0x307   : > { %v2813_v34 = vrot.slane %v2651_v8, 4  ;;  %v2989_v18 = vpop.permute.xlu1 %2988  ;;  %v2628_v42 = vmul.f32 %v6562_v33, %v2483_v13 }
 0x308   : > { %v3429_v15 = vsel %vm3394_vm5, %v3428_v17, %v3345_v26  ;;  %v3269_v45 = vmul.f32 1.442695, %v3187_v60  ;;  %v3188_v21 = vadd.f32 %v3125_v38, %v3080_v41  ;;  %v2672_v50 = vadd.f32 %v2671_v25, %v2670_v52 }
 0x309   : > { %v2814_v54 = vadd.f32 %v2813_v34, %v2651_v8  ;;  %4208 = vrcp.f32 %v2989_v18  ;;  %vm3219_vm6 = vcmp.gt.f32.partialorder %v3187_v60, 0.0  ;;  %v2675_v8 = vrot.slane %v2628_v42, 4 }
 0x30a   : > { %4210 = vpow2.f32 %v3269_v45  ;;  %v3271_v43 = vmul.f32 1.442695, %v3188_v21  ;;  %v2603_v9 = vpop.permute.xlu0 %2602  ;;  %v2673_v51 = vrot.slane %v2672_v50, 1  ;;  %vm3220_vm7 = vcmp.gt.f32.partialorder %v3188_v21, 0.0 }
 0x30b   : > { %v2815_v20 = vrot.slane %v2814_v54, 2  ;;  %v6021_v24 = vpop.permute.xlu1 %2295  ;;  %v6565_v17 = vunpack.c.l.bf16 %v6564_v47  ;;  %v3127_v41 = vrot.slane %v6554_v27, 5  ;;  %v2676_v25 = vadd.f32 %v2675_v8, %v2628_v42 }
 0x30c   : > { %4212 = vpow2.f32 %v3271_v43  ;;  %v2674_v30 = vadd.f32 %v2673_v51, %v2672_v50 }
 0x30d   : > { %v2816_v59 = vadd.f32 %v2815_v20, %v2814_v54  ;;  %v2677_v54 = vrot.slane %v2676_v25, 2 }
 0x30e   : > { %v6024_v10 = vpop.permute.xlu0 %2300  ;;  %v6026_v16 = vadd.f32 %v2674_v30, %v2435_v28 }
 0x30f   : > { %v2817_v5 = vrot.slane %v2816_v59, 1  ;;  %v6028_v22 = vpop.permute.xlu1 %2415 }
 0x311   : > { %v2818_v11 = vadd.f32 %v2817_v5, %v2816_v59  ;;  %v3128_v59 = vrot.slane %v6554_v27, 6 }
 0x312   : > { %v6031_v29 = vpop.permute.xlu0 %2420 }
 0x313   : > { %v4209_v35 = vpop.eup %4208  ;;  %v6033_v58 = vadd.f32 %v2818_v11, %v2459_v6  ;;  %v2488_v32 = vpop.permute.xlu1 %2487 }
 0x314   : > { %v4211_v19 = vpop.eup %4210  ;;  %v3084_v61 = vmul.f32 %v4209_v35, %v5922_v44  ;;  %v6563_v44 = vunpack.c.h.bf16 %v6560_v23  ;;  %v3126_v35 = vrot.slane %v6554_v27, 4 }
 0x315   : > { %v3606_v62 = vadd.f32 -1.0, %v4211_v19  ;;  %v6569_v19 = vld [vmem:[#allocation15_spill] sm:$0xff] }
 0x316   : > { %v4213_v53 = vpop.eup %4212  ;;  %v2493_v38 = vpop.permute.xlu0 %2492  ;;  %v2652_v12 = vmul.f32 %v6563_v44, %v2603_v9  ;;  %v6049_v23 = vadd.f32 %v3127_v41, %v3084_v61  ;;  %v6567_v9 = vld [vmem:[#allocation25_spill] sm:$0xff]  ;;  %v3130_v61 = vrot.slane %v6569_v19, 1 }
 0x317   : > { %v3347_v7 = vsel %vm3219_vm6, %v3187_v60, %v3606_v62  ;;  %v3607_v1 = vadd.f32 -1.0, %v4213_v53  ;;  %v2608_v2 = vpop.permute.xlu1 %2607  ;;  %v2629_v60 = vmul.f32 %v6565_v17, %v2488_v32  ;;  %v6568_v51 = vunpack.c.l.bf16 %v6567_v9  ;;  %v6570_v53 = vld [vmem:[#allocation9_spill] sm:$0xff] }
 0x318   : > { %v3430_v37 = vrot.slane %v3347_v7, 6  ;;  %v2819_v13 = vrot.slane %v2652_v12, 4  ;;  %v3275_v28 = vmul.f32 1.442695, %v6049_v23  ;;  %v3111_v7 = vrot.slane %v6570_v53, 3 }
 0x319   : > { %v3348_v31 = vsel %vm3220_vm7, %v3188_v21, %v3607_v1  ;;  %v2681_v34 = vrot.slane %v2629_v60, 4  ;;  %v2653_v20 = vmul.f32 %v6568_v51, %v2608_v2  ;;  %v3132_v1 = vrot.slane %v6569_v19, 3 }
 0x31a   : > { %v3431_v63 = vsel %vm3397_vm8, %v3430_v37, %v3429_v15  ;;  %v3432_v36 = vrot.slane %v3348_v31, 5  ;;  %v2613_v57 = vpop.permute.xlu0 %2612  ;;  %v6566_v15 = vunpack.c.h.bf16 %v6564_v47  ;;  %v2820_v18 = vadd.f32 %v2819_v13, %v2652_v12 }
 0x31b   : > { %v2994_v14 = vpop.permute.xlu1 %2993  ;;  %v2682_v43 = vadd.f32 %v2681_v34, %v2629_v60  ;;  %v2678_v2 = vadd.f32 %v2677_v54, %v2676_v25  ;;  %v2825_v33 = vrot.slane %v2653_v20, 4  ;;  %v6571_v42 = vunpack.c.h.bf16 %v6567_v9 }
 0x31c   : > { %v6042_v52 = vsel %vm3400_vm10, %v3432_v36, %v3431_v63  ;;  %4214 = vrcp.f32 %v2994_v14  ;;  %v2630_v45 = vmul.f32 %v6566_v15, %v2493_v38  ;;  %v2821_v11 = vrot.slane %v2820_v18, 2 }
 0x31d   : > { %v3109_v38 = vrot.slane %v6570_v53, 1  ;;  %v2683_v31 = vrot.slane %v2682_v43, 2  ;;  %v2654_v63 = vmul.f32 %v6571_v42, %v2613_v57  ;;  %v3110_v8 = vrot.slane %v6570_v53, 2 }
 0x31e   : > { %v2984_v40 = vpop.permute.xlu0 %2983  ;;  %v2687_v30 = vrot.slane %v2630_v45, 4  ;;  %v2822_v14 = vadd.f32 %v2821_v11, %v2820_v18  ;;  %v3131_v47 = vrot.slane %v6569_v19, 2  ;;  %v3112_v17 = vrot.slane %v6570_v53, 4 }
 0x31f   : > { %4216 = vrcp.f32 %v2984_v40  ;;  %v6047_v26 = vpop.permute.xlu1 %2305  ;;  %v3113_v57 = vrot.slane %v6570_v53, 5  ;;  %v3133_v13 = vrot.slane %v6569_v19, 4  ;;  %v2684_v25 = vadd.f32 %v2683_v31, %v2682_v43 }
 0x320   : > { %4218 = vpow2.f32 %v3275_v28  ;;  %v2688_v36 = vadd.f32 %v2687_v30, %v2630_v45  ;;  %v2826_v34 = vadd.f32 %v2825_v33, %v2653_v20  ;;  %v2679_v45 = vrot.slane %v2678_v2, 1 }
 0x321   : > { %v2823_v51 = vrot.slane %v2822_v14, 1  ;;  %v6100_v15 = vmul.f32 0.0, %v6028_v22  ;;  %vm3222_vm9 = vcmp.gt.f32.partialorder %v6049_v23, 0.0 }
 0x322   : > { %v6053_v21 = vpop.permute.xlu0 %2310  ;;  %v2689_v18 = vrot.slane %v2688_v36, 2  ;;  %v2680_v33 = vadd.f32 %v2679_v45, %v2678_v2  ;;  %v6575_v2 = vld [vmem:[#allocation27_spill] sm:$0xff] }
 0x323   : > { %v6055_v50 = vpop.permute.xlu1 %2425  ;;  %v2824_v28 = vadd.f32 %v2823_v51, %v2822_v14 }
 0x324   : > { %v2690_v42 = vadd.f32 %v2689_v18, %v2688_v36 }
 0x326   : > { %v6061_v5 = vpop.permute.xlu0 %2430  ;;  %v4215_v6 = vpop.eup %4214 }
 0x327   : > { %v3086_v32 = vmul.f32 %v4215_v6, %v5945_v0  ;;  %v2498_v62 = vpop.permute.xlu1 %2497  ;;  %v2436_v6 = vmul.f32 0.0, %v5987_v55  ;;  %v2437_v55 = vmul.f32 0.0, %v6021_v24  ;;  %v6107_v24 = vmul.f32 0.0, %v6031_v29 }
 0x329   : > { %v4217_v37 = vpop.eup %4216  ;;  %v6071_v44 = vadd.f32 %v3128_v59, %v3086_v32  ;;  %v2685_v32 = vrot.slane %v2684_v25, 1  ;;  %v6109_v51 = vadd.f32 %v2680_v33, %v2436_v6 }
 0x32a   : > { %v3082_v0 = vmul.f32 %v4217_v37, %v5929_v56  ;;  %v2503_v12 = vpop.permute.xlu0 %2502  ;;  %v2831_v56 = vrot.slane %v2654_v63, 4  ;;  %v2827_v37 = vrot.slane %v2826_v34, 2 }
 0x32b   : > { %v3277_v60 = vmul.f32 1.442695, %v6071_v44  ;;  %v2618_v40 = vpop.permute.xlu1 %2617  ;;  %vm3223_vm11 = vcmp.gt.f32.partialorder %v6071_v44, 0.0 }
 0x32c   : > { %v6078_v41 = vadd.f32 %v3126_v35, %v3082_v0  ;;  %v2460_v35 = vmul.f32 0.0, %v6002_v46  ;;  %v2832_v31 = vadd.f32 %v2831_v56, %v2654_v63  ;;  %v6572_v0 = vld [vmem:[#allocation26_spill] sm:$0xff]  ;;  %v4219_v46 = vpop.eup %4218  ;;  %v6576_v63 = vunpack.c.l.bf16 %v6575_v2 }
 0x32d   : > { %4220 = vpow2.f32 %v3277_v60  ;;  %v6573_v60 = vunpack.c.l.bf16 %v6572_v0  ;;  %v6574_v11 = vunpack.c.h.bf16 %v6572_v0  ;;  %v2828_v45 = vadd.f32 %v2827_v37, %v2826_v34 }
 0x32e   : > { %v3273_v54 = vmul.f32 1.442695, %v6078_v41  ;;  %v2623_v9 = vpop.permute.xlu0 %2622  ;;  %v2655_v36 = vmul.f32 %v6576_v63, %v2618_v40  ;;  %v2833_v18 = vrot.slane %v2832_v31, 2  ;;  %v3609_v40 = vadd.f32 -1.0, %v4219_v46 }
 0x32f   : > { %v3009_v43 = vpop.permute.xlu1 %3008  ;;  %v2631_v30 = vmul.f32 %v6573_v60, %v2498_v62  ;;  %v2632_v20 = vmul.f32 %v6574_v11, %v2503_v12  ;;  %v6577_v62 = vunpack.c.h.bf16 %v6575_v2  ;;  %v2691_v12 = vrot.slane %v2690_v42, 1 }
 0x330   : > { %4222 = vpow2.f32 %v3273_v54  ;;  %v6095_v54 = vmul.f32 0.0, %v6024_v10  ;;  %v2686_v10 = vadd.f32 %v2685_v32, %v2684_v25  ;;  %v6112_v11 = vadd.f32 %v2824_v28, %v2460_v35 }
 0x331   : > { %4224 = vrcp.f32 %v3009_v43  ;;  %v2656_v56 = vmul.f32 %v6577_v62, %v2623_v9  ;;  %v2693_v43 = vrot.slane %v2631_v30, 4  ;;  %v2699_v9 = vrot.slane %v2632_v20, 4 }
 0x332   : > { %v2889_v59 = vpop.permute.xlu0 %2888  ;;  %v6115_v0 = vmul.f32 0.0, %v6047_v26  ;;  %v2837_v29 = vrot.slane %v2655_v36, 4  ;;  %v6117_v6 = vadd.f32 %v2686_v10, %v2437_v55  ;;  %v2829_v32 = vrot.slane %v2828_v45, 1 }
 0x333   : > { %4226 = vrcp.f32 %v2889_v59  ;;  %v2884_v14 = vpop.permute.xlu1 %2883  ;;  %v2843_v25 = vrot.slane %v2656_v56, 4  ;;  %v6119_v37 = vadd.f32 %v2833_v18, %v2832_v31  ;;  %v2692_v2 = vadd.f32 %v2691_v12, %v2690_v42 }
 0x334   : > { %4228 = vrcp.f32 %v2884_v14  ;;  %v6122_v28 = vmul.f32 0.0, %v6053_v21  ;;  %v2694_v35 = vadd.f32 %v2693_v43, %v2631_v30  ;;  %v3350_v26 = vsel %vm3222_vm9, %v6049_v23, %v3609_v40 }
 0x335   : > { %v2700_v63 = vadd.f32 %v2699_v9, %v2632_v20  ;;  %vm3221_vm12 = vcmp.gt.f32.partialorder %v6078_v41, 0.0  ;;  %v2838_v31 = vadd.f32 %v2837_v29, %v2655_v36  ;;  %v2844_v14 = vadd.f32 %v2843_v25, %v2656_v56 }
 0x336   : > { %v2899_v22 = vpop.permute.xlu0 %2898  ;;  %v3436_v23 = vrot.slane %v3350_v26, 3  ;;  %v6132_v12 = vadd.f32 %v2829_v32, %v2828_v45  ;;  %v2695_v20 = vrot.slane %v2694_v35, 2 }
 0x337   : > { %v4221_v59 = vpop.eup %4220  ;;  %4230 = vrcp.f32 %v2899_v22  ;;  %v3004_v34 = vpop.permute.xlu1 %3003  ;;  %v2701_v40 = vrot.slane %v2700_v63, 2  ;;  %v2839_v45 = vrot.slane %v2838_v31, 2  ;;  %v2845_v25 = vrot.slane %v2844_v14, 2 }
 0x338   : > { %v3610_v33 = vadd.f32 -1.0, %v4221_v59  ;;  %4232 = vrcp.f32 %v3004_v34  ;;  %v2696_v32 = vadd.f32 %v2695_v20, %v2694_v35 }
 0x339   : > { %v2846_v35 = vadd.f32 %v2845_v25, %v2844_v14 }
 0x33a   : > { %v4223_v60 = vpop.eup %4222  ;;  %v3019_v46 = vpop.permute.xlu0 %3018  ;;  %v3351_v21 = vsel %vm3223_vm11, %v6071_v44, %v3610_v33 }
 0x33b   : > { %v3608_v55 = vadd.f32 -1.0, %v4223_v60  ;;  %v4225_v62 = vpop.eup %4224  ;;  %4234 = vrcp.f32 %v3019_v46  ;;  %v2894_v42 = vpop.permute.xlu1 %2893 }
 0x33c   : > { %v3092_v10 = vmul.f32 %v4225_v62, %v6004_v4  ;;  %4236 = vrcp.f32 %v2894_v42  ;;  %v3438_v4 = vrot.slane %v3351_v21, 2  ;;  %v2463_v42 = vmul.f32 0.0, %v6055_v50 }
 0x33d   : > { %v3349_v30 = vsel %vm3221_vm12, %v6078_v41, %v3608_v55  ;;  %v4227_v18 = vpop.eup %4226  ;;  %v2835_v41 = vrot.slane %v6119_v37, 1 }
 0x33e   : > { %v3434_v43 = vrot.slane %v3349_v30, 4  ;;  %v3014_v22 = vpop.permute.xlu0 %3013  ;;  %v6136_v36 = vadd.f32 %v3130_v61, %v3092_v10  ;;  %v3044_v56 = vmul.f32 %v4227_v18, %v5985_v3  ;;  %v4229_v44 = vpop.eup %4228  ;;  %v2697_v18 = vrot.slane %v2696_v32, 1 }
 0x33f   : > { %4238 = vrcp.f32 %v3014_v22  ;;  %v2904_v59 = vpop.permute.xlu1 %2903  ;;  %v3042_v33 = vmul.f32 %v4229_v44, %v5981_v39  ;;  %v2836_v22 = vadd.f32 %v2835_v41, %v6119_v37 }
 0x340   : > { %v3435_v9 = vsel %vm3403_vm13, %v3434_v43, %v6042_v52  ;;  %v3283_v34 = vmul.f32 1.442695, %v6136_v36  ;;  %v6146_v61 = vadd.f32 %v3109_v38, %v3044_v56  ;;  %4240 = vrcp.f32 %v2904_v59 }
 0x341   : > { %v3437_v29 = vsel %vm3406_vm14, %v3436_v23, %v3435_v9  ;;  %v4231_v3 = vpop.eup %4230  ;;  %v2702_v52 = vadd.f32 %v2701_v40, %v2700_v63  ;;  %v2840_v38 = vadd.f32 %v2839_v45, %v2838_v31  ;;  %v6156_v21 = vadd.f32 %v6570_v53, %v3042_v33 }
 0x342   : > { %v2909_v60 = vpop.permute.xlu0 %2908  ;;  %v6150_v46 = vsel %vm3409_vm15, %v3438_v4, %v3437_v29  ;;  %4242 = vpow2.f32 %v3283_v34  ;;  %v3235_v26 = vmul.f32 1.442695, %v6146_v61  ;;  %v3048_v55 = vmul.f32 %v4231_v3, %v6109_v51  ;;  %v4233_v62 = vpop.eup %4232 }
 0x343   : > { %4244 = vrcp.f32 %v2909_v60  ;;  %v3024_v39 = vpop.permute.xlu1 %3023  ;;  %v3090_v63 = vmul.f32 %v4233_v62, %v5994_v49  ;;  %v2854_v51 = vadd.f32 %v2692_v2, %v6095_v54  ;;  %v3233_v50 = vmul.f32 1.442695, %v6156_v21 }
 0x344   : > { %4246 = vpow2.f32 %v3235_v26  ;;  %v6160_v30 = vadd.f32 %v3111_v7, %v3048_v55  ;;  %v2703_v43 = vrot.slane %v2702_v52, 1  ;;  %v2841_v49 = vrot.slane %v2840_v38, 1 }
 0x345   : > { %v4235_v10 = vpop.eup %4234  ;;  %4248 = vrcp.f32 %v3024_v39  ;;  %v6167_v14 = vadd.f32 %v6569_v19, %v3090_v63  ;;  %v2847_v56 = vrot.slane %v2846_v35, 1  ;;  %v2698_v9 = vadd.f32 %v2697_v18, %v2696_v32 }
 0x346   : > { %v3029_v31 = vpop.permute.xlu0 %3028  ;;  %v4237_v23 = vpop.eup %4236  ;;  %v3239_v20 = vmul.f32 1.442695, %v6160_v30  ;;  %v3096_v7 = vmul.f32 %v4235_v10, %v6112_v11  ;;  %4250 = vpow2.f32 %v3233_v50  ;;  %v2704_v41 = vadd.f32 %v2703_v43, %v2702_v52 }
 0x347   : > { %v3046_v54 = vmul.f32 %v4237_v23, %v6026_v16  ;;  %v2919_v2 = vpop.permute.xlu1 %2918  ;;  %v3281_v44 = vmul.f32 1.442695, %v6167_v14  ;;  %v2877_v16 = vadd.f32 %v6132_v12, %v6100_v15  ;;  %v2842_v25 = vadd.f32 %v2841_v49, %v2840_v38 }
 0x348   : > { %4252 = vpow2.f32 %v3239_v20  ;;  %v6175_v4 = vadd.f32 %v3132_v1, %v3096_v7  ;;  %v2464_v3 = vmul.f32 0.0, %v6061_v5  ;;  %v2848_v32 = vadd.f32 %v2847_v56, %v2846_v35 }
 0x349   : > { %v4239_v40 = vpop.eup %4238  ;;  %v6179_v11 = vadd.f32 %v3110_v8, %v3046_v54  ;;  %4254 = vrcp.f32 %v3029_v31  ;;  %v2878_v33 = vadd.f32 %v2836_v22, %v6107_v24  ;;  %v6194_v60 = vadd.f32 %v2698_v9, %v6115_v0 }
 0x34a   : > { %v3094_v37 = vmul.f32 %v4239_v40, %v6033_v58  ;;  %4256 = vpow2.f32 %v3281_v44  ;;  %v3287_v45 = vmul.f32 1.442695, %v6175_v4  ;;  %v3034_v59 = vpop.permute.xlu0 %3033  ;;  %v4241_v29 = vpop.eup %4240  ;;  %v2856_v26 = vadd.f32 %v2704_v41, %v6122_v28 }
 0x34b   : > { %v3237_v1 = vmul.f32 1.442695, %v6179_v11  ;;  %4258 = vrcp.f32 %v2919_v2  ;;  %v2914_v8 = vpop.permute.xlu1 %2913  ;;  %v3050_v15 = vmul.f32 %v4241_v29, %v6117_v6  ;;  %v2879_v6 = vadd.f32 %v2842_v25, %v2463_v42 }
 0x34c   : > { %v6188_v34 = vadd.f32 %v3131_v47, %v3094_v37  ;;  %v4243_v58 = vpop.eup %4242  ;;  %4260 = vpow2.f32 %v3287_v45  ;;  %v6202_v24 = vadd.f32 %v2848_v32, %v2464_v3  ;;  %vm3202_vm2 = vcmp.gt.f32.partialorder %v6146_v61, 0.0 }
 0x34d   : > { %v4245_v12 = vpop.eup %4244  ;;  %4262 = vpow2.f32 %v3237_v1  ;;  %v6200_v55 = vadd.f32 %v3112_v17, %v3050_v15  ;;  %v3613_v38 = vadd.f32 -1.0, %v4243_v58  ;;  %vm3226_vm3 = vcmp.gt.f32.partialorder %v6136_v36, 0.0 }
 0x34e   : > { %v3285_v52 = vmul.f32 1.442695, %v6188_v34  ;;  %v4247_v47 = vpop.eup %4246  ;;  %v3052_v5 = vmul.f32 %v4245_v12, %v2854_v51  ;;  %4264 = vrcp.f32 %v3034_v59  ;;  %v3039_v35 = vpop.permute.xlu0 %3038  ;;  %vm3201_vm4 = vcmp.gt.f32.partialorder %v6156_v21, 0.0 }
 0x34f   : > { %v4249_v62 = vpop.eup %4248  ;;  %v3589_v39 = vadd.f32 -1.0, %v4247_v47  ;;  %v3241_v0 = vmul.f32 1.442695, %v6200_v55  ;;  %v2999_v10 = vpop.permute.xlu1 %2998  ;;  %v3354_v23 = vsel %vm3226_vm3, %v6136_v36, %v3613_v38  ;;  %vm3204_vm1 = vcmp.gt.f32.partialorder %v6160_v30, 0.0 }
 0x350   : > { %4266 = vpow2.f32 %v3285_v52  ;;  %v6208_v28 = vadd.f32 %v3113_v57, %v3052_v5  ;;  %v4251_v17 = vpop.eup %4250  ;;  %v3098_v42 = vmul.f32 %v4249_v62, %v2877_v16  ;;  %v3442_v40 = vrot.slane %v3354_v23, 7 }
 0x351   : > { %v3330_v63 = vsel %vm3202_vm2, %v6146_v61, %v3589_v39  ;;  %4268 = vrcp.f32 %v2914_v8  ;;  %v3588_v50 = vadd.f32 -1.0, %v4251_v17  ;;  %vm3225_vm6 = vcmp.gt.f32.partialorder %v6167_v14, 0.0 }
 0x352   : > { %v4253_v51 = vpop.eup %4252  ;;  %v3393_v18 = vrot.slane %v3330_v63, 7  ;;  %4270 = vpow2.f32 %v3241_v0  ;;  %v3243_v57 = vmul.f32 1.442695, %v6208_v28  ;;  %v6217_v43 = vadd.f32 %v3133_v13, %v3098_v42 }
 0x353   : > { %v4255_v31 = vpop.eup %4254  ;;  %4272 = vrcp.f32 %v3039_v35  ;;  %v3329_v20 = vsel %vm3201_vm4, %v6156_v21, %v3588_v50  ;;  %v3591_v54 = vadd.f32 -1.0, %v4253_v51  ;;  %v6578_v56 = vrot.slane %v6569_v19, 5 }
 0x354   : > { %v4257_v61 = vpop.eup %4256  ;;  %v3100_v7 = vmul.f32 %v4255_v31, %v2878_v33  ;;  %4274 = vrcp.f32 %v2999_v10  ;;  %v3395_v49 = vsel %vm3394_vm5, %v3393_v18, %v3329_v20  ;;  %v3289_v13 = vmul.f32 1.442695, %v6217_v43 }
 0x355   : > { %v4259_v22 = vpop.eup %4258  ;;  %v3612_v2 = vadd.f32 -1.0, %v4257_v61  ;;  %4276 = vpow2.f32 %v3243_v57  ;;  %vm3228_vm7 = vcmp.gt.f32.partialorder %v6175_v4, 0.0  ;;  %vm3203_vm9 = vcmp.gt.f32.partialorder %v6179_v11, 0.0 }
 0x356   : > { %v4261_v36 = vpop.eup %4260  ;;  %v6226_v44 = vadd.f32 %v6578_v56, %v3100_v7  ;;  %v3056_v16 = vmul.f32 %v4259_v22, %v2856_v26  ;;  %4278 = vpow2.f32 %v3289_v13  ;;  %v3332_v25 = vsel %vm3204_vm1, %v6160_v30, %v3591_v54 }
 0x357   : > { %v4263_v21 = vpop.eup %4262  ;;  %v3353_v9 = vsel %vm3225_vm6, %v6167_v14, %v3612_v2  ;;  %v3615_v37 = vadd.f32 -1.0, %v4261_v36  ;;  %v6579_v14 = vrot.slane %v6570_v53, 7  ;;  %vm3205_vm11 = vcmp.gt.f32.partialorder %v6200_v55, 0.0 }
 0x358   : > { %v4265_v41 = vpop.eup %4264  ;;  %v3443_v45 = vsel %vm3394_vm5, %v3442_v40, %v3353_v9  ;;  %v3590_v59 = vadd.f32 -1.0, %v4263_v21  ;;  %v3291_v1 = vmul.f32 1.442695, %v6226_v44  ;;  %vm3227_vm5 = vcmp.gt.f32.partialorder %v6188_v34, 0.0 }
 0x359   : > { %v6238_v8 = vadd.f32 %v6579_v14, %v3056_v16  ;;  %v3102_v58 = vmul.f32 %v4265_v41, %v2879_v6  ;;  %v3356_v3 = vsel %vm3228_vm7, %v6175_v4, %v3615_v37  ;;  %v3399_v47 = vrot.slane %v3332_v25, 5 }
 0x35a   : > { %v4267_v29 = vpop.eup %4266  ;;  %v3331_v32 = vsel %vm3203_vm9, %v6179_v11, %v3590_v59  ;;  %4280 = vpow2.f32 %v3291_v1  ;;  %v6580_v5 = vrot.slane %v6569_v19, 6  ;;  %v3446_v6 = vrot.slane %v3356_v3, 5 }
 0x35b   : > { %v3614_v15 = vadd.f32 -1.0, %v4267_v29  ;;  %v4269_v12 = vpop.eup %4268  ;;  %v3396_v33 = vrot.slane %v3331_v32, 6  ;;  %v3247_v30 = vmul.f32 1.442695, %v6238_v8  ;;  %v6581_v42 = vrot.slane %v6570_v53, 6 }
 0x35c   : > { %v4271_v52 = vpop.eup %4270  ;;  %v3199_v62 = vadd.f32 %v6580_v5, %v3102_v58  ;;  %v3054_v4 = vmul.f32 %v4269_v12, %v6194_v60  ;;  %vm3206_vm12 = vcmp.gt.f32.partialorder %v6208_v28, 0.0  ;;  %v6582_v61 = vrot.slane %v6569_v19, 7 }
 0x35d   : > { %v3355_v26 = vsel %vm3227_vm5, %v6188_v34, %v3614_v15  ;;  %v4273_v11 = vpop.eup %4272  ;;  %v3398_v38 = vsel %vm3397_vm8, %v3396_v33, %v3395_v49  ;;  %v3592_v0 = vadd.f32 -1.0, %v4271_v52  ;;  %4282 = vpow2.f32 %v3247_v30 }
 0x35e   : > { %v3444_v39 = vrot.slane %v3355_v26, 6  ;;  %v4275_v35 = vpop.eup %4274  ;;  %v3401_v17 = vsel %vm3400_vm10, %v3399_v47, %v3398_v38  ;;  %v3293_v63 = vmul.f32 1.442695, %v3199_v62  ;;  %v3175_v10 = vadd.f32 %v6581_v42, %v3054_v4 }
 0x35f   : > { %v4277_v34 = vpop.eup %4276  ;;  %v3333_v60 = vsel %vm3205_vm11, %v6200_v55, %v3592_v0  ;;  %v3104_v18 = vmul.f32 %v4273_v11, %v6202_v24  ;;  %v3088_v50 = vmul.f32 %v4275_v35, %v5955_v48  ;;  %v6583_v7 = vrot.slane %v6554_v27, 7 }
 0x360   : > { %v3445_v51 = vsel %vm3397_vm8, %v3444_v39, %v3443_v45  ;;  %v3402_v31 = vrot.slane %v3333_v60, 4  ;;  %v3593_v23 = vadd.f32 -1.0, %v4277_v34  ;;  %4284 = vpow2.f32 %v3293_v63  ;;  %v4279_v49 = vpop.eup %4278 }
 0x361   : > { %v3447_v57 = vsel %vm3400_vm10, %v3446_v6, %v3445_v51  ;;  %v3245_v53 = vmul.f32 1.442695, %v3175_v10  ;;  %v3200_v20 = vadd.f32 %v6582_v61, %v3104_v18  ;;  %v3192_v22 = vadd.f32 %v6583_v7, %v3088_v50 }
 0x362   : > { %v3404_v55 = vsel %vm3403_vm13, %v3402_v31, %v3401_v17  ;;  %v3334_v24 = vsel %vm3206_vm12, %v6208_v28, %v3593_v23  ;;  %v3616_v54 = vadd.f32 -1.0, %v4279_v49  ;;  %vm3229_vm8 = vcmp.gt.f32.partialorder %v6217_v43, 0.0 }
 0x363   : > { %v3405_v48 = vrot.slane %v3334_v24, 3  ;;  %4286 = vpow2.f32 %v3245_v53  ;;  %v3295_v2 = vmul.f32 1.442695, %v3200_v20  ;;  %v3279_v36 = vmul.f32 1.442695, %v3192_v22 }
 0x364   : > { %v4281_v40 = vpop.eup %4280  ;;  %v3357_v19 = vsel %vm3229_vm8, %v6217_v43, %v3616_v54  ;;  %vm3230_vm10 = vcmp.gt.f32.partialorder %v6226_v44, 0.0  ;;  %vm3231_vm2 = vcmp.gt.f32.partialorder %v3199_v62, 0.0  ;;  %vm3208_vm3 = vcmp.gt.f32.partialorder %v6238_v8, 0.0 }
 0x365   : > { %v3407_v13 = vsel %vm3406_vm14, %v3405_v48, %v3404_v55  ;;  %v3448_v56 = vrot.slane %v3357_v19, 4  ;;  %v3617_v27 = vadd.f32 -1.0, %v4281_v40  ;;  %4288 = vpow2.f32 %v3295_v2 }
 0x366   : > { %4290 = vpow2.f32 %v3279_v36  ;;  %vm3207_vm4 = vcmp.gt.f32.partialorder %v3175_v10, 0.0 }
 0x367   : > { %v4283_v21 = vpop.eup %4282  ;;  %v3449_v28 = vsel %vm3403_vm13, %v3448_v56, %v3447_v57  ;;  %v3358_v9 = vsel %vm3230_vm10, %v6226_v44, %v3617_v27  ;;  %vm3232_vm13 = vcmp.gt.f32.partialorder %v3200_v20, 0.0 }
 0x368   : > { %v3450_v37 = vrot.slane %v3358_v9, 3  ;;  %v3595_v45 = vadd.f32 -1.0, %v4283_v21 }
 0x36a   : > { %v4285_v16 = vpop.eup %4284  ;;  %v3451_v41 = vsel %vm3406_vm14, %v3450_v37, %v3449_v28  ;;  %v3336_v1 = vsel %vm3208_vm3, %v6238_v8, %v3595_v45  ;;  %vm3224_vm14 = vcmp.gt.f32.partialorder %v3192_v22, 0.0 }
 0x36b   : > { %v3618_v59 = vadd.f32 -1.0, %v4285_v16  ;;  %v3411_v12 = vrot.slane %v3336_v1, 1 }
 0x36d   : > { %v4287_v29 = vpop.eup %4286  ;;  %v3359_v43 = vsel %vm3231_vm2, %v3199_v62, %v3618_v59 }
 0x36e   : > { %v3594_v25 = vadd.f32 -1.0, %v4287_v29  ;;  %v3452_v3 = vrot.slane %v3359_v43, 2 }
 0x36f   : > { %v4289_v14 = vpop.eup %4288 }
 0x370   : > { %v3335_v58 = vsel %vm3207_vm4, %v3175_v10, %v3594_v25  ;;  %v4291_v44 = vpop.eup %4290  ;;  %v3619_v15 = vadd.f32 -1.0, %v4289_v14  ;;  %v3453_v5 = vsel %vm3409_vm15, %v3452_v3, %v3451_v41 }
 0x371   : > { %v3408_v32 = vrot.slane %v3335_v58, 2  ;;  %v3611_v33 = vadd.f32 -1.0, %v4291_v44 }
 0x372   : > { %v3360_v52 = vsel %vm3232_vm13, %v3200_v20, %v3619_v15 }
 0x373   : > { %v3410_v30 = vsel %vm3409_vm15, %v3408_v32, %v3407_v13  ;;  %v3454_v47 = vrot.slane %v3360_v52, 1  ;;  %v3352_v26 = vsel %vm3224_vm14, %v3192_v22, %v3611_v33 }
 0x374   : > { %v3413_v8 = vsel %vm3412_vm0, %v3411_v12, %v3410_v30  ;;  %v3440_v62 = vrot.slane %v3352_v26, 1 }
 0x375   : > { %3460 = vst [vmem:[%s6017_s6] sm:$0xff] %v3413_v8  ;;  %v3455_v4 = vsel %vm3412_vm0, %v3454_v47, %v3453_v5 }
 0x376   : > { %3463 = vst [vmem:[%s6017_s6 + $0x18] sm:$0xff] %v3455_v4  ;;  %v3441_v11 = vsel %vm3412_vm0, %v3440_v62, %v6150_v46 }
 0x377   : > { %3462 = vst [vmem:[%s6017_s6 + $0x10] sm:$0xff] %v3441_v11 }
 0x378   : > { %4335 = shalt.err (!%p4332_p4)
}
 0x379   : > { %s4336_s5 = scalar_lea.hbm %s6285_s19, 512  ;;  %s4340_s8 = scalar_lea.hbm %s6340_s4, 1024 }
 0x37a   : > { %p4337_p5 = scmp.ne.s32.totalorder %s6285_s19, %s4336_s5  ;;  %p4341_p1 = scmp.lt.u32.totalorder %s6285_s19, %s6340_s4 }
 0x37b   : > { %p4342_p3 = scmp.lt.u32.totalorder %s4340_s8, %s4336_s5  ;;  %p4344_p6 = scmp.lt.u32.totalorder %s4336_s5, %s6285_s19 }
 0x37c   : > { %p4338_p7 = pnand %p4337_p5, %p6584_p12 }
 0x37d   : > { %p4343_p11 = por %p4342_p3, %p4341_p1 }
 0x37e   : > { %p4339_p9 = pneg %p4338_p7 }
 0x37f   : > { %p4345_p13 = por %p4344_p6, %p4343_p11 }
 0x381   : > { %p4346_p8 = pnand %p4345_p13, %p4339_p9 }
 0x383   : > { %4349 = shalt.err (!%p4346_p8)
}
 0x384   : > { %s4397_s6 = smov 128   ;;  %s4398_s14 = smov 8  }
 0x385   : > { %3983 = dma.vmem_to_hbm [thread:$0]  (%p6584_p12), %s6287_s20, 512, %s6285_s19, %s3465_s23, %s4397_s6, %s4397_s6, %s4398_s14  }
 0x386 PF: > { %s3493_s11 = sand.u32 1, %s4376_s15   ;;  %p6585_p10 = scmp.ne.s32.totalorder %s6439_s28, 0 }
 0x387   : > { %p6586_p0 = scmp.ge.s32.totalorder %s4388_s18, 2  ;;  %s3494_s10 = scalar_lea.sflag [#allocation4], %s3493_s11 }
 0x389   : > { %p3990_p2 = pnand %p6586_p0, %p6585_p10 }
 0x38b   : > { %4371 = dma.done.wait (!%p3990_p2), %s3494_s10, 512  }
 0x38c   : > { %4373 = vsyncadd (!%p3990_p2), %s3494_s10, 4294966784  ;;  %p17_p4 = scmp.ge.s32.totalorder %s4449_s21, 4   ;;  %s6587_s15 = smov %s4380_s16 }
 0x38d   : > { %s6588_s16 = smov %s4384_s17  ;;  %s6589_s17 = smov %s4461_s24 }
 0x38e   : > { %s6590_s18 = smov %s4449_s21  ;;  %19 = sbr.rel (!%p17_p4) target bundleno = 5 (0x5), region = 87 }
 0x395   :  { %3499 = vsyncpa [#allocation3], 1 }
 0x396   :  { %3501 = vsyncpa [#allocation3 + $0x1], 1 }
 0x397   :  { %3502 = vsyncpa [#allocation4], 1 }
 0x398   :  { %3504 = vsyncpa [#allocation4 + $0x1], 1 }

</bundles_post_ra>
